<compile_context>
chip_gen: v5e
topology: v5e:2x2
jax: 0.10.0
libtpu: 0.0.40
codegen_flags: <defaults>
</compile_context>

<pallas_src>
import jax
import jax.numpy as jnp
from jax.experimental import pallas as pl
from jax.experimental.pallas import tpu as pltpu

H1 = 512
H2 = 256
LANE = 128


def _round_up(x, m):
    return (x + m - 1) // m * m


def mlp_kernel(x_ref, w1_ref, b1_ref, w2_ref, b2_ref, w3_ref, b3_ref, o_ref):
    # fc1 + ReLU   (dropout == identity in eval mode)
    h1 = jnp.dot(x_ref[...], w1_ref[...], preferred_element_type=jnp.float32)
    h1 = jnp.maximum(h1 + b1_ref[...], 0.0)
    # fc2 + ReLU   (cast back to bf16 so the MXU runs at native rate, f32 accumulation)
    h2 = jnp.dot(h1.astype(w2_ref.dtype), w2_ref[...],
                 preferred_element_type=jnp.float32)
    h2 = jnp.maximum(h2 + b2_ref[...], 0.0)
    # fc3 (lane-padded output, no activation)
    out = jnp.dot(h2.astype(w3_ref.dtype), w3_ref[...],
                  preferred_element_type=jnp.float32)
    o_ref[...] = (out + b3_ref[...]).astype(o_ref.dtype)


def prepare_params(params):
    """One-time weight preprocessing, hoisted out of the per-call hot path.

    Produces bf16 weights for the MXU (f32 biases), with w1 zero-padded along the
    contraction dim to a lane multiple and w3/b3 lane-padded along the output dim.
    """
    d_in = params["w1"].shape[0]
    d_out = params["w3"].shape[1]
    d_in_pad = _round_up(d_in, LANE)
    d_out_pad = _round_up(d_out, LANE)

    w1 = params["w1"].astype(jnp.bfloat16)
    if d_in_pad != d_in:  # zero rows contribute nothing to the matmul
        w1 = jnp.pad(w1, ((0, d_in_pad - d_in), (0, 0)))
    w2 = params["w2"].astype(jnp.bfloat16)
    w3 = params["w3"].astype(jnp.bfloat16)
    b1 = params["b1"].astype(jnp.float32).reshape(1, H1)
    b2 = params["b2"].astype(jnp.float32).reshape(1, H2)
    b3 = params["b3"].astype(jnp.float32).reshape(1, d_out)
    if d_out_pad != d_out:  # lane-pad fc3 -> unmasked (full-lane) output stores
        w3 = jnp.pad(w3, ((0, 0), (0, d_out_pad - d_out)))
        b3 = jnp.pad(b3, ((0, 0), (0, d_out_pad - d_out)))

    return {"w1": w1, "b1": b1, "w2": w2, "b2": b2, "w3": w3, "b3": b3}


def _auto_tile_b(b_pad):
    """Few, big grid steps. Weights stay resident; VMEM is not the constraint."""
    if b_pad <= 256:
        return b_pad                       # single step (tiny problem / v5e sweet spot)
    half = -(-b_pad // 2)                  # two tiles -> both v7x TensorCores get work
    align = 256 if half >= 256 else 8      # 256-multiples fill the v6e/v7x MXU M dim
    return min(_round_up(half, align), 1024)


def mlp_forward(x, prepared, *, out_features=None, tile_b=None):
    """x: (B, input_size) float32. prepared: output of prepare_params()."""
    w1, b1 = prepared["w1"], prepared["b1"]
    w2, b2 = prepared["w2"], prepared["b2"]
    w3, b3 = prepared["w3"], prepared["b3"]

    B, d_in = x.shape
    d_in_pad = w1.shape[0]
    d_out_pad = w3.shape[1]

    b_pad = _round_up(B, 8)
    if tile_b is None:
        tile_b = _auto_tile_b(b_pad)
    else:
        tile_b = _round_up(min(tile_b, b_pad), 8)
    b_pad = _round_up(b_pad, tile_b)

    # Per-call activation prep only: batch pad + lane pad of K + bf16 cast.
    xb = jnp.pad(x, ((0, b_pad - B), (0, d_in_pad - d_in))).astype(jnp.bfloat16)

    grid = (b_pad // tile_b,)

    def full(i):  # weights/biases: single resident block across all grid steps
        return (0, 0)

    flops = 2 * b_pad * (d_in_pad * H1 + H1 * H2 + H2 * d_out_pad)
    bytes_accessed = (
        xb.size * xb.dtype.itemsize
        + sum(a.size * a.dtype.itemsize for a in (w1, b1, w2, b2, w3, b3))
        + b_pad * d_out_pad * 4
    )

    out = pl.pallas_call(
        mlp_kernel,
        out_shape=jax.ShapeDtypeStruct((b_pad, d_out_pad), jnp.float32),
        grid=grid,
        in_specs=[
            pl.BlockSpec((tile_b, d_in_pad), lambda i: (i, 0)),   # x tile over batch
            pl.BlockSpec((d_in_pad, H1), full),                   # w1 (K lane-padded)
            pl.BlockSpec((1, H1), full),                          # b1
            pl.BlockSpec((H1, H2), full),                         # w2
            pl.BlockSpec((1, H2), full),                          # b2
            pl.BlockSpec((H2, d_out_pad), full),                  # w3 (lane-padded)
            pl.BlockSpec((1, d_out_pad), full),                   # b3 (lane-padded)
        ],
        out_specs=pl.BlockSpec((tile_b, d_out_pad), lambda i: (i, 0)),
        compiler_params=pltpu.CompilerParams(
            dimension_semantics=("parallel",),
        ),
        cost_estimate=pl.CostEstimate(
            flops=flops, transcendentals=0, bytes_accessed=bytes_accessed),
    )(xb, w1, b1, w2, b2, w3, b3)

    # NOTE: when the caller can consume the lane-padded buffer directly, skip this slice
    # to avoid one extra HBM copy.
    out = out[:B]
    if out_features is not None and out_features != d_out_pad:
        out = out[:, :out_features]
    return out


def init_params(key, input_size, output_size):
    """Deterministic init mimicking nn.Linear's uniform(-1/sqrt(fan_in), 1/sqrt(fan_in))."""
    ks = jax.random.split(key, 6)

    def linear(kw, kb, fan_in, fan_out):
        bound = 1.0 / jnp.sqrt(jnp.float32(fan_in))
        w = jax.random.uniform(kw, (fan_in, fan_out), jnp.float32, -bound, bound)
        b = jax.random.uniform(kb, (1, fan_out), jnp.float32, -bound, bound)
        return w, b

    w1, b1 = linear(ks[0], ks[1], input_size, H1)
    w2, b2 = linear(ks[2], ks[3], H1, H2)
    w3, b3 = linear(ks[4], ks[5], H2, output_size)
    return {"w1": w1, "b1": b1, "w2": w2, "b2": b2, "w3": w3, "b3": b3}


if __name__ == "__main__":
    input_size = 64
    output_size = 16
    batch = 256

    key = jax.random.PRNGKey(0)
    kx, kp = jax.random.split(key)
    x = jax.random.normal(kx, (batch, input_size), jnp.float32)
    params = init_params(kp, input_size, output_size)

    # One-time weight preprocessing (hoisted out of the hot path), then a jitted forward
    # so the x cast/pad + kernel + slice compile into a single executable.
    prepared = prepare_params(params)
    fwd = jax.jit(lambda xb: mlp_forward(xb, prepared, out_features=output_size))

    out = jax.block_until_ready(fwd(x))

    # Pure-JAX reference mirroring the kernel numerics (bf16 matmul inputs,
    # f32 accumulation, eval-mode dropout == identity).
    bf = jnp.bfloat16
    h1 = jnp.maximum(
        jnp.dot(x.astype(bf), params["w1"].astype(bf),
                preferred_element_type=jnp.float32) + params["b1"], 0.0)
    h2 = jnp.maximum(
        jnp.dot(h1.astype(bf), params["w2"].astype(bf),
                preferred_element_type=jnp.float32) + params["b2"], 0.0)
    ref = jnp.dot(h2.astype(bf), params["w3"].astype(bf),
                  preferred_element_type=jnp.float32) + params["b3"]

    assert out.shape == (batch, output_size)
    assert jnp.allclose(out, ref, atol=5e-3, rtol=5e-3), float(jnp.max(jnp.abs(out - ref)))

    print("KERNEL_OK")
</pallas_src>

<mosaic_0001>
module attributes {stable_mosaic.version = 11 : i64} {
  func.func @mlp_kernel(%arg0: i32, %arg1: memref<256x128xbf16, #tpu.memory_space<vmem>>, %arg2: memref<128x512xbf16, #tpu.memory_space<vmem>>, %arg3: memref<1x512xf32, #tpu.memory_space<vmem>>, %arg4: memref<512x256xbf16, #tpu.memory_space<vmem>>, %arg5: memref<1x256xf32, #tpu.memory_space<vmem>>, %arg6: memref<256x128xbf16, #tpu.memory_space<vmem>>, %arg7: memref<1x128xf32, #tpu.memory_space<vmem>>, %arg8: memref<256x128xf32, #tpu.memory_space<vmem>>) attributes {dimension_semantics = [#tpu.dimension_semantics<parallel>], iteration_bounds = array<i64: 1>, scalar_prefetch = 0 : i64, scratch_operands = 0 : i64, tpu.core_type = #tpu.core_type<tc>, window_params = [{transform_indices = @transform_0, window_bounds = array<i64: 256, 128>}, {pipeline_mode = #tpu.pipeline_mode<synchronous>, transform_indices = @transform_1, window_bounds = array<i64: 128, 512>}, {pipeline_mode = #tpu.pipeline_mode<synchronous>, transform_indices = @transform_2, window_bounds = array<i64: 1, 512>}, {pipeline_mode = #tpu.pipeline_mode<synchronous>, transform_indices = @transform_3, window_bounds = array<i64: 512, 256>}, {pipeline_mode = #tpu.pipeline_mode<synchronous>, transform_indices = @transform_4, window_bounds = array<i64: 1, 256>}, {pipeline_mode = #tpu.pipeline_mode<synchronous>, transform_indices = @transform_5, window_bounds = array<i64: 256, 128>}, {pipeline_mode = #tpu.pipeline_mode<synchronous>, transform_indices = @transform_6, window_bounds = array<i64: 1, 128>}, {transform_indices = @transform_7, window_bounds = array<i64: 256, 128>}]} {
    %c0 = arith.constant 0 : index
    %c0_0 = arith.constant 0 : index
    %0 = vector.load %arg1[%c0, %c0_0] : memref<256x128xbf16, #tpu.memory_space<vmem>>, vector<256x128xbf16>
    %c0_1 = arith.constant 0 : index
    %c0_2 = arith.constant 0 : index
    %1 = vector.load %arg2[%c0_1, %c0_2] : memref<128x512xbf16, #tpu.memory_space<vmem>>, vector<128x512xbf16>
    %cst = arith.constant dense<0.000000e+00> : vector<256x512xf32>
    %2 = tpu.matmul %0, %1, %cst {dimension_numbers = #tpu.dot_dimension_numbers<[1], [0], [0], [1], [0, 0, 1, 1], [], []>} : vector<256x128xbf16>, vector<128x512xbf16>, vector<256x512xf32> -> vector<256x512xf32>
    %c0_3 = arith.constant 0 : index
    %c0_4 = arith.constant 0 : index
    %3 = vector.load %arg3[%c0_3, %c0_4] : memref<1x512xf32, #tpu.memory_space<vmem>>, vector<1x512xf32>
    %4 = vector.broadcast %3 : vector<1x512xf32> to vector<256x512xf32>
    %5 = arith.addf %2, %4 : vector<256x512xf32>
    %cst_5 = arith.constant 0.000000e+00 : f32
    %6 = vector.broadcast %cst_5 : f32 to vector<256x512xf32>
    %7 = arith.maximumf %5, %6 : vector<256x512xf32>
    %8 = arith.truncf %7 : vector<256x512xf32> to vector<256x512xbf16>
    %c0_6 = arith.constant 0 : index
    %c0_7 = arith.constant 0 : index
    %9 = vector.load %arg4[%c0_6, %c0_7] : memref<512x256xbf16, #tpu.memory_space<vmem>>, vector<512x256xbf16>
    %cst_8 = arith.constant dense<0.000000e+00> : vector<256x256xf32>
    %10 = tpu.matmul %8, %9, %cst_8 {dimension_numbers = #tpu.dot_dimension_numbers<[1], [0], [0], [1], [0, 0, 1, 1], [], []>} : vector<256x512xbf16>, vector<512x256xbf16>, vector<256x256xf32> -> vector<256x256xf32>
    %c0_9 = arith.constant 0 : index
    %c0_10 = arith.constant 0 : index
    %11 = vector.load %arg5[%c0_9, %c0_10] : memref<1x256xf32, #tpu.memory_space<vmem>>, vector<1x256xf32>
    %12 = vector.broadcast %11 : vector<1x256xf32> to vector<256x256xf32>
    %13 = arith.addf %10, %12 : vector<256x256xf32>
    %cst_11 = arith.constant 0.000000e+00 : f32
    %14 = vector.broadcast %cst_11 : f32 to vector<256x256xf32>
    %15 = arith.maximumf %13, %14 : vector<256x256xf32>
    %16 = arith.truncf %15 : vector<256x256xf32> to vector<256x256xbf16>
    %c0_12 = arith.constant 0 : index
    %c0_13 = arith.constant 0 : index
    %17 = vector.load %arg6[%c0_12, %c0_13] : memref<256x128xbf16, #tpu.memory_space<vmem>>, vector<256x128xbf16>
    %cst_14 = arith.constant dense<0.000000e+00> : vector<256x128xf32>
    %18 = tpu.matmul %16, %17, %cst_14 {dimension_numbers = #tpu.dot_dimension_numbers<[1], [0], [0], [1], [0, 0, 1, 1], [], []>} : vector<256x256xbf16>, vector<256x128xbf16>, vector<256x128xf32> -> vector<256x128xf32>
    %c0_15 = arith.constant 0 : index
    %c0_16 = arith.constant 0 : index
    %19 = vector.load %arg7[%c0_15, %c0_16] : memref<1x128xf32, #tpu.memory_space<vmem>>, vector<1x128xf32>
    %20 = vector.broadcast %19 : vector<1x128xf32> to vector<256x128xf32>
    %21 = arith.addf %18, %20 : vector<256x128xf32>
    %c0_17 = arith.constant 0 : index
    %c0_18 = arith.constant 0 : index
    %22 = vector.load %arg8[%c0_17, %c0_18] : memref<256x128xf32, #tpu.memory_space<vmem>>, vector<256x128xf32>
    tpu.vector_store %arg8[%c0_17, %c0_18], %21 {strides = array<i32>} : memref<256x128xf32, #tpu.memory_space<vmem>>, vector<256x128xf32>,
    return
  }
  func.func @transform_0(%arg0: i32) -> (i32, i32) {
    %c0_i32 = arith.constant 0 : i32
    %c0_i32_0 = arith.constant 0 : i32
    return %arg0, %c0_i32 : i32, i32
  }
  func.func @transform_1(%arg0: i32) -> (i32, i32) {
    %c0_i32 = arith.constant 0 : i32
    %c0_i32_0 = arith.constant 0 : i32
    %c0_i32_1 = arith.constant 0 : i32
    return %c0_i32, %c0_i32_0 : i32, i32
  }
  func.func @transform_2(%arg0: i32) -> (i32, i32) {
    %c0_i32 = arith.constant 0 : i32
    %c0_i32_0 = arith.constant 0 : i32
    %c0_i32_1 = arith.constant 0 : i32
    return %c0_i32, %c0_i32_0 : i32, i32
  }
  func.func @transform_3(%arg0: i32) -> (i32, i32) {
    %c0_i32 = arith.constant 0 : i32
    %c0_i32_0 = arith.constant 0 : i32
    %c0_i32_1 = arith.constant 0 : i32
    return %c0_i32, %c0_i32_0 : i32, i32
  }
  func.func @transform_4(%arg0: i32) -> (i32, i32) {
    %c0_i32 = arith.constant 0 : i32
    %c0_i32_0 = arith.constant 0 : i32
    %c0_i32_1 = arith.constant 0 : i32
    return %c0_i32, %c0_i32_0 : i32, i32
  }
  func.func @transform_5(%arg0: i32) -> (i32, i32) {
    %c0_i32 = arith.constant 0 : i32
    %c0_i32_0 = arith.constant 0 : i32
    %c0_i32_1 = arith.constant 0 : i32
    return %c0_i32, %c0_i32_0 : i32, i32
  }
  func.func @transform_6(%arg0: i32) -> (i32, i32) {
    %c0_i32 = arith.constant 0 : i32
    %c0_i32_0 = arith.constant 0 : i32
    %c0_i32_1 = arith.constant 0 : i32
    return %c0_i32, %c0_i32_0 : i32, i32
  }
  func.func @transform_7(%arg0: i32) -> (i32, i32) {
    %c0_i32 = arith.constant 0 : i32
    %c0_i32_0 = arith.constant 0 : i32
    return %arg0, %c0_i32 : i32, i32
  }
}

</mosaic_0001>

<bundles_post_ra>
// kernel: _lambda_.1
= control target key start
LH: loop header
LB: loop body
LE: loop exit
PB: predicated region body
PF: predicated region fallthrough
CT: control target
= control target key end

     0   :  { %12 = vsyncpa [#allocation3], 0  ;;  %s4724_s0 = inlined_call_operand.vmem [shape: bf16[256,128], index: 0, kind: input, shape index: {}]   ;;  %s4725_s1 = inlined_call_operand.hbm [shape: bf16[128,512], index: 1, kind: input, shape index: {}]   ;;  %s4726_s2 = inlined_call_operand.hbm [shape: f32[1,512], index: 2, kind: input, shape index: {}]   ;;  %s4727_s3 = inlined_call_operand.vmem [shape: bf16[512,256], index: 3, kind: input, shape index: {}]   ;;  %s4728_s4 = inlined_call_operand.vmem [shape: f32[1,256], index: 4, kind: input, shape index: {}]   ;;  %s4729_s5 = inlined_call_operand.vmem [shape: bf16[256,128], index: 5, kind: input, shape index: {}]   ;;  %s4730_s6 = inlined_call_operand.vmem [shape: f32[1,128], index: 6, kind: input, shape index: {}]   ;;  %s4731_s7 = inlined_call_operand.vmem [shape: f32[256,128], index: 7, kind: output, shape index: {}]  }
   0x1   :  { %s20_s26 = sshll.u32 %s4725_s1, 4  ;;  %s21_s26 = int_to_ptr.hbm [resolvable:$true] %s20_s26 }
   0x2   :  { %13 = vsyncpa [#allocation5], 0  ;;  %s3199_s27 = smov [#allocation2]   ;;  %s34_s8 = sshll.u32 %s4726_s2, 4  ;;  %s35_s8 = int_to_ptr.hbm [resolvable:$true] %s34_s8 }
   0x3   :  { %s22_s28 = sshll.u32 %s3199_s27, 4  ;;  %s3200_s9 = smov 256   ;;  %s23_s28 = int_to_ptr.vmem [resolvable:$true] %s22_s28 }
   0x4   :  { %s3201_s10 = smov 16   ;;  %s3202_s11 = smov [#allocation4]  }
   0x5   :  { %28 = dma.hbm_to_vmem [thread:$0]  %s21_s26, 4096, %s23_s28, [#allocation3], %s3200_s9, %s3200_s9, %s3201_s10  }
   0x6   :  { %s36_s12 = sshll.u32 %s3202_s11, 4  ;;  %s37_s12 = int_to_ptr.vmem [resolvable:$true] %s36_s12 }
   0x7   :  { %39 = dma.hbm_to_vmem [thread:$0]  %s35_s8, 64, %s37_s12, [#allocation5]  }
   0x8   :  { %3195 = dma.done.wait [#allocation3], 4096  }
   0x9   :  { %3196 = vsyncadd [#allocation3], 4294963200 }
   0xa   :  { %3197 = dma.done.wait [#allocation5], 64  }
   0xb   :  { %3198 = vsyncadd [#allocation5], 4294967232  ;;  %v2658_v0 = vld [vmem:[#allocation2 + $0xe0] sm:$0xf]  ;;  %v3038_v1 = vld [vmem:[#allocation2 + $0xec] sm:$0xf0] }
   0xc   :  { %v3036_v2 = vld [vmem:[#allocation2 + $0xe4] sm:$0xf]  ;;  %v2659_v3 = vor.u32 %v3038_v1, %v2658_v0  ;;  %v2660_v4 = vld [vmem:[#allocation2 + $0xf0] sm:$0xf0]  ;;  %v2642_v5 = vld [vmem:[#allocation2 + $0xc0] sm:$0xf] }
   0xd   :  { %v3034_v6 = vld [vmem:[#allocation2 + $0xcc] sm:$0xf0]  ;;  %v2663_v7 = vor.u32 %v3036_v2, %v2660_v4  ;;  %v3032_v8 = vld [vmem:[#allocation2 + $0xc4] sm:$0xf]  ;;  %v2644_v9 = vld [vmem:[#allocation2 + $0xd0] sm:$0xf0] }
   0xe   :  { %386 = vmatpush.bf16.msra.mxu0 %v2659_v3  ;;  %3120 = vmatpush.bf16.msra.mxu2 %v2659_v3  ;;  %v2643_v10 = vor.u32 %v3034_v6, %v2642_v5  ;;  %v2647_v11 = vor.u32 %v3032_v8, %v2644_v9  ;;  %v2626_v12 = vld [vmem:[#allocation2 + $0xa0] sm:$0xf]  ;;  %v3030_v13 = vld [vmem:[#allocation2 + $0xac] sm:$0xf0]  ;;  %v3028_v14 = vld [vmem:[#allocation2 + $0xa4] sm:$0xf] }
   0xf   :  { %475 = vmatpush.bf16.msra.mxu1 %v2663_v7  ;;  %3128 = vmatpush.bf16.msra.mxu3 %v2663_v7  ;;  %v2628_v15 = vld [vmem:[#allocation2 + $0xb0] sm:$0xf0]  ;;  %v2627_v16 = vor.u32 %v3030_v13, %v2626_v12  ;;  %v2610_v18 = vld [vmem:[#allocation2 + $0x80] sm:$0xf]  ;;  %v3026_v19 = vld [vmem:[#allocation2 + $0x8c] sm:$0xf0] }
  0x10   :  { %v2631_v17 = vor.u32 %v3028_v14, %v2628_v15  ;;  %v3024_v20 = vld [vmem:[#allocation2 + $0x84] sm:$0xf]  ;;  %v2612_v21 = vld [vmem:[#allocation2 + $0x90] sm:$0xf0]  ;;  %v2611_v22 = vor.u32 %v3026_v19, %v2610_v18  ;;  %v2594_v24 = vld [vmem:[#allocation2 + $0x60] sm:$0xf] }
  0x11   :  { %v2615_v23 = vor.u32 %v3024_v20, %v2612_v21  ;;  %v3022_v25 = vld [vmem:[#allocation2 + $0x6c] sm:$0xf0]  ;;  %v3020_v26 = vld [vmem:[#allocation2 + $0x64] sm:$0xf]  ;;  %v2596_v27 = vld [vmem:[#allocation2 + $0x70] sm:$0xf0] }
  0x12   :  { %387 = vmatpush.bf16.msra.mxu0 %v2643_v10  ;;  %3121 = vmatpush.bf16.msra.mxu2 %v2643_v10  ;;  %v2595_v28 = vor.u32 %v3022_v25, %v2594_v24  ;;  %v2599_v29 = vor.u32 %v3020_v26, %v2596_v27  ;;  %v2578_v30 = vld [vmem:[#allocation2 + $0x40] sm:$0xf]  ;;  %v3018_v31 = vld [vmem:[#allocation2 + $0x4c] sm:$0xf0]  ;;  %v3016_v32 = vld [vmem:[#allocation2 + $0x44] sm:$0xf] }
  0x13   :  { %476 = vmatpush.bf16.msra.mxu1 %v2647_v11  ;;  %3129 = vmatpush.bf16.msra.mxu3 %v2647_v11  ;;  %v2580_v33 = vld [vmem:[#allocation2 + $0x50] sm:$0xf0]  ;;  %v2579_v34 = vor.u32 %v3018_v31, %v2578_v30  ;;  %v2562_v36 = vld [vmem:[#allocation2 + $0x20] sm:$0xf]  ;;  %v3014_v37 = vld [vmem:[#allocation2 + $0x2c] sm:$0xf0] }
  0x14   :  { %v2583_v35 = vor.u32 %v3016_v32, %v2580_v33  ;;  %v3012_v38 = vld [vmem:[#allocation2 + $0x24] sm:$0xf]  ;;  %v2564_v39 = vld [vmem:[#allocation2 + $0x30] sm:$0xf0]  ;;  %v2563_v40 = vor.u32 %v3014_v37, %v2562_v36  ;;  %v2546_v42 = vld [vmem:[#allocation2] sm:$0xf] }
  0x15   :  { %v2567_v41 = vor.u32 %v3012_v38, %v2564_v39  ;;  %v3010_v43 = vld [vmem:[#allocation2 + $0xc] sm:$0xf0]  ;;  %v3008_v44 = vld [vmem:[#allocation2 + $0x4] sm:$0xf]  ;;  %v2548_v45 = vld [vmem:[#allocation2 + $0x10] sm:$0xf0] }
  0x16   :  { %388 = vmatpush.bf16.msra.mxu0 %v2627_v16  ;;  %3122 = vmatpush.bf16.msra.mxu2 %v2627_v16  ;;  %v2666_v46 = vld [vmem:[#allocation2 + $0xe8] sm:$0xf]  ;;  %v3039_v47 = vld [vmem:[#allocation2 + $0xf4] sm:$0xf0]  ;;  %v3037_v48 = vld [vmem:[#allocation2 + $0xec] sm:$0xf]  ;;  %v2547_v50 = vor.u32 %v3010_v43, %v2546_v42  ;;  %v2551_v51 = vor.u32 %v3008_v44, %v2548_v45 }
  0x17   :  { %477 = vmatpush.bf16.msra.mxu1 %v2631_v17  ;;  %3130 = vmatpush.bf16.msra.mxu3 %v2631_v17  ;;  %v2668_v49 = vld [vmem:[#allocation2 + $0xf8] sm:$0xf0]  ;;  %v3252_v52 = vld [vmem:[%s4724_s0] sm:$0xff]  ;;  %v2667_v54 = vor.u32 %v3039_v47, %v2666_v46  ;;  %v2650_v56 = vld [vmem:[#allocation2 + $0xc8] sm:$0xf] }
  0x18   :  { %v3257_v53 = vld [vmem:[%s4724_s0 + $0x40] sm:$0xff]  ;;  %v2671_v55 = vor.u32 %v3037_v48, %v2668_v49  ;;  %v3035_v57 = vld [vmem:[#allocation2 + $0xd4] sm:$0xf0]  ;;  %v3033_v58 = vld [vmem:[#allocation2 + $0xcc] sm:$0xf] }
  0x19   :  { %v2652_v59 = vld [vmem:[#allocation2 + $0xd8] sm:$0xf0]  ;;  %v2651_v60 = vor.u32 %v3035_v57, %v2650_v56  ;;  %v2634_v62 = vld [vmem:[#allocation2 + $0xa8] sm:$0xf]  ;;  %v3031_v63 = vld [vmem:[#allocation2 + $0xb4] sm:$0xf0] }
  0x1a   :  { %389 = vmatpush.bf16.msra.mxu0 %v2611_v22  ;;  %3123 = vmatpush.bf16.msra.mxu2 %v2611_v22  ;;  %v2655_v61 = vor.u32 %v3033_v58, %v2652_v59  ;;  %v3029_v0 = vld [vmem:[#allocation2 + $0xac] sm:$0xf]  ;;  %v2636_v1 = vld [vmem:[#allocation2 + $0xb8] sm:$0xf0]  ;;  %v2635_v2 = vor.u32 %v3031_v63, %v2634_v62  ;;  %v2618_v6 = vld [vmem:[#allocation2 + $0x88] sm:$0xf] }
  0x1b   :  { %478 = vmatpush.bf16.msra.mxu1 %v2615_v23  ;;  %3131 = vmatpush.bf16.msra.mxu3 %v2615_v23  ;;  %v2639_v3 = vor.u32 %v3029_v0, %v2636_v1  ;;  %v3266_v4 = vld [vmem:[%s4724_s0 + $0x8] sm:$0xff]  ;;  %v3027_v7 = vld [vmem:[#allocation2 + $0x94] sm:$0xf0]  ;;  %v2620_v10 = vld [vmem:[#allocation2 + $0x98] sm:$0xf0] }
  0x1c   :  { %v3271_v5 = vld [vmem:[%s4724_s0 + $0x48] sm:$0xff]  ;;  %v2619_v9 = vor.u32 %v3027_v7, %v2618_v6  ;;  %v3280_v12 = vld [vmem:[%s4724_s0 + $0x10] sm:$0xff]  ;;  %v3023_v15 = vld [vmem:[#allocation2 + $0x74] sm:$0xf0] }
  0x1d   :  { %v3025_v8 = vld [vmem:[#allocation2 + $0x8c] sm:$0xf]  ;;  %v3285_v13 = vld [vmem:[%s4724_s0 + $0x50] sm:$0xff]  ;;  %v2602_v14 = vld [vmem:[#allocation2 + $0x68] sm:$0xf] }
  0x1e   :  { %390 = vmatpush.bf16.msra.mxu0 %v2595_v28  ;;  %3124 = vmatpush.bf16.msra.mxu2 %v2595_v28  ;;  %v2623_v11 = vor.u32 %v3025_v8, %v2620_v10  ;;  %v3021_v16 = vld [vmem:[#allocation2 + $0x6c] sm:$0xf]  ;;  %v2603_v17 = vor.u32 %v3023_v15, %v2602_v14  ;;  %v2604_v18 = vld [vmem:[#allocation2 + $0x78] sm:$0xf0]  ;;  %v2586_v22 = vld [vmem:[#allocation2 + $0x48] sm:$0xf] }
  0x1f   :  { %479 = vmatpush.bf16.msra.mxu1 %v2599_v29  ;;  %3132 = vmatpush.bf16.msra.mxu3 %v2599_v29  ;;  %v2607_v19 = vor.u32 %v3021_v16, %v2604_v18  ;;  %v3294_v20 = vld [vmem:[%s4724_s0 + $0x18] sm:$0xff]  ;;  %v3017_v24 = vld [vmem:[#allocation2 + $0x4c] sm:$0xf]  ;;  %v3304_v28 = vld [vmem:[%s4724_s0 + $0x20] sm:$0xff] }
  0x20   :  { %v3003_v21 = vld [vmem:[%s4724_s0 + $0x58] sm:$0xff]  ;;  %v3004_v29 = vld [vmem:[%s4724_s0 + $0x60] sm:$0xff]  ;;  %v2570_v30 = vld [vmem:[#allocation2 + $0x28] sm:$0xf] }
  0x21   :  { %v3019_v23 = vld [vmem:[#allocation2 + $0x54] sm:$0xf0]  ;;  %v2588_v26 = vld [vmem:[#allocation2 + $0x58] sm:$0xf0]  ;;  %v3013_v32 = vld [vmem:[#allocation2 + $0x2c] sm:$0xf] }
  0x22   :  { %391 = vmatpush.bf16.msra.mxu0 %v2579_v34  ;;  %3125 = vmatpush.bf16.msra.mxu2 %v2579_v34  ;;  %v2587_v25 = vor.u32 %v3019_v23, %v2586_v22  ;;  %v2591_v27 = vor.u32 %v3017_v24, %v2588_v26  ;;  %v3015_v31 = vld [vmem:[#allocation2 + $0x34] sm:$0xf0]  ;;  %v2572_v34 = vld [vmem:[#allocation2 + $0x38] sm:$0xf0]  ;;  %v2794_v39 = vld [vmem:[%s4727_s3 + $0xf0] sm:$0xf] }
  0x23   :  { %480 = vmatpush.bf16.msra.mxu1 %v2583_v35  ;;  %3133 = vmatpush.bf16.msra.mxu3 %v2583_v35  ;;  %v2571_v33 = vor.u32 %v3015_v31, %v2570_v30  ;;  %v2730_v35 = vld [vmem:[%s4727_s3 + $0x70] sm:$0xf]  ;;  %v3055_v36 = vld [vmem:[%s4727_s3 + $0x74] sm:$0xf0]  ;;  %v2575_v37 = vor.u32 %v3013_v32, %v2572_v34  ;;  %v3326_v42 = vld [vmem:[%s4724_s0 + $0x28] sm:$0xff] }
  0x24   :  { %v2731_v38 = vor.u32 %v3055_v36, %v2730_v35  ;;  %v3005_v43 = vld [vmem:[%s4724_s0 + $0x68] sm:$0xff]  ;;  %v2722_v44 = vld [vmem:[%s4727_s3 + $0x60] sm:$0xf]  ;;  %v2556_v56 = vld [vmem:[#allocation2 + $0x18] sm:$0xf0] }
  0x25   :  { %v3053_v45 = vld [vmem:[%s4727_s3 + $0x64] sm:$0xf0]  ;;  %v2786_v47 = vld [vmem:[%s4727_s3 + $0xe0] sm:$0xf]  ;;  %v2714_v57 = vld [vmem:[%s4727_s3 + $0x50] sm:$0xf] }
  0x26   :  { %392 = vmatpush.bf16.msra.mxu0 %v2563_v40  ;;  %3126 = vmatpush.bf16.msra.mxu2 %v2563_v40  ;;  %v3071_v40 = vld [vmem:[%s4727_s3 + $0xf4] sm:$0xf0]  ;;  %v2723_v46 = vor.u32 %v3053_v45, %v2722_v44  ;;  %v3069_v48 = vld [vmem:[%s4727_s3 + $0xe4] sm:$0xf0]  ;;  %v2706_v63 = vld [vmem:[%s4727_s3 + $0x40] sm:$0xf] }
  0x27   :  { %481 = vmatpush.bf16.msra.mxu1 %v2567_v41  ;;  %3134 = vmatpush.bf16.msra.mxu3 %v2567_v41  ;;  %v2795_v41 = vor.u32 %v3071_v40, %v2794_v39  ;;  %v2554_v49 = vld [vmem:[#allocation2 + $0x8] sm:$0xf]  ;;  %v3051_v58 = vld [vmem:[%s4727_s3 + $0x54] sm:$0xf0]  ;;  %v2698_v8 = vld [vmem:[%s4727_s3 + $0x30] sm:$0xf] }
  0x28   :  { %v3067_v62 = vld [vmem:[%s4727_s3 + $0xd4] sm:$0xf0]  ;;  %v3049_v1 = vld [vmem:[%s4727_s3 + $0x44] sm:$0xf0]  ;;  %v2762_v10 = vld [vmem:[%s4727_s3 + $0xb0] sm:$0xf] }
  0x29   :  { %v2707_v6 = vor.u32 %v3049_v1, %v2706_v63  ;;  %v3006_v14 = vld [vmem:[%s4724_s0 + $0x70] sm:$0xff]  ;;  %v3063_v16 = vld [vmem:[%s4727_s3 + $0xb4] sm:$0xf0]  ;;  %v2690_v18 = vld [vmem:[%s4727_s3 + $0x20] sm:$0xf] }
  0x2a   :  { %393 = vmatpush.bf16.msra.mxu0 %v2547_v50  ;;  %3127 = vmatpush.bf16.msra.mxu2 %v2547_v50  ;;  %v3011_v50 = vld [vmem:[#allocation2 + $0x14] sm:$0xf0]  ;;  %v3061_v23 = vld [vmem:[%s4727_s3 + $0xa4] sm:$0xf0]  ;;  %v2858_v24 = vld [vmem:[%s4727_s3 + $0x170] sm:$0xf] }
  0x2b   :  { %482 = vmatpush.bf16.msra.mxu1 %v2551_v51  ;;  %3135 = vmatpush.bf16.msra.mxu3 %v2551_v51  ;;  %v2787_v51 = vor.u32 %v3069_v48, %v2786_v47  ;;  %v3103_v30 = vld [vmem:[%s4727_s3 + $0x1f4] sm:$0xf0]  ;;  %v2682_v32 = vld [vmem:[%s4727_s3 + $0x10] sm:$0xf]  ;;  %v3041_v39 = vld [vmem:[%s4727_s3 + $0x4] sm:$0xf0] }
  0x2c   :  { %v2746_v34 = vld [vmem:[%s4727_s3 + $0x90] sm:$0xf]  ;;  %v3059_v36 = vld [vmem:[%s4727_s3 + $0x94] sm:$0xf0]  ;;  %v2738_v40 = vld [vmem:[%s4727_s3 + $0x80] sm:$0xf] }
  0x2d   :  { %394 = vmatmul.bf16.vlgmr.msra.gmra.mxu0 %v3252_v52  ;;  %434 = vmatmul.bf16.vlgmr.msra.gmra.mxu2 %v3257_v53  ;;  %v3442_v45 = vld [vmem:[%s4724_s0 + $0x38] sm:$0xff]  ;;  %v3449_v47 = vld [vmem:[#allocation4] sm:$0xf] }
  0x2e   :  { %564 = vmatpush.bf16.msrb.mxu2 %v2667_v54  ;;  %483 = vmatmul.bf16.vlgmr.msra.gmra.mxu1 %v3252_v52  ;;  %v3009_v54 = vld [vmem:[#allocation2 + $0xc] sm:$0xf] }
  0x2f   :  { %653 = vmatpush.bf16.msrb.mxu3 %v2671_v55  ;;  %1324 = vmatpush.bf16.msrb.mxu0 %v2731_v38  ;;  %v2555_v55 = vor.u32 %v3011_v50, %v2554_v49  ;;  %v2559_v59 = vor.u32 %v3009_v54, %v2556_v56  ;;  %v2674_v38 = vld [vmem:[%s4727_s3] sm:$0xf]  ;;  %v3452_v50 = vperm.slane %v3449_v47, 1 }
  0x30   :  { %523 = vmatmul.bf16.vlgmr.msra.gmra.mxu3 %v3257_v53  ;;  %1413 = vmatpush.bf16.msrb.mxu1 %v2795_v41  ;;  %v2675_v41 = vor.u32 %v3041_v39, %v2674_v38  ;;  %v2850_v54 = vld [vmem:[%s4727_s3 + $0x160] sm:$0xf] }
  0x32   :  { %565 = vmatpush.bf16.msrb.mxu2 %v2651_v60  ;;  %v2715_v60 = vor.u32 %v3051_v58, %v2714_v57  ;;  %v2914_v58 = vld [vmem:[%s4727_s3 + $0x1e0] sm:$0xf] }
  0x33   :  { %654 = vmatpush.bf16.msrb.mxu3 %v2655_v61  ;;  %1325 = vmatpush.bf16.msrb.mxu0 %v2723_v46  ;;  %v2778_v61 = vld [vmem:[%s4727_s3 + $0xd0] sm:$0xf]  ;;  %v3007_v46 = vld [vmem:[%s4724_s0 + $0x78] sm:$0xff] }
  0x34   :  { %1414 = vmatpush.bf16.msrb.mxu1 %v2787_v51  ;;  %v2779_v0 = vor.u32 %v3067_v62, %v2778_v61  ;;  %v3455_v51 = vperm.slane %v3449_v47, 0 }
  0x36   :  { %566 = vmatpush.bf16.msrb.mxu2 %v2635_v2  ;;  %v2770_v2 = vld [vmem:[%s4727_s3 + $0xc0] sm:$0xf] }
  0x37   :  { %655 = vmatpush.bf16.msrb.mxu3 %v2639_v3  ;;  %v3065_v3 = vld [vmem:[%s4727_s3 + $0xc4] sm:$0xf0]  ;;  %1326 = vmatpush.bf16.msrb.mxu0 %v2715_v60 }
  0x38   :  { %1415 = vmatpush.bf16.msrb.mxu1 %v2779_v0  ;;  %v2771_v7 = vor.u32 %v3065_v3, %v2770_v2 }
  0x3a   :  { %567 = vmatpush.bf16.msrb.mxu2 %v2619_v9  ;;  %v3047_v9 = vld [vmem:[%s4727_s3 + $0x34] sm:$0xf0] }
  0x3b   :  { %656 = vmatpush.bf16.msrb.mxu3 %v2623_v11  ;;  %1327 = vmatpush.bf16.msrb.mxu0 %v2707_v6  ;;  %v3381_v11 = vld [vmem:[%s4724_s0 + $0x30] sm:$0xff]  ;;  %v2699_v15 = vor.u32 %v3047_v9, %v2698_v8 }
  0x3c   :  { %1416 = vmatpush.bf16.msrb.mxu1 %v2771_v7 }
  0x3d   :  { %399 = vmatmul.bf16.gmra.mxu0 %v3266_v4  ;;  %439 = vmatmul.bf16.gmra.mxu2 %v3271_v5 }
  0x3e   :  { %488 = vmatmul.bf16.gmra.mxu1 %v3266_v4  ;;  %568 = vmatpush.bf16.msrb.mxu2 %v2603_v17  ;;  %v2763_v17 = vor.u32 %v3063_v16, %v2762_v10 }
  0x3f   :  { %657 = vmatpush.bf16.msrb.mxu3 %v2607_v19  ;;  %1328 = vmatpush.bf16.msrb.mxu0 %v2699_v15  ;;  %v3045_v19 = vld [vmem:[%s4727_s3 + $0x24] sm:$0xf0] }
  0x40   :  { %528 = vmatmul.bf16.gmra.mxu3 %v3271_v5  ;;  %1417 = vmatpush.bf16.msrb.mxu1 %v2763_v17  ;;  %v2691_v22 = vor.u32 %v3045_v19, %v2690_v18 }
  0x42   :  { %569 = vmatpush.bf16.msrb.mxu2 %v2587_v25  ;;  %v3087_v25 = vld [vmem:[%s4727_s3 + $0x174] sm:$0xf0] }
  0x43   :  { %658 = vmatpush.bf16.msrb.mxu3 %v2591_v27  ;;  %v2922_v27 = vld [vmem:[%s4727_s3 + $0x1f0] sm:$0xf]  ;;  %1329 = vmatpush.bf16.msrb.mxu0 %v2691_v22 }
  0x44   :  { %v2923_v31 = vor.u32 %v3103_v30, %v2922_v27 }
  0x46   :  { %570 = vmatpush.bf16.msrb.mxu2 %v2571_v33  ;;  %v3043_v33 = vld [vmem:[%s4727_s3 + $0x14] sm:$0xf0] }
  0x47   :  { %659 = vmatpush.bf16.msrb.mxu3 %v2575_v37  ;;  %v2683_v35 = vor.u32 %v3043_v33, %v2682_v32  ;;  %v2747_v37 = vor.u32 %v3059_v36, %v2746_v34 }
  0x49   :  { %1330 = vmatpush.bf16.msrb.mxu0 %v2683_v35 }
  0x4a   :  { %571 = vmatpush.bf16.msrb.mxu2 %v2555_v55  ;;  %v3085_v55 = vld [vmem:[%s4727_s3 + $0x164] sm:$0xf0] }
  0x4b   :  { %660 = vmatpush.bf16.msrb.mxu3 %v2559_v59  ;;  %v2851_v57 = vor.u32 %v3085_v55, %v2850_v54  ;;  %v3101_v59 = vld [vmem:[%s4727_s3 + $0x1e4] sm:$0xf0] }
  0x4c   :  { %v2915_v61 = vor.u32 %v3101_v59, %v2914_v58 }
  0x4d   :  { %404 = vmatmul.bf16.gmra.mxu0 %v3280_v12  ;;  %444 = vmatmul.bf16.gmra.mxu2 %v3285_v13 }
  0x4e   :  { %493 = vmatmul.bf16.gmra.mxu1 %v3280_v12  ;;  %1331 = vmatpush.bf16.msrb.mxu0 %v2675_v41 }
  0x4f   :  { %1591 = vmatpush.bf16.msra.mxu3 %v2923_v31 }
  0x50   :  { %533 = vmatmul.bf16.gmra.mxu3 %v3285_v13 }
  0x53   :  { %1592 = vmatpush.bf16.msra.mxu3 %v2915_v61 }
  0x5d   :  { %409 = vmatmul.bf16.gmra.mxu0 %v3294_v20  ;;  %449 = vmatmul.bf16.gmra.mxu2 %v3003_v21 }
  0x5e   :  { %498 = vmatmul.bf16.gmra.mxu1 %v3294_v20 }
  0x60   :  { %538 = vmatmul.bf16.gmra.mxu3 %v3003_v21  ;;  %v2754_v21 = vld [vmem:[%s4727_s3 + $0xa0] sm:$0xf] }
  0x61   :  { %v2755_v26 = vor.u32 %v3061_v23, %v2754_v21 }
  0x63   :  { %1418 = vmatpush.bf16.msrb.mxu1 %v2755_v26 }
  0x67   :  { %1419 = vmatpush.bf16.msrb.mxu1 %v2747_v37 }
  0x6d   :  { %414 = vmatmul.bf16.gmra.mxu0 %v3304_v28  ;;  %454 = vmatmul.bf16.gmra.mxu2 %v3004_v29 }
  0x6e   :  { %503 = vmatmul.bf16.gmra.mxu1 %v3304_v28 }
  0x70   :  { %543 = vmatmul.bf16.gmra.mxu3 %v3004_v29  ;;  %v2859_v29 = vor.u32 %v3087_v25, %v2858_v24 }
  0x72   :  { %1502 = vmatpush.bf16.msra.mxu2 %v2859_v29 }
  0x76   :  { %1503 = vmatpush.bf16.msra.mxu2 %v2851_v57 }
  0x7d   :  { %419 = vmatmul.bf16.gmra.mxu0 %v3326_v42  ;;  %459 = vmatmul.bf16.gmra.mxu2 %v3005_v43 }
  0x7e   :  { %508 = vmatmul.bf16.gmra.mxu1 %v3326_v42 }
  0x80   :  { %548 = vmatmul.bf16.gmra.mxu3 %v3005_v43  ;;  %v3057_v43 = vld [vmem:[%s4727_s3 + $0x84] sm:$0xf0] }
  0x81   :  { %v2739_v44 = vor.u32 %v3057_v43, %v2738_v40 }
  0x83   :  { %1420 = vmatpush.bf16.msrb.mxu1 %v2739_v44 }
  0x8d   :  { %424 = vmatmul.bf16.gmra.mxu0 %v3381_v11  ;;  %464 = vmatmul.bf16.gmra.mxu2 %v3006_v14 }
  0x8e   :  { %513 = vmatmul.bf16.gmra.mxu1 %v3381_v11 }
  0x90   :  { %553 = vmatmul.bf16.gmra.mxu3 %v3006_v14 }
  0x9d   :  { %429 = vmatmul.bf16.gmra.mxu0 %v3442_v45  ;;  %469 = vmatmul.bf16.gmra.mxu2 %v3007_v46 }
  0x9e   :  { %518 = vmatmul.bf16.gmra.mxu1 %v3442_v45 }
  0xa0   :  { %558 = vmatmul.bf16.gmra.mxu3 %v3007_v46 }
  0xaa   :  { %v395_v48 = vpop.f32.mrf.mxu0 }
  0xab   :  { %v484_v49 = vpop.f32.mrf.mxu1  ;;  %v396_v56 = vadd.f32 %v395_v48, %v3455_v51 }
  0xad   :  { %572 = vmatmul.bf16.vlgmr.msrb.gmra.mxu2 %v3252_v52  ;;  %v742_v0 = vmax.f32 %v396_v56, 0.0 }
  0xb0   :  { %661 = vmatmul.bf16.vlgmr.msrb.gmra.mxu3 %v3252_v52  ;;  %v485_v52 = vadd.f32 %v484_v49, %v3452_v50  ;;  %v435_v60 = vpop.f32.mrf.mxu2 }
  0xb1   :  { %v436_v9 = vadd.f32 %v435_v60, %v3455_v51 }
  0xb2   :  { %v397_v63 = vpop.f32.mrf.mxu0  ;;  %v743_v3 = vmax.f32 %v485_v52, 0.0 }
  0xb3   :  { %v524_v62 = vpop.f32.mrf.mxu3  ;;  %v398_v1 = vadd.f32 %v397_v63, %v3455_v51  ;;  %v486_v2 = vpop.f32.mrf.mxu1  ;;  %v806_v22 = vmax.f32 %v436_v9, 0.0  ;;  %v3083_v63 = vld [vmem:[%s4727_s3 + $0x154] sm:$0xf0] }
  0xb4   :  { %v487_v6 = vadd.f32 %v486_v2, %v3452_v50  ;;  %v525_v14 = vadd.f32 %v524_v62, %v3452_v50  ;;  %v2842_v62 = vld [vmem:[%s4727_s3 + $0x150] sm:$0xf] }
  0xb5   :  { %v746_v7 = vmax.f32 %v398_v1, 0.0  ;;  %v2843_v2 = vor.u32 %v3083_v63, %v2842_v62 }
  0xb6   :  { %v747_v8 = vmax.f32 %v487_v6, 0.0  ;;  %v807_v25 = vmax.f32 %v525_v14, 0.0 }
  0xb7   :  { %v3476_v10 = vpack.c.bf16 %v746_v7, %v742_v0  ;;  %1504 = vmatpush.bf16.msra.mxu2 %v2843_v2 }
  0xb8   :  { %v437_v15 = vpop.f32.mrf.mxu2  ;;  %v3479_v16 = vpack.c.bf16 %v747_v8, %v743_v3  ;;  %v2906_v3 = vld [vmem:[%s4727_s3 + $0x1d0] sm:$0xf] }
  0xb9   :  { %v438_v17 = vadd.f32 %v437_v15, %v3455_v51  ;;  %1332 = vmatmul.bf16.vlgmr.msrb.gmra.mxu0 %v3476_v10 }
  0xba   :  { %1421 = vmatmul.bf16.vlgmr.msrb.gmra.mxu1 %v3479_v16  ;;  %v400_v21 = vpop.f32.mrf.mxu0 }
  0xbb   :  { %v526_v18 = vpop.f32.mrf.mxu3  ;;  %v810_v23 = vmax.f32 %v438_v17, 0.0  ;;  %v489_v24 = vpop.f32.mrf.mxu1  ;;  %v401_v30 = vadd.f32 %v400_v21, %v3455_v51 }
  0xbc   :  { %v527_v19 = vadd.f32 %v526_v18, %v3452_v50  ;;  %v490_v31 = vadd.f32 %v489_v24, %v3452_v50 }
  0xbd   :  { %577 = vmatmul.bf16.gmra.mxu2 %v3266_v4  ;;  %v3486_v27 = vpack.c.bf16 %v810_v23, %v806_v22  ;;  %v750_v35 = vmax.f32 %v401_v30, 0.0 }
  0xbe   :  { %v811_v26 = vmax.f32 %v527_v19, 0.0  ;;  %v751_v38 = vmax.f32 %v490_v31, 0.0 }
  0xc0   :  { %666 = vmatmul.bf16.gmra.mxu3 %v3266_v4  ;;  %v3489_v29 = vpack.c.bf16 %v811_v26, %v807_v25  ;;  %v440_v32 = vpop.f32.mrf.mxu2 }
  0xc1   :  { %v441_v4 = vadd.f32 %v440_v32, %v3455_v51 }
  0xc2   :  { %v402_v34 = vpop.f32.mrf.mxu0 }
  0xc3   :  { %v529_v33 = vpop.f32.mrf.mxu3  ;;  %v403_v36 = vadd.f32 %v402_v34, %v3455_v51  ;;  %v491_v37 = vpop.f32.mrf.mxu1  ;;  %v814_v57 = vmax.f32 %v441_v4, 0.0 }
  0xc4   :  { %v492_v39 = vadd.f32 %v491_v37, %v3452_v50  ;;  %v530_v44 = vadd.f32 %v529_v33, %v3452_v50 }
  0xc5   :  { %v754_v40 = vmax.f32 %v403_v36, 0.0 }
  0xc6   :  { %v755_v41 = vmax.f32 %v492_v39, 0.0  ;;  %v815_v52 = vmax.f32 %v530_v44, 0.0 }
  0xc7   :  { %v3496_v43 = vpack.c.bf16 %v754_v40, %v750_v35 }
  0xc8   :  { %v442_v46 = vpop.f32.mrf.mxu2  ;;  %v3499_v48 = vpack.c.bf16 %v755_v41, %v751_v38 }
  0xc9   :  { %v443_v49 = vadd.f32 %v442_v46, %v3455_v51  ;;  %1337 = vmatmul.bf16.gmra.mxu0 %v3496_v43 }
  0xca   :  { %1426 = vmatmul.bf16.gmra.mxu1 %v3499_v48  ;;  %v405_v56 = vpop.f32.mrf.mxu0 }
  0xcb   :  { %v531_v54 = vpop.f32.mrf.mxu3  ;;  %v818_v58 = vmax.f32 %v443_v49, 0.0  ;;  %v494_v59 = vpop.f32.mrf.mxu1  ;;  %v406_v1 = vadd.f32 %v405_v56, %v3455_v51 }
  0xcc   :  { %v532_v55 = vadd.f32 %v531_v54, %v3452_v50  ;;  %v495_v6 = vadd.f32 %v494_v59, %v3452_v50 }
  0xcd   :  { %582 = vmatmul.bf16.gmra.mxu2 %v3280_v12  ;;  %v3506_v61 = vpack.c.bf16 %v818_v58, %v814_v57  ;;  %v758_v15 = vmax.f32 %v406_v1, 0.0 }
  0xce   :  { %v819_v60 = vmax.f32 %v532_v55, 0.0  ;;  %v759_v19 = vmax.f32 %v495_v6, 0.0 }
  0xd0   :  { %671 = vmatmul.bf16.gmra.mxu3 %v3280_v12  ;;  %v3515_v0 = vpack.c.bf16 %v819_v60, %v815_v52  ;;  %v3099_v12 = vld [vmem:[%s4727_s3 + $0x1d4] sm:$0xf0]  ;;  %v445_v7 = vpop.f32.mrf.mxu2 }
  0xd1   :  { %v2907_v8 = vor.u32 %v3099_v12, %v2906_v3  ;;  %v446_v24 = vadd.f32 %v445_v7, %v3455_v51 }
  0xd2   :  { %v407_v14 = vpop.f32.mrf.mxu0 }
  0xd3   :  { %v534_v9 = vpop.f32.mrf.mxu3  ;;  %1593 = vmatpush.bf16.msra.mxu3 %v2907_v8  ;;  %v408_v17 = vadd.f32 %v407_v14, %v3455_v51  ;;  %v496_v18 = vpop.f32.mrf.mxu1  ;;  %v822_v36 = vmax.f32 %v446_v24, 0.0 }
  0xd4   :  { %v497_v21 = vadd.f32 %v496_v18, %v3452_v50  ;;  %v535_v26 = vadd.f32 %v534_v9, %v3452_v50 }
  0xd5   :  { %v762_v22 = vmax.f32 %v408_v17, 0.0 }
  0xd6   :  { %v763_v23 = vmax.f32 %v497_v21, 0.0  ;;  %v823_v39 = vmax.f32 %v535_v26, 0.0  ;;  %v2834_v21 = vld [vmem:[%s4727_s3 + $0x140] sm:$0xf] }
  0xd7   :  { %v3528_v25 = vpack.c.bf16 %v762_v22, %v758_v15  ;;  %v3081_v22 = vld [vmem:[%s4727_s3 + $0x144] sm:$0xf0] }
  0xd8   :  { %v447_v30 = vpop.f32.mrf.mxu2  ;;  %v3531_v31 = vpack.c.bf16 %v763_v23, %v759_v19  ;;  %v2835_v26 = vor.u32 %v3081_v22, %v2834_v21 }
  0xd9   :  { %v448_v32 = vadd.f32 %v447_v30, %v3455_v51  ;;  %1342 = vmatmul.bf16.gmra.mxu0 %v3528_v25  ;;  %v2898_v30 = vld [vmem:[%s4727_s3 + $0x1c0] sm:$0xf] }
  0xda   :  { %1431 = vmatmul.bf16.gmra.mxu1 %v3531_v31  ;;  %v410_v35 = vpop.f32.mrf.mxu0  ;;  %1505 = vmatpush.bf16.msra.mxu2 %v2835_v26 }
  0xdb   :  { %v536_v33 = vpop.f32.mrf.mxu3  ;;  %v826_v37 = vmax.f32 %v448_v32, 0.0  ;;  %v499_v38 = vpop.f32.mrf.mxu1  ;;  %v411_v44 = vadd.f32 %v410_v35, %v3455_v51 }
  0xdc   :  { %v537_v34 = vadd.f32 %v536_v33, %v3452_v50  ;;  %v500_v46 = vadd.f32 %v499_v38, %v3452_v50 }
  0xdd   :  { %587 = vmatmul.bf16.gmra.mxu2 %v3294_v20  ;;  %v3538_v41 = vpack.c.bf16 %v826_v37, %v822_v36  ;;  %v766_v56 = vmax.f32 %v411_v44, 0.0 }
  0xde   :  { %v827_v40 = vmax.f32 %v537_v34, 0.0  ;;  %v767_v59 = vmax.f32 %v500_v46, 0.0 }
  0xe0   :  { %676 = vmatmul.bf16.gmra.mxu3 %v3294_v20  ;;  %v3541_v4 = vpack.c.bf16 %v827_v40, %v823_v39  ;;  %v450_v49 = vpop.f32.mrf.mxu2 }
  0xe1   :  { %v451_v20 = vadd.f32 %v450_v49, %v3455_v51 }
  0xe2   :  { %v412_v55 = vpop.f32.mrf.mxu0 }
  0xe3   :  { %v539_v54 = vpop.f32.mrf.mxu3  ;;  %v413_v57 = vadd.f32 %v412_v55, %v3455_v51  ;;  %v501_v58 = vpop.f32.mrf.mxu1  ;;  %v830_v9 = vmax.f32 %v451_v20, 0.0 }
  0xe4   :  { %v502_v52 = vadd.f32 %v501_v58, %v3452_v50  ;;  %v540_v1 = vadd.f32 %v539_v54, %v3452_v50 }
  0xe5   :  { %v770_v60 = vmax.f32 %v413_v57, 0.0 }
  0xe6   :  { %v771_v62 = vmax.f32 %v502_v52, 0.0  ;;  %v831_v17 = vmax.f32 %v540_v1, 0.0 }
  0xe7   :  { %v3548_v63 = vpack.c.bf16 %v770_v60, %v766_v56 }
  0xe8   :  { %v452_v2 = vpop.f32.mrf.mxu2  ;;  %v3551_v3 = vpack.c.bf16 %v771_v62, %v767_v59 }
  0xe9   :  { %v453_v12 = vadd.f32 %v452_v2, %v3455_v51  ;;  %1347 = vmatmul.bf16.gmra.mxu0 %v3548_v63 }
  0xea   :  { %1436 = vmatmul.bf16.gmra.mxu1 %v3551_v3  ;;  %v415_v8 = vpop.f32.mrf.mxu0 }
  0xeb   :  { %v541_v6 = vpop.f32.mrf.mxu3  ;;  %v834_v14 = vmax.f32 %v453_v12, 0.0  ;;  %v504_v15 = vpop.f32.mrf.mxu1  ;;  %v416_v24 = vadd.f32 %v415_v8, %v3455_v51 }
  0xec   :  { %v542_v7 = vadd.f32 %v541_v6, %v3452_v50  ;;  %v505_v32 = vadd.f32 %v504_v15, %v3452_v50 }
  0xed   :  { %592 = vmatmul.bf16.gmra.mxu2 %v3304_v28  ;;  %v3558_v19 = vpack.c.bf16 %v834_v14, %v830_v9  ;;  %v774_v37 = vmax.f32 %v416_v24, 0.0 }
  0xee   :  { %v835_v18 = vmax.f32 %v542_v7, 0.0  ;;  %v775_v40 = vmax.f32 %v505_v32, 0.0 }
  0xef   :  { %4764 = vst [vmem:[#allocation8_spill] sm:$0xff] %v3558_v19 }
  0xf0   :  { %681 = vmatmul.bf16.gmra.mxu3 %v3304_v28  ;;  %v3567_v23 = vpack.c.bf16 %v835_v18, %v831_v17  ;;  %v3097_v28 = vld [vmem:[%s4727_s3 + $0x1c4] sm:$0xf0]  ;;  %v455_v33 = vpop.f32.mrf.mxu2 }
  0xf1   :  { %v2899_v34 = vor.u32 %v3097_v28, %v2898_v30  ;;  %v456_v54 = vadd.f32 %v455_v33, %v3455_v51 }
  0xf2   :  { %4765 = vst [vmem:[#allocation9_spill] sm:$0xff] %v3567_v23  ;;  %v417_v36 = vpop.f32.mrf.mxu0 }
  0xf3   :  { %v544_v35 = vpop.f32.mrf.mxu3  ;;  %1594 = vmatpush.bf16.msra.mxu3 %v2899_v34  ;;  %v418_v38 = vadd.f32 %v417_v36, %v3455_v51  ;;  %v506_v39 = vpop.f32.mrf.mxu1  ;;  %v838_v20 = vmax.f32 %v456_v54, 0.0 }
  0xf4   :  { %v507_v44 = vadd.f32 %v506_v39, %v3452_v50  ;;  %v545_v56 = vadd.f32 %v544_v35, %v3452_v50 }
  0xf5   :  { %v778_v46 = vmax.f32 %v418_v38, 0.0 }
  0xf6   :  { %v779_v49 = vmax.f32 %v507_v44, 0.0  ;;  %v839_v12 = vmax.f32 %v545_v56, 0.0 }
  0xf7   :  { %v3580_v55 = vpack.c.bf16 %v778_v46, %v774_v37 }
  0xf8   :  { %v457_v57 = vpop.f32.mrf.mxu2  ;;  %v3583_v58 = vpack.c.bf16 %v779_v49, %v775_v40 }
  0xf9   :  { %v458_v59 = vadd.f32 %v457_v57, %v3455_v51  ;;  %1352 = vmatmul.bf16.gmra.mxu0 %v3580_v55 }
  0xfa   :  { %1441 = vmatmul.bf16.gmra.mxu1 %v3583_v58  ;;  %v420_v62 = vpop.f32.mrf.mxu0 }
  0xfb   :  { %v546_v52 = vpop.f32.mrf.mxu3  ;;  %v842_v1 = vmax.f32 %v458_v59, 0.0  ;;  %v509_v2 = vpop.f32.mrf.mxu1  ;;  %v421_v9 = vadd.f32 %v420_v62, %v3455_v51  ;;  %v2826_v59 = vld [vmem:[%s4727_s3 + $0x130] sm:$0xf] }
  0xfc   :  { %v547_v60 = vadd.f32 %v546_v52, %v3452_v50  ;;  %v510_v14 = vadd.f32 %v509_v2, %v3452_v50  ;;  %v3079_v52 = vld [vmem:[%s4727_s3 + $0x134] sm:$0xf0] }
  0xfd   :  { %597 = vmatmul.bf16.gmra.mxu2 %v3326_v42  ;;  %v3590_v7 = vpack.c.bf16 %v842_v1, %v838_v20  ;;  %v782_v21 = vmax.f32 %v421_v9, 0.0  ;;  %v2827_v20 = vor.u32 %v3079_v52, %v2826_v59  ;;  %v2890_v1 = vld [vmem:[%s4727_s3 + $0x1b0] sm:$0xf] }
  0xfe   :  { %v843_v6 = vmax.f32 %v547_v60, 0.0  ;;  %v783_v26 = vmax.f32 %v510_v14, 0.0 }
  0xff   :  { %4766 = vst [vmem:[#allocation10_spill] sm:$0xff] %v3590_v7  ;;  %1506 = vmatpush.bf16.msra.mxu2 %v2827_v20 }
 0x100   :  { %686 = vmatmul.bf16.gmra.mxu3 %v3326_v42  ;;  %v3593_v8 = vpack.c.bf16 %v843_v6, %v839_v12  ;;  %v460_v15 = vpop.f32.mrf.mxu2 }
 0x101   :  { %v461_v42 = vadd.f32 %v460_v15, %v3455_v51 }
 0x102   :  { %4767 = vst [vmem:[#allocation11_spill] sm:$0xff] %v3593_v8  ;;  %v422_v18 = vpop.f32.mrf.mxu0 }
 0x103   :  { %v549_v17 = vpop.f32.mrf.mxu3  ;;  %v423_v22 = vadd.f32 %v422_v18, %v3455_v51  ;;  %v511_v24 = vpop.f32.mrf.mxu1  ;;  %v846_v44 = vmax.f32 %v461_v42, 0.0 }
 0x104   :  { %v512_v30 = vadd.f32 %v511_v24, %v3452_v50  ;;  %v550_v34 = vadd.f32 %v549_v17, %v3452_v50 }
 0x105   :  { %v786_v28 = vmax.f32 %v423_v22, 0.0 }
 0x106   :  { %v787_v32 = vmax.f32 %v512_v30, 0.0  ;;  %v847_v54 = vmax.f32 %v550_v34, 0.0 }
 0x107   :  { %v3600_v33 = vpack.c.bf16 %v786_v28, %v782_v21 }
 0x108   :  { %v462_v35 = vpop.f32.mrf.mxu2  ;;  %v3603_v36 = vpack.c.bf16 %v787_v32, %v783_v26 }
 0x109   :  { %v463_v37 = vadd.f32 %v462_v35, %v3455_v51  ;;  %1357 = vmatmul.bf16.gmra.mxu0 %v3600_v33 }
 0x10a   :  { %1446 = vmatmul.bf16.gmra.mxu1 %v3603_v36  ;;  %v425_v40 = vpop.f32.mrf.mxu0 }
 0x10b   :  { %v551_v38 = vpop.f32.mrf.mxu3  ;;  %v850_v46 = vmax.f32 %v463_v37, 0.0  ;;  %v514_v49 = vpop.f32.mrf.mxu1  ;;  %v426_v62 = vadd.f32 %v425_v40, %v3455_v51 }
 0x10c   :  { %v552_v39 = vadd.f32 %v551_v38, %v3452_v50  ;;  %v515_v2 = vadd.f32 %v514_v49, %v3452_v50 }
 0x10d   :  { %602 = vmatmul.bf16.gmra.mxu2 %v3381_v11  ;;  %v3610_v57 = vpack.c.bf16 %v850_v46, %v846_v44  ;;  %v790_v15 = vmax.f32 %v426_v62, 0.0 }
 0x10e   :  { %v851_v56 = vmax.f32 %v552_v39, 0.0  ;;  %v791_v21 = vmax.f32 %v515_v2, 0.0  ;;  %v2732_v2 = vld [vmem:[%s4727_s3 + $0x78] sm:$0xf0] }
 0x10f   :  { %4768 = vst [vmem:[#allocation12_spill] sm:$0xff] %v3610_v57 }
 0x110   :  { %691 = vmatmul.bf16.gmra.mxu3 %v3381_v11  ;;  %v3619_v60 = vpack.c.bf16 %v851_v56, %v847_v54  ;;  %v3095_v11 = vld [vmem:[%s4727_s3 + $0x1b4] sm:$0xf0]  ;;  %v465_v12 = vpop.f32.mrf.mxu2 }
 0x111   :  { %v2891_v6 = vor.u32 %v3095_v11, %v2890_v1  ;;  %v466_v30 = vadd.f32 %v465_v12, %v3455_v51  ;;  %v3054_v11 = vld [vmem:[%s4727_s3 + $0x74] sm:$0xf] }
 0x112   :  { %4769 = vst [vmem:[#allocation13_spill] sm:$0xff] %v3619_v60  ;;  %v427_v14 = vpop.f32.mrf.mxu0 }
 0x113   :  { %v554_v9 = vpop.f32.mrf.mxu3  ;;  %1595 = vmatpush.bf16.msra.mxu3 %v2891_v6  ;;  %v428_v17 = vadd.f32 %v427_v14, %v3455_v51  ;;  %v516_v18 = vpop.f32.mrf.mxu1  ;;  %v854_v40 = vmax.f32 %v466_v30, 0.0  ;;  %v2735_v6 = vor.u32 %v3054_v11, %v2732_v2  ;;  %v998_v11 = vld [vmem:[%s4728_s4] sm:$0x3] }
 0x114   :  { %v517_v22 = vadd.f32 %v516_v18, %v3452_v50  ;;  %v555_v32 = vadd.f32 %v554_v9, %v3452_v50  ;;  %v3070_v18 = vld [vmem:[%s4727_s3 + $0xf4] sm:$0xf] }
 0x115   :  { %v794_v24 = vmax.f32 %v428_v17, 0.0  ;;  %1680 = vmatpush.bf16.msra.mxu0 %v2735_v6 }
 0x116   :  { %v795_v26 = vmax.f32 %v517_v22, 0.0  ;;  %v855_v49 = vmax.f32 %v555_v32, 0.0 }
 0x117   :  { %v3632_v28 = vpack.c.bf16 %v794_v24, %v790_v15 }
 0x118   :  { %v467_v42 = vpop.f32.mrf.mxu2  ;;  %v3635_v34 = vpack.c.bf16 %v795_v26, %v791_v21  ;;  %v2796_v21 = vld [vmem:[%s4727_s3 + $0xf8] sm:$0xf0] }
 0x119   :  { %v468_v35 = vadd.f32 %v467_v42, %v3455_v51  ;;  %1362 = vmatmul.bf16.gmra.mxu0 %v3632_v28  ;;  %v2799_v24 = vor.u32 %v3070_v18, %v2796_v21 }
 0x11a   :  { %1451 = vmatmul.bf16.gmra.mxu1 %v3635_v34  ;;  %v430_v39 = vpop.f32.mrf.mxu0 }
 0x11b   :  { %v556_v37 = vpop.f32.mrf.mxu3  ;;  %v858_v44 = vmax.f32 %v468_v35, 0.0  ;;  %v519_v46 = vpop.f32.mrf.mxu1  ;;  %v431_v52 = vadd.f32 %v430_v39, %v3455_v51  ;;  %1769 = vmatpush.bf16.msra.mxu1 %v2799_v24 }
 0x11c   :  { %v557_v38 = vadd.f32 %v556_v37, %v3452_v50  ;;  %v520_v62 = vadd.f32 %v519_v46, %v3452_v50 }
 0x11d   :  { %607 = vmatmul.bf16.gmra.mxu2 %v3442_v45  ;;  %v3642_v56 = vpack.c.bf16 %v858_v44, %v854_v40  ;;  %v798_v9 = vmax.f32 %v431_v52, 0.0 }
 0x11e   :  { %v859_v54 = vmax.f32 %v557_v38, 0.0  ;;  %v799_v15 = vmax.f32 %v520_v62, 0.0 }
 0x11f   :  { %4770 = vst [vmem:[#allocation14_spill] sm:$0xff] %v3642_v56 }
 0x120   :  { %696 = vmatmul.bf16.gmra.mxu3 %v3442_v45  ;;  %v3645_v59 = vpack.c.bf16 %v859_v54, %v855_v49  ;;  %v470_v20 = vpop.f32.mrf.mxu2 }
 0x121   :  { %v471_v30 = vadd.f32 %v470_v20, %v3455_v51 }
 0x122   :  { %4771 = vst [vmem:[#allocation15_spill] sm:$0xff] %v3645_v59  ;;  %v432_v12 = vpop.f32.mrf.mxu0 }
 0x123   :  { %v559_v1 = vpop.f32.mrf.mxu3  ;;  %v433_v45 = vadd.f32 %v432_v12, %v3455_v51  ;;  %v521_v14 = vpop.f32.mrf.mxu1  ;;  %v862_v44 = vmax.f32 %v471_v30, 0.0  ;;  %v3093_v12 = vld [vmem:[%s4727_s3 + $0x1a4] sm:$0xf0] }
 0x124   :  { %v522_v17 = vadd.f32 %v521_v14, %v3452_v50  ;;  %v560_v42 = vadd.f32 %v559_v1, %v3452_v50  ;;  %v3700_v14 = vperm.slane %v3449_v47, 3 }
 0x125   :  { %v802_v22 = vmax.f32 %v433_v45, 0.0  ;;  %v3697_v45 = vperm.slane %v998_v11, 0  ;;  %v3052_v11 = vld [vmem:[%s4727_s3 + $0x64] sm:$0xf] }
 0x126   :  { %v803_v26 = vmax.f32 %v522_v17, 0.0  ;;  %v863_v49 = vmax.f32 %v560_v42, 0.0 }
 0x127   :  { %v3664_v32 = vpack.c.bf16 %v802_v22, %v798_v9  ;;  %v3695_v9 = vperm.slane %v3449_v47, 2 }
 0x128   :  { %v472_v35 = vpop.f32.mrf.mxu2  ;;  %v3667_v37 = vpack.c.bf16 %v803_v26, %v799_v15 }
 0x129   :  { %v473_v38 = vadd.f32 %v472_v35, %v3455_v51  ;;  %1367 = vmatmul.bf16.gmra.mxu0 %v3664_v32  ;;  %v2818_v51 = vld [vmem:[%s4727_s3 + $0x120] sm:$0xf] }
 0x12a   :  { %1456 = vmatmul.bf16.gmra.mxu1 %v3667_v37 }
 0x12b   :  { %v561_v39 = vpop.f32.mrf.mxu3  ;;  %v866_v46 = vmax.f32 %v473_v38, 0.0 }
 0x12c   :  { %v562_v40 = vadd.f32 %v561_v39, %v3452_v50  ;;  %v3077_v50 = vld [vmem:[%s4727_s3 + $0x124] sm:$0xf0] }
 0x12d   :  { %612 = vmatmul.bf16.gmra.mxu2 %v3257_v53  ;;  %v3674_v52 = vpack.c.bf16 %v866_v46, %v862_v44  ;;  %v2819_v20 = vor.u32 %v3077_v50, %v2818_v51 }
 0x12e   :  { %v867_v54 = vmax.f32 %v562_v40, 0.0 }
 0x12f   :  { %4772 = vst [vmem:[#allocation16_spill] sm:$0xff] %v3674_v52  ;;  %1507 = vmatpush.bf16.msra.mxu2 %v2819_v20 }
 0x130   :  { %701 = vmatmul.bf16.gmra.mxu3 %v3257_v53  ;;  %v3683_v62 = vpack.c.bf16 %v867_v54, %v863_v49  ;;  %v573_v1 = vpop.f32.mrf.mxu2  ;;  %v2882_v53 = vld [vmem:[%s4727_s3 + $0x1a0] sm:$0xf] }
 0x131   :  { %v2883_v6 = vor.u32 %v3093_v12, %v2882_v53  ;;  %v574_v17 = vadd.f32 %v573_v1, %v3695_v9  ;;  %v2788_v12 = vld [vmem:[%s4727_s3 + $0xe8] sm:$0xf0] }
 0x132   :  { %4773 = vst [vmem:[#allocation17_spill] sm:$0xff] %v3683_v62 }
 0x133   :  { %v662_v2 = vpop.f32.mrf.mxu3  ;;  %1596 = vmatpush.bf16.msra.mxu3 %v2883_v6  ;;  %v744_v35 = vmax.f32 %v574_v17, 0.0 }
 0x134   :  { %v663_v22 = vadd.f32 %v662_v2, %v3700_v14  ;;  %v2724_v2 = vld [vmem:[%s4727_s3 + $0x68] sm:$0xf0] }
 0x135   :  { %v2727_v53 = vor.u32 %v3052_v11, %v2724_v2 }
 0x136   :  { %v1333_v15 = vpop.f32.mrf.mxu0  ;;  %v745_v39 = vmax.f32 %v663_v22, 0.0 }
 0x137   :  { %v1334_v18 = vadd.f32 %v1333_v15, %v3697_v45  ;;  %v1422_v21 = vpop.f32.mrf.mxu1  ;;  %1681 = vmatpush.bf16.msra.mxu0 %v2727_v53 }
 0x138   :  { %v575_v24 = vpop.f32.mrf.mxu2 }
 0x139   :  { %v3705_v26 = vadd.f32 %v1422_v21, %v1334_v18  ;;  %v576_v30 = vadd.f32 %v575_v24, %v3695_v9  ;;  %1372 = vmatmul.bf16.gmra.mxu0 %v3486_v27 }
 0x13a   :  { %1461 = vmatmul.bf16.gmra.mxu1 %v3489_v29 }
 0x13b   :  { %v664_v42 = vpop.f32.mrf.mxu3  ;;  %v748_v38 = vmax.f32 %v576_v30, 0.0 }
 0x13c   :  { %v665_v47 = vadd.f32 %v664_v42, %v3700_v14 }
 0x13d   :  { %v3711_v44 = vpack.c.bf16 %v748_v38, %v744_v35  ;;  %617 = vmatmul.bf16.gmra.mxu2 %v3271_v5 }
 0x13e   :  { %v749_v40 = vmax.f32 %v665_v47, 0.0  ;;  %v1335_v49 = vpop.f32.mrf.mxu0 }
 0x13f   :  { %4774 = vst [vmem:[#allocation18_spill] sm:$0xff] %v3711_v44  ;;  %v1336_v54 = vadd.f32 %v1335_v49, %v3697_v45  ;;  %v1424_v51 = vpop.f32.mrf.mxu1 }
 0x140   :  { %v3714_v46 = vpack.c.bf16 %v749_v40, %v745_v39  ;;  %706 = vmatmul.bf16.gmra.mxu3 %v3271_v5  ;;  %v578_v50 = vpop.f32.mrf.mxu2  ;;  %v3068_v5 = vld [vmem:[%s4727_s3 + $0xe4] sm:$0xf] }
 0x141   :  { %v3718_v20 = vadd.f32 %v1424_v51, %v1336_v54  ;;  %v2791_v6 = vor.u32 %v3068_v5, %v2788_v12  ;;  %v579_v17 = vadd.f32 %v578_v50, %v3695_v9  ;;  %v2810_v50 = vld [vmem:[%s4727_s3 + $0x110] sm:$0xf] }
 0x142   :  { %4775 = vst [vmem:[#allocation19_spill] sm:$0xff] %v3714_v46 }
 0x143   :  { %v667_v1 = vpop.f32.mrf.mxu3  ;;  %1770 = vmatpush.bf16.msra.mxu1 %v2791_v6  ;;  %v752_v38 = vmax.f32 %v579_v17, 0.0  ;;  %v3091_v17 = vld [vmem:[%s4727_s3 + $0x194] sm:$0xf0] }
 0x144   :  { %v668_v22 = vadd.f32 %v667_v1, %v3700_v14  ;;  %v3075_v1 = vld [vmem:[%s4727_s3 + $0x114] sm:$0xf0] }
 0x145   :  { %v2811_v5 = vor.u32 %v3075_v1, %v2810_v50 }
 0x146   :  { %v1338_v15 = vpop.f32.mrf.mxu0  ;;  %v753_v40 = vmax.f32 %v668_v22, 0.0 }
 0x147   :  { %v1339_v18 = vadd.f32 %v1338_v15, %v3697_v45  ;;  %v1427_v21 = vpop.f32.mrf.mxu1  ;;  %1508 = vmatpush.bf16.msra.mxu2 %v2811_v5 }
 0x148   :  { %v580_v24 = vpop.f32.mrf.mxu2 }
 0x149   :  { %v3735_v30 = vadd.f32 %v1427_v21, %v1339_v18  ;;  %v581_v42 = vadd.f32 %v580_v24, %v3695_v9  ;;  %1377 = vmatmul.bf16.gmra.mxu0 %v3506_v61 }
 0x14a   :  { %1466 = vmatmul.bf16.gmra.mxu1 %v3515_v0 }
 0x14b   :  { %v669_v47 = vpop.f32.mrf.mxu3  ;;  %v756_v39 = vmax.f32 %v581_v42, 0.0 }
 0x14c   :  { %v670_v35 = vadd.f32 %v669_v47, %v3700_v14 }
 0x14d   :  { %622 = vmatmul.bf16.gmra.mxu2 %v3285_v13  ;;  %v3742_v54 = vpack.c.bf16 %v756_v39, %v752_v38 }
 0x14e   :  { %v757_v49 = vmax.f32 %v670_v35, 0.0  ;;  %v1340_v51 = vpop.f32.mrf.mxu0 }
 0x14f   :  { %4776 = vst [vmem:[#allocation20_spill] sm:$0xff] %v3742_v54  ;;  %v1341_v2 = vadd.f32 %v1340_v51, %v3697_v45  ;;  %v1429_v53 = vpop.f32.mrf.mxu1 }
 0x150   :  { %711 = vmatmul.bf16.gmra.mxu3 %v3285_v13  ;;  %v3751_v11 = vpack.c.bf16 %v757_v49, %v753_v40  ;;  %v583_v12 = vpop.f32.mrf.mxu2  ;;  %v2874_v13 = vld [vmem:[%s4727_s3 + $0x190] sm:$0xf] }
 0x151   :  { %v3754_v6 = vadd.f32 %v1429_v53, %v1341_v2  ;;  %v2875_v18 = vor.u32 %v3091_v17, %v2874_v13  ;;  %v584_v22 = vadd.f32 %v583_v12, %v3695_v9  ;;  %v3141_v53 = vld [vmem:[%s4724_s0 + $0x58] sm:$0xff] }
 0x152   :  { %4777 = vst [vmem:[#allocation21_spill] sm:$0xff] %v3751_v11 }
 0x153   :  { %v672_v15 = vpop.f32.mrf.mxu3  ;;  %1597 = vmatpush.bf16.msra.mxu3 %v2875_v18  ;;  %v760_v51 = vmax.f32 %v584_v22, 0.0 }
 0x154   :  { %v673_v47 = vadd.f32 %v672_v15, %v3700_v14 }
 0x156   :  { %v1343_v21 = vpop.f32.mrf.mxu0  ;;  %v761_v1 = vmax.f32 %v673_v47, 0.0 }
 0x157   :  { %v1344_v24 = vadd.f32 %v1343_v21, %v3697_v45  ;;  %v1432_v42 = vpop.f32.mrf.mxu1 }
 0x158   :  { %v585_v35 = vpop.f32.mrf.mxu2 }
 0x159   :  { %v3765_v38 = vadd.f32 %v1432_v42, %v1344_v24  ;;  %v586_v39 = vadd.f32 %v585_v35, %v3695_v9  ;;  %1382 = vmatmul.bf16.gmra.mxu0 %v3538_v41  ;;  %v3050_v24 = vld [vmem:[%s4727_s3 + $0x54] sm:$0xf]  ;;  %v2716_v42 = vld [vmem:[%s4727_s3 + $0x58] sm:$0xf0] }
 0x15a   :  { %1471 = vmatmul.bf16.gmra.mxu1 %v3541_v4  ;;  %v2719_v47 = vor.u32 %v3050_v24, %v2716_v42  ;;  %v3066_v35 = vld [vmem:[%s4727_s3 + $0xd4] sm:$0xf] }
 0x15b   :  { %v674_v40 = vpop.f32.mrf.mxu3  ;;  %v764_v50 = vmax.f32 %v586_v39, 0.0  ;;  %v2780_v39 = vld [vmem:[%s4727_s3 + $0xd8] sm:$0xf0] }
 0x15c   :  { %v675_v49 = vadd.f32 %v674_v40, %v3700_v14  ;;  %1682 = vmatpush.bf16.msra.mxu0 %v2719_v47  ;;  %v2783_v40 = vor.u32 %v3066_v35, %v2780_v39 }
 0x15d   :  { %627 = vmatmul.bf16.gmra.mxu2 %v3141_v53  ;;  %v3774_v5 = vpack.c.bf16 %v764_v50, %v760_v51 }
 0x15e   :  { %v765_v2 = vmax.f32 %v675_v49, 0.0  ;;  %v1345_v12 = vpop.f32.mrf.mxu0  ;;  %1771 = vmatpush.bf16.msra.mxu1 %v2783_v40 }
 0x15f   :  { %4778 = vst [vmem:[#allocation22_spill] sm:$0xff] %v3774_v5  ;;  %v1346_v13 = vadd.f32 %v1345_v12, %v3697_v45  ;;  %v1434_v17 = vpop.f32.mrf.mxu1 }
 0x160   :  { %716 = vmatmul.bf16.gmra.mxu3 %v3141_v53  ;;  %v3776_v15 = vpack.c.bf16 %v765_v2, %v761_v1  ;;  %v588_v18 = vpop.f32.mrf.mxu2 }
 0x161   :  { %v3779_v21 = vadd.f32 %v1434_v17, %v1346_v13  ;;  %v589_v51 = vadd.f32 %v588_v18, %v3695_v9 }
 0x162   :  { %4779 = vst [vmem:[#allocation23_spill] sm:$0xff] %v3776_v15 }
 0x163   :  { %v677_v22 = vpop.f32.mrf.mxu3  ;;  %v768_v42 = vmax.f32 %v589_v51, 0.0  ;;  %v3073_v51 = vld [vmem:[%s4727_s3 + $0x104] sm:$0xf0] }
 0x164   :  { %v678_v2 = vadd.f32 %v677_v22, %v3700_v14  ;;  %v3142_v22 = vld [vmem:[%s4724_s0 + $0x60] sm:$0xff] }
 0x166   :  { %v1348_v49 = vpop.f32.mrf.mxu0  ;;  %v769_v47 = vmax.f32 %v678_v2, 0.0 }
 0x167   :  { %v1349_v50 = vadd.f32 %v1348_v49, %v3697_v45  ;;  %v1437_v1 = vpop.f32.mrf.mxu1  ;;  %v2802_v49 = vld [vmem:[%s4727_s3 + $0x100] sm:$0xf] }
 0x168   :  { %v590_v53 = vpop.f32.mrf.mxu2 }
 0x169   :  { %v3796_v12 = vadd.f32 %v1437_v1, %v1349_v50  ;;  %v591_v13 = vadd.f32 %v590_v53, %v3695_v9  ;;  %1387 = vmatmul.bf16.gmra.mxu0 %v3558_v19  ;;  %v2803_v53 = vor.u32 %v3073_v51, %v2802_v49 }
 0x16a   :  { %1476 = vmatmul.bf16.gmra.mxu1 %v3567_v23 }
 0x16b   :  { %4780 = vst [vmem:[#allocation24_spill] sm:$0xff] %v3796_v12  ;;  %v679_v17 = vpop.f32.mrf.mxu3  ;;  %v772_v18 = vmax.f32 %v591_v13, 0.0  ;;  %1509 = vmatpush.bf16.msra.mxu2 %v2803_v53 }
 0x16c   :  { %v680_v24 = vadd.f32 %v679_v17, %v3700_v14 }
 0x16d   :  { %632 = vmatmul.bf16.gmra.mxu2 %v3142_v22  ;;  %v3805_v39 = vpack.c.bf16 %v772_v18, %v768_v42  ;;  %v2866_v42 = vld [vmem:[%s4727_s3 + $0x180] sm:$0xf]  ;;  %v3089_v18 = vld [vmem:[%s4727_s3 + $0x184] sm:$0xf0] }
 0x16e   :  { %v773_v35 = vmax.f32 %v680_v24, 0.0  ;;  %v1350_v40 = vpop.f32.mrf.mxu0 }
 0x16f   :  { %4781 = vst [vmem:[#allocation25_spill] sm:$0xff] %v3805_v39  ;;  %v1351_v1 = vadd.f32 %v1350_v40, %v3697_v45  ;;  %v1439_v2 = vpop.f32.mrf.mxu1 }
 0x170   :  { %721 = vmatmul.bf16.gmra.mxu3 %v3142_v22  ;;  %v3813_v50 = vpack.c.bf16 %v773_v35, %v769_v47  ;;  %v593_v13 = vpop.f32.mrf.mxu2  ;;  %v2867_v22 = vor.u32 %v3089_v18, %v2866_v42 }
 0x171   :  { %v3816_v17 = vadd.f32 %v1439_v2, %v1351_v1  ;;  %v594_v35 = vadd.f32 %v593_v13, %v3695_v9 }
 0x172   :  { %4782 = vst [vmem:[#allocation26_spill] sm:$0xff] %v3813_v50  ;;  %1598 = vmatpush.bf16.msra.mxu3 %v2867_v22 }
 0x173   :  { %4783 = vst [vmem:[#allocation27_spill] sm:$0xff] %v3816_v17  ;;  %v682_v24 = vpop.f32.mrf.mxu3  ;;  %v776_v42 = vmax.f32 %v594_v35, 0.0 }
 0x174   :  { %v683_v51 = vadd.f32 %v682_v24, %v3700_v14  ;;  %v3143_v24 = vld [vmem:[%s4724_s0 + $0x68] sm:$0xff] }
 0x176   :  { %v1353_v47 = vpop.f32.mrf.mxu0  ;;  %v777_v13 = vmax.f32 %v683_v51, 0.0  ;;  %v2708_v51 = vld [vmem:[%s4727_s3 + $0x48] sm:$0xf0] }
 0x177   :  { %v1354_v40 = vadd.f32 %v1353_v47, %v3697_v45  ;;  %v1442_v49 = vpop.f32.mrf.mxu1 }
 0x178   :  { %v595_v1 = vpop.f32.mrf.mxu2 }
 0x179   :  { %v3827_v2 = vadd.f32 %v1442_v49, %v1354_v40  ;;  %v596_v53 = vadd.f32 %v595_v1, %v3695_v9  ;;  %1392 = vmatmul.bf16.gmra.mxu0 %v3590_v7 }
 0x17a   :  { %1481 = vmatmul.bf16.gmra.mxu1 %v3593_v8 }
 0x17b   :  { %4784 = vst [vmem:[#allocation28_spill] sm:$0xff] %v3827_v2  ;;  %v684_v23 = vpop.f32.mrf.mxu3  ;;  %v780_v18 = vmax.f32 %v596_v53, 0.0 }
 0x17c   :  { %v685_v19 = vadd.f32 %v684_v23, %v3700_v14 }
 0x17d   :  { %637 = vmatmul.bf16.gmra.mxu2 %v3143_v24  ;;  %v3836_v47 = vpack.c.bf16 %v780_v18, %v776_v42  ;;  %v3064_v42 = vld [vmem:[%s4727_s3 + $0xc4] sm:$0xf]  ;;  %v2772_v18 = vld [vmem:[%s4727_s3 + $0xc8] sm:$0xf0] }
 0x17e   :  { %v781_v22 = vmax.f32 %v685_v19, 0.0  ;;  %v1355_v40 = vpop.f32.mrf.mxu0  ;;  %v3048_v19 = vld [vmem:[%s4727_s3 + $0x44] sm:$0xf] }
 0x17f   :  { %4785 = vst [vmem:[#allocation29_spill] sm:$0xff] %v3836_v47  ;;  %v1356_v1 = vadd.f32 %v1355_v40, %v3697_v45  ;;  %v1444_v23 = vpop.f32.mrf.mxu1  ;;  %v2711_v53 = vor.u32 %v3048_v19, %v2708_v51  ;;  %v3046_v51 = vld [vmem:[%s4727_s3 + $0x34] sm:$0xf] }
 0x180   :  { %726 = vmatmul.bf16.gmra.mxu3 %v3143_v24  ;;  %v3838_v49 = vpack.c.bf16 %v781_v22, %v777_v13  ;;  %v598_v7 = vpop.f32.mrf.mxu2  ;;  %v2775_v13 = vor.u32 %v3064_v42, %v2772_v18  ;;  %v3062_v42 = vld [vmem:[%s4727_s3 + $0xb4] sm:$0xf] }
 0x181   :  { %v3841_v8 = vadd.f32 %v1444_v23, %v1356_v1  ;;  %1683 = vmatpush.bf16.msra.mxu0 %v2711_v53  ;;  %v599_v24 = vadd.f32 %v598_v7, %v3695_v9  ;;  %v2700_v53 = vld [vmem:[%s4727_s3 + $0x38] sm:$0xf0] }
 0x182   :  { %4786 = vst [vmem:[#allocation30_spill] sm:$0xff] %v3838_v49  ;;  %1772 = vmatpush.bf16.msra.mxu1 %v2775_v13 }
 0x183   :  { %4787 = vst [vmem:[#allocation31_spill] sm:$0xff] %v3841_v8  ;;  %v687_v35 = vpop.f32.mrf.mxu3  ;;  %v784_v17 = vmax.f32 %v599_v24, 0.0  ;;  %v3060_v24 = vld [vmem:[%s4727_s3 + $0xa4] sm:$0xf] }
 0x184   :  { %v688_v23 = vadd.f32 %v687_v35, %v3700_v14  ;;  %v2703_v35 = vor.u32 %v3046_v51, %v2700_v53  ;;  %v2692_v51 = vld [vmem:[%s4727_s3 + $0x28] sm:$0xf0]  ;;  %v3144_v53 = vld [vmem:[%s4724_s0 + $0x70] sm:$0xff] }
 0x186   :  { %v1358_v22 = vpop.f32.mrf.mxu0  ;;  %1684 = vmatpush.bf16.msra.mxu0 %v2703_v35 }
 0x187   :  { %v1359_v40 = vadd.f32 %v1358_v22, %v3697_v45  ;;  %v1447_v1 = vpop.f32.mrf.mxu1  ;;  %v2764_v22 = vld [vmem:[%s4727_s3 + $0xb8] sm:$0xf0] }
 0x188   :  { %v600_v19 = vpop.f32.mrf.mxu2  ;;  %v2767_v2 = vor.u32 %v3062_v42, %v2764_v22 }
 0x189   :  { %v3867_v7 = vadd.f32 %v1447_v1, %v1359_v40  ;;  %v601_v18 = vadd.f32 %v600_v19, %v3695_v9  ;;  %1397 = vmatmul.bf16.gmra.mxu0 %v3610_v57  ;;  %v785_v40 = vmax.f32 %v688_v23, 0.0  ;;  %v3044_v19 = vld [vmem:[%s4727_s3 + $0x24] sm:$0xf] }
 0x18a   :  { %1486 = vmatmul.bf16.gmra.mxu1 %v3619_v60  ;;  %v2695_v42 = vor.u32 %v3044_v19, %v2692_v51 }
 0x18b   :  { %v689_v13 = vpop.f32.mrf.mxu3  ;;  %v788_v12 = vmax.f32 %v601_v18, 0.0  ;;  %1773 = vmatpush.bf16.msra.mxu1 %v2767_v2  ;;  %v3086_v18 = vld [vmem:[%s4727_s3 + $0x174] sm:$0xf] }
 0x18c   :  { %v690_v8 = vadd.f32 %v689_v13, %v3700_v14  ;;  %v2860_v13 = vld [vmem:[%s4727_s3 + $0x178] sm:$0xf0]  ;;  %1685 = vmatpush.bf16.msra.mxu0 %v2695_v42  ;;  %v3102_v42 = vld [vmem:[%s4727_s3 + $0x1f4] sm:$0xf] }
 0x18d   :  { %642 = vmatmul.bf16.gmra.mxu2 %v3144_v53  ;;  %v3891_v2 = vpack.c.bf16 %v788_v12, %v784_v17  ;;  %v2863_v60 = vor.u32 %v3086_v18, %v2860_v13  ;;  %v3042_v17 = vld [vmem:[%s4727_s3 + $0x14] sm:$0xf]  ;;  %v2748_v18 = vld [vmem:[%s4727_s3 + $0x98] sm:$0xf0] }
 0x18e   :  { %v789_v1 = vmax.f32 %v690_v8, 0.0  ;;  %v2756_v8 = vld [vmem:[%s4727_s3 + $0xa8] sm:$0xf0]  ;;  %v1360_v23 = vpop.f32.mrf.mxu0 }
 0x18f   :  { %4788 = vst [vmem:[#allocation32_spill] sm:$0xff] %v3891_v2  ;;  %v2759_v35 = vor.u32 %v3060_v24, %v2756_v8  ;;  %v1361_v19 = vadd.f32 %v1360_v23, %v3697_v45  ;;  %v1449_v51 = vpop.f32.mrf.mxu1  ;;  %1858 = vmatpush.bf16.msrb.mxu2 %v2863_v60  ;;  %v2924_v8 = vld [vmem:[%s4727_s3 + $0x1f8] sm:$0xf0]  ;;  %v3040_v60 = vld [vmem:[%s4727_s3 + $0x4] sm:$0xf] }
 0x190   :  { %731 = vmatmul.bf16.gmra.mxu3 %v3144_v53  ;;  %v3899_v22 = vpack.c.bf16 %v789_v1, %v785_v40  ;;  %v603_v12 = vpop.f32.mrf.mxu2  ;;  %v2684_v53 = vld [vmem:[%s4727_s3 + $0x18] sm:$0xf0]  ;;  %v3058_v40 = vld [vmem:[%s4727_s3 + $0x94] sm:$0xf]  ;;  %v2927_v13 = vor.u32 %v3102_v42, %v2924_v8 }
 0x191   :  { %1774 = vmatpush.bf16.msra.mxu1 %v2759_v35  ;;  %v3911_v1 = vadd.f32 %v1449_v51, %v1361_v19  ;;  %v2687_v23 = vor.u32 %v3042_v17, %v2684_v53  ;;  %v2751_v35 = vor.u32 %v3058_v40, %v2748_v18  ;;  %v2676_v19 = vld [vmem:[%s4727_s3 + $0x8] sm:$0xf0]  ;;  %v3056_v17 = vld [vmem:[%s4727_s3 + $0x84] sm:$0xf]  ;;  %v604_v8 = vadd.f32 %v603_v12, %v3695_v9 }
 0x192   :  { %4789 = vst [vmem:[#allocation33_spill] sm:$0xff] %v3899_v22  ;;  %1947 = vmatpush.bf16.msrb.mxu3 %v2927_v13  ;;  %v2679_v51 = vor.u32 %v3040_v60, %v2676_v19  ;;  %v2740_v53 = vld [vmem:[%s4727_s3 + $0x88] sm:$0xf0] }
 0x193   :  { %4790 = vst [vmem:[#allocation34_spill] sm:$0xff] %v3911_v1  ;;  %v692_v24 = vpop.f32.mrf.mxu3  ;;  %1686 = vmatpush.bf16.msra.mxu0 %v2687_v23  ;;  %v2743_v42 = vor.u32 %v3056_v17, %v2740_v53  ;;  %v792_v12 = vmax.f32 %v604_v8, 0.0 }
 0x194   :  { %v693_v13 = vadd.f32 %v692_v24, %v3700_v14  ;;  %v3145_v24 = vld [vmem:[%s4724_s0 + $0x78] sm:$0xff] }
 0x195   :  { %1775 = vmatpush.bf16.msra.mxu1 %v2751_v35 }
 0x196   :  { %v1363_v40 = vpop.f32.mrf.mxu0  ;;  %v793_v53 = vmax.f32 %v693_v13, 0.0 }
 0x197   :  { %v1364_v23 = vadd.f32 %v1363_v40, %v3697_v45  ;;  %v1452_v18 = vpop.f32.mrf.mxu1  ;;  %1687 = vmatpush.bf16.msra.mxu0 %v2679_v51 }
 0x198   :  { %v605_v35 = vpop.f32.mrf.mxu2 }
 0x199   :  { %1776 = vmatpush.bf16.msra.mxu1 %v2743_v42  ;;  %v3937_v60 = vadd.f32 %v1452_v18, %v1364_v23  ;;  %v606_v19 = vadd.f32 %v605_v35, %v3695_v9  ;;  %1402 = vmatmul.bf16.gmra.mxu0 %v3642_v56 }
 0x19a   :  { %1491 = vmatmul.bf16.gmra.mxu1 %v3645_v59 }
 0x19b   :  { %v694_v57 = vpop.f32.mrf.mxu3  ;;  %v796_v17 = vmax.f32 %v606_v19, 0.0 }
 0x19c   :  { %v695_v1 = vadd.f32 %v694_v57, %v3700_v14 }
 0x19d   :  { %647 = vmatmul.bf16.gmra.mxu2 %v3145_v24  ;;  %v3946_v51 = vpack.c.bf16 %v796_v17, %v792_v12 }
 0x19e   :  { %v797_v40 = vmax.f32 %v695_v1, 0.0  ;;  %v1365_v42 = vpop.f32.mrf.mxu0 }
 0x19f   :  { %4791 = vst [vmem:[#allocation35_spill] sm:$0xff] %v3946_v51  ;;  %v1366_v18 = vadd.f32 %v1365_v42, %v3697_v45  ;;  %v1454_v57 = vpop.f32.mrf.mxu1 }
 0x1a0   :  { %736 = vmatmul.bf16.gmra.mxu3 %v3145_v24  ;;  %v3948_v23 = vpack.c.bf16 %v797_v40, %v793_v53  ;;  %v608_v35 = vpop.f32.mrf.mxu2 }
 0x1a1   :  { %v3951_v59 = vadd.f32 %v1454_v57, %v1366_v18  ;;  %v609_v1 = vadd.f32 %v608_v35, %v3695_v9 }
 0x1a2   :  { %4792 = vst [vmem:[#allocation36_spill] sm:$0xff] %v3948_v23 }
 0x1a3   :  { %4793 = vst [vmem:[#allocation37_spill] sm:$0xff] %v3951_v59  ;;  %v697_v8 = vpop.f32.mrf.mxu3  ;;  %v800_v18 = vmax.f32 %v609_v1, 0.0 }
 0x1a4   :  { %v698_v12 = vadd.f32 %v697_v8, %v3700_v14  ;;  %v3084_v8 = vld [vmem:[%s4727_s3 + $0x164] sm:$0xf] }
 0x1a6   :  { %v1368_v13 = vpop.f32.mrf.mxu0  ;;  %v801_v35 = vmax.f32 %v698_v12, 0.0 }
 0x1a7   :  { %v1369_v19 = vadd.f32 %v1368_v13, %v3697_v45  ;;  %v1457_v56 = vpop.f32.mrf.mxu1 }
 0x1a8   :  { %v610_v17 = vpop.f32.mrf.mxu2 }
 0x1a9   :  { %v3956_v24 = vadd.f32 %v1457_v56, %v1369_v19  ;;  %v611_v53 = vadd.f32 %v610_v17, %v3695_v9  ;;  %1407 = vmatmul.bf16.gmra.mxu0 %v3674_v52  ;;  %v2852_v19 = vld [vmem:[%s4727_s3 + $0x168] sm:$0xf0] }
 0x1aa   :  { %1496 = vmatmul.bf16.gmra.mxu1 %v3683_v62 }
 0x1ab   :  { %v699_v40 = vpop.f32.mrf.mxu3  ;;  %v804_v57 = vmax.f32 %v611_v53, 0.0  ;;  %v2855_v53 = vor.u32 %v3084_v8, %v2852_v19 }
 0x1ac   :  { %v700_v42 = vadd.f32 %v699_v40, %v3700_v14 }
 0x1ad   :  { %1510 = vmatmul.bf16.vlgmr.msra.gmra.mxu2 %v3711_v44  ;;  %v3963_v13 = vpack.c.bf16 %v804_v57, %v800_v18  ;;  %v3100_v57 = vld [vmem:[%s4727_s3 + $0x1e4] sm:$0xf] }
 0x1ae   :  { %v805_v59 = vmax.f32 %v700_v42, 0.0  ;;  %v1370_v56 = vpop.f32.mrf.mxu0  ;;  %1859 = vmatpush.bf16.msrb.mxu2 %v2855_v53 }
 0x1af   :  { %4794 = vst [vmem:[#allocation38_spill] sm:$0xff] %v3963_v13  ;;  %v1371_v1 = vadd.f32 %v1370_v56, %v3697_v45  ;;  %v1459_v12 = vpop.f32.mrf.mxu1 }
 0x1b0   :  { %1599 = vmatmul.bf16.vlgmr.msra.gmra.mxu3 %v3714_v46  ;;  %v3972_v17 = vpack.c.bf16 %v805_v59, %v801_v35  ;;  %v613_v40 = vpop.f32.mrf.mxu2  ;;  %v2916_v46 = vld [vmem:[%s4727_s3 + $0x1e8] sm:$0xf0] }
 0x1b1   :  { %v3975_v42 = vadd.f32 %v1459_v12, %v1371_v1  ;;  %v2919_v44 = vor.u32 %v3100_v57, %v2916_v46  ;;  %v614_v35 = vadd.f32 %v613_v40, %v3695_v9 }
 0x1b2   :  { %4795 = vst [vmem:[#allocation39_spill] sm:$0xff] %v3972_v17 }
 0x1b3   :  { %v702_v18 = vpop.f32.mrf.mxu3  ;;  %1948 = vmatpush.bf16.msrb.mxu3 %v2919_v44  ;;  %v808_v44 = vmax.f32 %v614_v35, 0.0 }
 0x1b4   :  { %v703_v19 = vadd.f32 %v702_v18, %v3700_v14 }
 0x1b6   :  { %v1373_v59 = vpop.f32.mrf.mxu0  ;;  %v809_v40 = vmax.f32 %v703_v19, 0.0 }
 0x1b7   :  { %v1374_v56 = vadd.f32 %v1373_v59, %v3697_v45  ;;  %v1462_v8 = vpop.f32.mrf.mxu1 }
 0x1b8   :  { %v615_v1 = vpop.f32.mrf.mxu2 }
 0x1b9   :  { %v3986_v12 = vadd.f32 %v1462_v8, %v1374_v56  ;;  %v616_v53 = vadd.f32 %v615_v1, %v3695_v9  ;;  %1688 = vmatmul.bf16.vlgmr.msra.gmra.mxu0 %v3476_v10 }
 0x1ba   :  { %1777 = vmatmul.bf16.vlgmr.msra.gmra.mxu1 %v3479_v16 }
 0x1bb   :  { %v704_v62 = vpop.f32.mrf.mxu3  ;;  %v812_v46 = vmax.f32 %v616_v53, 0.0 }
 0x1bc   :  { %v705_v52 = vadd.f32 %v704_v62, %v3700_v14 }
 0x1bd   :  { %1515 = vmatmul.bf16.gmra.mxu2 %v3742_v54  ;;  %v3993_v59 = vpack.c.bf16 %v812_v46, %v808_v44 }
 0x1be   :  { %v813_v57 = vmax.f32 %v705_v52, 0.0  ;;  %v1375_v18 = vpop.f32.mrf.mxu0 }
 0x1bf   :  { %v1376_v8 = vadd.f32 %v1375_v18, %v3697_v45  ;;  %v1464_v10 = vpop.f32.mrf.mxu1 }
 0x1c0   :  { %1604 = vmatmul.bf16.gmra.mxu3 %v3751_v11  ;;  %v3996_v56 = vpack.c.bf16 %v813_v57, %v809_v40  ;;  %v618_v1 = vpop.f32.mrf.mxu2 }
 0x1c1   :  { %v3999_v62 = vadd.f32 %v1464_v10, %v1376_v8  ;;  %v619_v19 = vadd.f32 %v618_v1, %v3695_v9 }
 0x1c3   :  { %v707_v16 = vpop.f32.mrf.mxu3  ;;  %v816_v8 = vmax.f32 %v619_v19, 0.0 }
 0x1c4   :  { %v708_v44 = vadd.f32 %v707_v16, %v3700_v14 }
 0x1c6   :  { %v1378_v35 = vpop.f32.mrf.mxu0  ;;  %v817_v1 = vmax.f32 %v708_v44, 0.0 }
 0x1c7   :  { %v1379_v52 = vadd.f32 %v1378_v35, %v3697_v45  ;;  %v1467_v53 = vpop.f32.mrf.mxu1 }
 0x1c8   :  { %v620_v46 = vpop.f32.mrf.mxu2 }
 0x1c9   :  { %v4004_v11 = vadd.f32 %v1467_v53, %v1379_v52  ;;  %v621_v40 = vadd.f32 %v620_v46, %v3695_v9  ;;  %1693 = vmatmul.bf16.gmra.mxu0 %v3496_v43  ;;  %v3082_v52 = vld [vmem:[%s4727_s3 + $0x154] sm:$0xf]  ;;  %v2844_v43 = vld [vmem:[%s4727_s3 + $0x158] sm:$0xf0] }
 0x1ca   :  { %1782 = vmatmul.bf16.gmra.mxu1 %v3499_v48  ;;  %v2847_v44 = vor.u32 %v3082_v52, %v2844_v43 }
 0x1cb   :  { %v709_v57 = vpop.f32.mrf.mxu3  ;;  %v820_v10 = vmax.f32 %v621_v40, 0.0 }
 0x1cc   :  { %v710_v18 = vadd.f32 %v709_v57, %v3700_v14  ;;  %1860 = vmatpush.bf16.msrb.mxu2 %v2847_v44 }
 0x1cd   :  { %1520 = vmatmul.bf16.gmra.mxu2 %v3774_v5  ;;  %v4011_v35 = vpack.c.bf16 %v820_v10, %v816_v8  ;;  %v2908_v8 = vld [vmem:[%s4727_s3 + $0x1d8] sm:$0xf0] }
 0x1ce   :  { %v821_v54 = vmax.f32 %v710_v18, 0.0  ;;  %v1380_v16 = vpop.f32.mrf.mxu0  ;;  %v3098_v18 = vld [vmem:[%s4727_s3 + $0x1d4] sm:$0xf] }
 0x1cf   :  { %v1381_v19 = vadd.f32 %v1380_v16, %v3697_v45  ;;  %v1469_v53 = vpop.f32.mrf.mxu1  ;;  %v2911_v10 = vor.u32 %v3098_v18, %v2908_v8 }
 0x1d0   :  { %1609 = vmatmul.bf16.gmra.mxu3 %v3776_v15  ;;  %v4020_v48 = vpack.c.bf16 %v821_v54, %v817_v1  ;;  %v623_v46 = vpop.f32.mrf.mxu2 }
 0x1d1   :  { %v4023_v40 = vadd.f32 %v1469_v53, %v1381_v19  ;;  %1949 = vmatpush.bf16.msrb.mxu3 %v2911_v10  ;;  %v624_v1 = vadd.f32 %v623_v46, %v3695_v9 }
 0x1d3   :  { %v712_v57 = vpop.f32.mrf.mxu3  ;;  %v824_v18 = vmax.f32 %v624_v1, 0.0 }
 0x1d4   :  { %v713_v43 = vadd.f32 %v712_v57, %v3700_v14 }
 0x1d6   :  { %v1383_v54 = vpop.f32.mrf.mxu0  ;;  %v825_v46 = vmax.f32 %v713_v43, 0.0 }
 0x1d7   :  { %v1384_v16 = vadd.f32 %v1383_v54, %v3697_v45  ;;  %v1472_v52 = vpop.f32.mrf.mxu1 }
 0x1d8   :  { %v625_v19 = vpop.f32.mrf.mxu2 }
 0x1d9   :  { %v4034_v53 = vadd.f32 %v1472_v52, %v1384_v16  ;;  %v626_v44 = vadd.f32 %v625_v19, %v3695_v9  ;;  %1698 = vmatmul.bf16.gmra.mxu0 %v3528_v25 }
 0x1da   :  { %1787 = vmatmul.bf16.gmra.mxu1 %v3531_v31 }
 0x1db   :  { %v714_v15 = vpop.f32.mrf.mxu3  ;;  %v828_v8 = vmax.f32 %v626_v44, 0.0 }
 0x1dc   :  { %v715_v5 = vadd.f32 %v714_v15, %v3700_v14 }
 0x1dd   :  { %1525 = vmatmul.bf16.gmra.mxu2 %v3805_v39  ;;  %v4041_v54 = vpack.c.bf16 %v828_v8, %v824_v18 }
 0x1de   :  { %v829_v10 = vmax.f32 %v715_v5, 0.0  ;;  %v1385_v57 = vpop.f32.mrf.mxu0 }
 0x1df   :  { %v1386_v52 = vadd.f32 %v1385_v57, %v3697_v45  ;;  %v1474_v25 = vpop.f32.mrf.mxu1 }
 0x1e0   :  { %1614 = vmatmul.bf16.gmra.mxu3 %v3813_v50  ;;  %v4044_v16 = vpack.c.bf16 %v829_v10, %v825_v46  ;;  %v628_v19 = vpop.f32.mrf.mxu2 }
 0x1e1   :  { %v4047_v15 = vadd.f32 %v1474_v25, %v1386_v52  ;;  %v629_v43 = vadd.f32 %v628_v19, %v3695_v9 }
 0x1e3   :  { %v717_v31 = vpop.f32.mrf.mxu3  ;;  %v832_v52 = vmax.f32 %v629_v43, 0.0 }
 0x1e4   :  { %v718_v18 = vadd.f32 %v717_v31, %v3700_v14 }
 0x1e6   :  { %v1388_v1 = vpop.f32.mrf.mxu0  ;;  %v833_v19 = vmax.f32 %v718_v18, 0.0 }
 0x1e7   :  { %v1389_v5 = vadd.f32 %v1388_v1, %v3697_v45  ;;  %v1477_v44 = vpop.f32.mrf.mxu1 }
 0x1e8   :  { %v630_v8 = vpop.f32.mrf.mxu2 }
 0x1e9   :  { %v4052_v50 = vadd.f32 %v1477_v44, %v1389_v5  ;;  %v631_v46 = vadd.f32 %v630_v8, %v3695_v9  ;;  %1703 = vmatmul.bf16.gmra.mxu0 %v3548_v63  ;;  %v3080_v5 = vld [vmem:[%s4727_s3 + $0x144] sm:$0xf]  ;;  %v2836_v63 = vld [vmem:[%s4727_s3 + $0x148] sm:$0xf0] }
 0x1ea   :  { %1792 = vmatmul.bf16.gmra.mxu1 %v3551_v3  ;;  %v2839_v18 = vor.u32 %v3080_v5, %v2836_v63 }
 0x1eb   :  { %v719_v10 = vpop.f32.mrf.mxu3  ;;  %v836_v25 = vmax.f32 %v631_v46, 0.0 }
 0x1ec   :  { %v720_v57 = vadd.f32 %v719_v10, %v3700_v14  ;;  %1861 = vmatpush.bf16.msrb.mxu2 %v2839_v18 }
 0x1ed   :  { %1530 = vmatmul.bf16.gmra.mxu2 %v3836_v47  ;;  %v4059_v1 = vpack.c.bf16 %v836_v25, %v832_v52  ;;  %v2900_v52 = vld [vmem:[%s4727_s3 + $0x1c8] sm:$0xf0] }
 0x1ee   :  { %v837_v39 = vmax.f32 %v720_v57, 0.0  ;;  %v1390_v31 = vpop.f32.mrf.mxu0  ;;  %v3096_v57 = vld [vmem:[%s4727_s3 + $0x1c4] sm:$0xf] }
 0x1ef   :  { %v1391_v43 = vadd.f32 %v1390_v31, %v3697_v45  ;;  %v1479_v44 = vpop.f32.mrf.mxu1  ;;  %v2903_v25 = vor.u32 %v3096_v57, %v2900_v52 }
 0x1f0   :  { %1619 = vmatmul.bf16.gmra.mxu3 %v3838_v49  ;;  %v4068_v3 = vpack.c.bf16 %v837_v39, %v833_v19  ;;  %v633_v8 = vpop.f32.mrf.mxu2 }
 0x1f1   :  { %v4071_v46 = vadd.f32 %v1479_v44, %v1391_v43  ;;  %1950 = vmatpush.bf16.msrb.mxu3 %v2903_v25  ;;  %v634_v19 = vadd.f32 %v633_v8, %v3695_v9 }
 0x1f3   :  { %v722_v10 = vpop.f32.mrf.mxu3  ;;  %v840_v57 = vmax.f32 %v634_v19, 0.0 }
 0x1f4   :  { %v723_v63 = vadd.f32 %v722_v10, %v3700_v14 }
 0x1f6   :  { %v1393_v39 = vpop.f32.mrf.mxu0  ;;  %v841_v8 = vmax.f32 %v723_v63, 0.0 }
 0x1f7   :  { %v1394_v31 = vadd.f32 %v1393_v39, %v3697_v45  ;;  %v1482_v5 = vpop.f32.mrf.mxu1 }
 0x1f8   :  { %v635_v43 = vpop.f32.mrf.mxu2 }
 0x1f9   :  { %v4082_v44 = vadd.f32 %v1482_v5, %v1394_v31  ;;  %v636_v18 = vadd.f32 %v635_v43, %v3695_v9  ;;  %1708 = vmatmul.bf16.gmra.mxu0 %v3580_v55 }
 0x1fa   :  { %1797 = vmatmul.bf16.gmra.mxu1 %v3583_v58 }
 0x1fb   :  { %v724_v49 = vpop.f32.mrf.mxu3  ;;  %v844_v52 = vmax.f32 %v636_v18, 0.0 }
 0x1fc   :  { %v725_v47 = vadd.f32 %v724_v49, %v3700_v14 }
 0x1fd   :  { %1535 = vmatmul.bf16.gmra.mxu2 %v3891_v2  ;;  %v4089_v39 = vpack.c.bf16 %v844_v52, %v840_v57 }
 0x1fe   :  { %v845_v25 = vmax.f32 %v725_v47, 0.0  ;;  %v1395_v10 = vpop.f32.mrf.mxu0 }
 0x1ff   :  { %4796 = vst [vmem:[#allocation40_spill] sm:$0xff] %v4089_v39  ;;  %v1396_v5 = vadd.f32 %v1395_v10, %v3697_v45  ;;  %v1484_v55 = vpop.f32.mrf.mxu1 }
 0x200   :  { %1624 = vmatmul.bf16.gmra.mxu3 %v3899_v22  ;;  %v4092_v31 = vpack.c.bf16 %v845_v25, %v841_v8  ;;  %v638_v43 = vpop.f32.mrf.mxu2 }
 0x201   :  { %v4095_v49 = vadd.f32 %v1484_v55, %v1396_v5  ;;  %v639_v63 = vadd.f32 %v638_v43, %v3695_v9 }
 0x202   :  { %4797 = vst [vmem:[#allocation41_spill] sm:$0xff] %v4092_v31 }
 0x203   :  { %v727_v58 = vpop.f32.mrf.mxu3  ;;  %v848_v5 = vmax.f32 %v639_v63, 0.0 }
 0x204   :  { %v728_v57 = vadd.f32 %v727_v58, %v3700_v14 }
 0x206   :  { %v1398_v19 = vpop.f32.mrf.mxu0  ;;  %v849_v43 = vmax.f32 %v728_v57, 0.0 }
 0x207   :  { %v1399_v47 = vadd.f32 %v1398_v19, %v3697_v45  ;;  %v1487_v18 = vpop.f32.mrf.mxu1 }
 0x208   :  { %v640_v52 = vpop.f32.mrf.mxu2 }
 0x209   :  { %v4100_v22 = vadd.f32 %v1487_v18, %v1399_v47  ;;  %v641_v8 = vadd.f32 %v640_v52, %v3695_v9  ;;  %1713 = vmatmul.bf16.gmra.mxu0 %v3600_v33  ;;  %v3078_v47 = vld [vmem:[%s4727_s3 + $0x134] sm:$0xf]  ;;  %v2828_v33 = vld [vmem:[%s4727_s3 + $0x138] sm:$0xf0] }
 0x20a   :  { %1802 = vmatmul.bf16.gmra.mxu1 %v3603_v36  ;;  %v2831_v57 = vor.u32 %v3078_v47, %v2828_v33 }
 0x20b   :  { %v729_v25 = vpop.f32.mrf.mxu3  ;;  %v852_v55 = vmax.f32 %v641_v8, 0.0 }
 0x20c   :  { %v730_v10 = vadd.f32 %v729_v25, %v3700_v14  ;;  %1862 = vmatpush.bf16.msrb.mxu2 %v2831_v57 }
 0x20d   :  { %1540 = vmatmul.bf16.gmra.mxu2 %v3946_v51  ;;  %v4107_v19 = vpack.c.bf16 %v852_v55, %v848_v5  ;;  %v2892_v5 = vld [vmem:[%s4727_s3 + $0x1b8] sm:$0xf0] }
 0x20e   :  { %v853_v2 = vmax.f32 %v730_v10, 0.0  ;;  %v1400_v58 = vpop.f32.mrf.mxu0  ;;  %v3094_v10 = vld [vmem:[%s4727_s3 + $0x1b4] sm:$0xf] }
 0x20f   :  { %v1401_v63 = vadd.f32 %v1400_v58, %v3697_v45  ;;  %v1489_v18 = vpop.f32.mrf.mxu1  ;;  %v2895_v55 = vor.u32 %v3094_v10, %v2892_v5 }
 0x210   :  { %1629 = vmatmul.bf16.gmra.mxu3 %v3948_v23  ;;  %v4116_v36 = vpack.c.bf16 %v853_v2, %v849_v43  ;;  %v643_v52 = vpop.f32.mrf.mxu2 }
 0x211   :  { %v4119_v8 = vadd.f32 %v1489_v18, %v1401_v63  ;;  %1951 = vmatpush.bf16.msrb.mxu3 %v2895_v55  ;;  %v644_v43 = vadd.f32 %v643_v52, %v3695_v9 }
 0x213   :  { %v732_v25 = vpop.f32.mrf.mxu3  ;;  %v856_v10 = vmax.f32 %v644_v43, 0.0  ;;  %v3119_v43 = vld [vmem:[%s4729_s5 + $0x78] sm:$0xff] }
 0x214   :  { %v733_v33 = vadd.f32 %v732_v25, %v3700_v14  ;;  %2353 = vmatpush.bf16.msrb.mxu1 %v3119_v43 }
 0x216   :  { %v1403_v2 = vpop.f32.mrf.mxu0  ;;  %v857_v52 = vmax.f32 %v733_v33, 0.0 }
 0x217   :  { %v1404_v58 = vadd.f32 %v1403_v2, %v3697_v45  ;;  %v1492_v47 = vpop.f32.mrf.mxu1 }
 0x218   :  { %v645_v63 = vpop.f32.mrf.mxu2 }
 0x219   :  { %v4130_v18 = vadd.f32 %v1492_v47, %v1404_v58  ;;  %v646_v57 = vadd.f32 %v645_v63, %v3695_v9  ;;  %1718 = vmatmul.bf16.gmra.mxu0 %v3632_v28 }
 0x21a   :  { %1807 = vmatmul.bf16.gmra.mxu1 %v3635_v34 }
 0x21b   :  { %v734_v23 = vpop.f32.mrf.mxu3  ;;  %v860_v5 = vmax.f32 %v646_v57, 0.0 }
 0x21c   :  { %v735_v51 = vadd.f32 %v734_v23, %v3700_v14 }
 0x21d   :  { %1545 = vmatmul.bf16.gmra.mxu2 %v3963_v13  ;;  %v4137_v2 = vpack.c.bf16 %v860_v5, %v856_v10 }
 0x21e   :  { %v861_v55 = vmax.f32 %v735_v51, 0.0  ;;  %v1405_v25 = vpop.f32.mrf.mxu0  ;;  %v3111_v51 = vld [vmem:[%s4729_s5 + $0x38] sm:$0xff] }
 0x21f   :  { %4798 = vst [vmem:[#allocation42_spill] sm:$0xff] %v4137_v2  ;;  %v1406_v47 = vadd.f32 %v1405_v25, %v3697_v45  ;;  %v1494_v28 = vpop.f32.mrf.mxu1  ;;  %2264 = vmatpush.bf16.msrb.mxu0 %v3111_v51 }
 0x220   :  { %1634 = vmatmul.bf16.gmra.mxu3 %v3972_v17  ;;  %v4140_v58 = vpack.c.bf16 %v861_v55, %v857_v52  ;;  %v648_v63 = vpop.f32.mrf.mxu2 }
 0x221   :  { %v4143_v23 = vadd.f32 %v1494_v28, %v1406_v47  ;;  %v649_v57 = vadd.f32 %v648_v63, %v3695_v9 }
 0x222   :  { %4799 = vst [vmem:[#allocation43_spill] sm:$0xff] %v4140_v58 }
 0x223   :  { %v737_v34 = vpop.f32.mrf.mxu3  ;;  %v864_v17 = vmax.f32 %v649_v57, 0.0 }
 0x224   :  { %v738_v52 = vadd.f32 %v737_v34, %v3700_v14 }
 0x226   :  { %v1408_v33 = vpop.f32.mrf.mxu0  ;;  %v865_v13 = vmax.f32 %v738_v52, 0.0 }
 0x227   :  { %v1409_v10 = vadd.f32 %v1408_v33, %v3697_v45  ;;  %v1497_v5 = vpop.f32.mrf.mxu1 }
 0x228   :  { %v650_v55 = vpop.f32.mrf.mxu2 }
 0x229   :  { %v4154_v25 = vadd.f32 %v1497_v5, %v1409_v10  ;;  %v651_v47 = vadd.f32 %v650_v55, %v3695_v9  ;;  %1723 = vmatmul.bf16.gmra.mxu0 %v3664_v32  ;;  %v3076_v9 = vld [vmem:[%s4727_s3 + $0x124] sm:$0xf]  ;;  %v2820_v32 = vld [vmem:[%s4727_s3 + $0x128] sm:$0xf0] }
 0x22a   :  { %1812 = vmatmul.bf16.gmra.mxu1 %v3667_v37  ;;  %v2823_v10 = vor.u32 %v3076_v9, %v2820_v32 }
 0x22b   :  { %v739_v28 = vpop.f32.mrf.mxu3  ;;  %v868_v63 = vmax.f32 %v651_v47, 0.0  ;;  %v3092_v47 = vld [vmem:[%s4727_s3 + $0x1a4] sm:$0xf] }
 0x22c   :  { %v740_v51 = vadd.f32 %v739_v28, %v3700_v14  ;;  %1863 = vmatpush.bf16.msrb.mxu2 %v2823_v10 }
 0x22d   :  { %1550 = vmatmul.bf16.gmra.mxu2 %v3993_v59  ;;  %v4161_v43 = vpack.c.bf16 %v868_v63, %v864_v17 }
 0x22e   :  { %v869_v33 = vmax.f32 %v740_v51, 0.0  ;;  %v1410_v34 = vpop.f32.mrf.mxu0 }
 0x22f   :  { %4800 = vst [vmem:[#allocation44_spill] sm:$0xff] %v4161_v43  ;;  %v1411_v14 = vadd.f32 %v1410_v34, %v3697_v45  ;;  %v1499_v57 = vpop.f32.mrf.mxu1  ;;  %v3146_v45 = vld [vmem:[%s4728_s4] sm:$0x3] }
 0x230   :  { %1639 = vmatmul.bf16.gmra.mxu3 %v3996_v56  ;;  %v4170_v37 = vpack.c.bf16 %v869_v33, %v865_v13  ;;  %v1511_v5 = vpop.f32.mrf.mxu2  ;;  %v2884_v13 = vld [vmem:[%s4727_s3 + $0x1a8] sm:$0xf0]  ;;  %v4185_v63 = vperm.slane %v3146_v45, 1 }
 0x231   :  { %v4173_v17 = vadd.f32 %v1499_v57, %v1411_v14  ;;  %v1512_v52 = vadd.f32 %v1511_v5, %v3705_v26  ;;  %v2887_v28 = vor.u32 %v3092_v47, %v2884_v13 }
 0x232   :  { %4801 = vst [vmem:[#allocation45_spill] sm:$0xff] %v4170_v37 }
 0x233   :  { %v1600_v55 = vpop.f32.mrf.mxu3  ;;  %1952 = vmatpush.bf16.msrb.mxu3 %v2887_v28 }
 0x234   :  { %v1601_v51 = vadd.f32 %v1600_v55, %v1512_v52 }
 0x236   :  { %v1689_v26 = vpop.f32.mrf.mxu0  ;;  %v2036_v5 = vmax.f32 %v1601_v51, 0.0 }
 0x237   :  { %v1690_v33 = vadd.f32 %v1689_v26, %v4185_v63  ;;  %v1778_v34 = vpop.f32.mrf.mxu1 }
 0x238   :  { %v1513_v9 = vpop.f32.mrf.mxu2 }
 0x239   :  { %v4188_v32 = vadd.f32 %v1778_v34, %v1690_v33  ;;  %v1514_v14 = vadd.f32 %v1513_v9, %v3718_v20  ;;  %1728 = vmatmul.bf16.gmra.mxu0 %v3486_v27  ;;  %v3118_v33 = vld [vmem:[%s4729_s5 + $0x70] sm:$0xff] }
 0x23a   :  { %1817 = vmatmul.bf16.gmra.mxu1 %v3489_v29  ;;  %v3110_v29 = vld [vmem:[%s4729_s5 + $0x30] sm:$0xff] }
 0x23b   :  { %v1602_v57 = vpop.f32.mrf.mxu3  ;;  %2265 = vmatpush.bf16.msrb.mxu0 %v3110_v29  ;;  %2354 = vmatpush.bf16.msrb.mxu1 %v3118_v33 }
 0x23c   :  { %v1603_v10 = vadd.f32 %v1602_v57, %v1514_v14 }
 0x23d   :  { %1555 = vmatmul.bf16.gmra.mxu2 %v4011_v35 }
 0x23e   :  { %v2038_v52 = vmax.f32 %v1603_v10, 0.0  ;;  %v1691_v55 = vpop.f32.mrf.mxu0 }
 0x23f   :  { %v1692_v13 = vadd.f32 %v1691_v55, %v4185_v63  ;;  %v1780_v28 = vpop.f32.mrf.mxu1 }
 0x240   :  { %1644 = vmatmul.bf16.gmra.mxu3 %v4020_v48  ;;  %v4195_v47 = vpack.c.bf16 %v2038_v52, %v2036_v5  ;;  %v1516_v45 = vpop.f32.mrf.mxu2 }
 0x241   :  { %v4198_v20 = vadd.f32 %v1780_v28, %v1692_v13  ;;  %v1517_v27 = vadd.f32 %v1516_v45, %v3735_v30  ;;  %v3074_v45 = vld [vmem:[%s4727_s3 + $0x114] sm:$0xf] }
 0x243   :  { %v1605_v26 = vpop.f32.mrf.mxu3 }
 0x244   :  { %v1606_v51 = vadd.f32 %v1605_v26, %v1517_v27 }
 0x246   :  { %v1694_v34 = vpop.f32.mrf.mxu0  ;;  %v2040_v55 = vmax.f32 %v1606_v51, 0.0 }
 0x247   :  { %v1695_v9 = vadd.f32 %v1694_v34, %v4185_v63  ;;  %v1783_v14 = vpop.f32.mrf.mxu1 }
 0x248   :  { %v1518_v57 = vpop.f32.mrf.mxu2 }
 0x249   :  { %v4208_v10 = vadd.f32 %v1783_v14, %v1695_v9  ;;  %v1519_v30 = vadd.f32 %v1518_v57, %v3754_v6  ;;  %1733 = vmatmul.bf16.gmra.mxu0 %v3506_v61  ;;  %v2812_v6 = vld [vmem:[%s4727_s3 + $0x118] sm:$0xf0]  ;;  %v3090_v9 = vld [vmem:[%s4727_s3 + $0x194] sm:$0xf] }
 0x24a   :  { %1822 = vmatmul.bf16.gmra.mxu1 %v3515_v0  ;;  %v2815_v0 = vor.u32 %v3074_v45, %v2812_v6  ;;  %v2876_v14 = vld [vmem:[%s4727_s3 + $0x198] sm:$0xf0] }
 0x24b   :  { %v1607_v5 = vpop.f32.mrf.mxu3  ;;  %v2879_v57 = vor.u32 %v3090_v9, %v2876_v14  ;;  %v4802_v14 = vld [vmem:[#allocation24_spill] sm:$0xff] }
 0x24c   :  { %v1608_v52 = vadd.f32 %v1607_v5, %v1519_v30  ;;  %1864 = vmatpush.bf16.msrb.mxu2 %v2815_v0 }
 0x24d   :  { %1560 = vmatmul.bf16.gmra.mxu2 %v4041_v54  ;;  %1953 = vmatpush.bf16.msrb.mxu3 %v2879_v57 }
 0x24e   :  { %v2042_v13 = vmax.f32 %v1608_v52, 0.0  ;;  %v1696_v28 = vpop.f32.mrf.mxu0 }
 0x24f   :  { %v1697_v61 = vadd.f32 %v1696_v28, %v4185_v63  ;;  %v1785_v27 = vpop.f32.mrf.mxu1 }
 0x250   :  { %1649 = vmatmul.bf16.gmra.mxu3 %v4044_v16  ;;  %v4222_v26 = vpack.c.bf16 %v2042_v13, %v2040_v55  ;;  %v1521_v29 = vpop.f32.mrf.mxu2 }
 0x251   :  { %v4224_v51 = vadd.f32 %v1785_v27, %v1697_v61  ;;  %v1522_v33 = vadd.f32 %v1521_v29, %v3765_v38 }
 0x253   :  { %v1610_v34 = vpop.f32.mrf.mxu3 }
 0x254   :  { %v1611_v30 = vadd.f32 %v1610_v34, %v1522_v33 }
 0x256   :  { %v1699_v5 = vpop.f32.mrf.mxu0  ;;  %v2044_v61 = vmax.f32 %v1611_v30, 0.0 }
 0x257   :  { %v1700_v52 = vadd.f32 %v1699_v5, %v4185_v63  ;;  %v1788_v55 = vpop.f32.mrf.mxu1  ;;  %v3117_v5 = vld [vmem:[%s4729_s5 + $0x68] sm:$0xff] }
 0x258   :  { %v1523_v13 = vpop.f32.mrf.mxu2  ;;  %2355 = vmatpush.bf16.msrb.mxu1 %v3117_v5 }
 0x259   :  { %v4234_v28 = vadd.f32 %v1788_v55, %v1700_v52  ;;  %v1524_v38 = vadd.f32 %v1523_v13, %v3779_v21  ;;  %1738 = vmatmul.bf16.gmra.mxu0 %v3538_v41 }
 0x25a   :  { %1827 = vmatmul.bf16.gmra.mxu1 %v3541_v4  ;;  %v3109_v4 = vld [vmem:[%s4729_s5 + $0x28] sm:$0xff] }
 0x25b   :  { %v1612_v45 = vpop.f32.mrf.mxu3  ;;  %2266 = vmatpush.bf16.msrb.mxu0 %v3109_v4  ;;  %v2804_v4 = vld [vmem:[%s4727_s3 + $0x108] sm:$0xf0] }
 0x25c   :  { %v1613_v6 = vadd.f32 %v1612_v45, %v1524_v38 }
 0x25d   :  { %1565 = vmatmul.bf16.gmra.mxu2 %v4059_v1 }
 0x25e   :  { %v2046_v27 = vmax.f32 %v1613_v6, 0.0  ;;  %v1701_v0 = vpop.f32.mrf.mxu0  ;;  %v4804_v6 = vld [vmem:[#allocation27_spill] sm:$0xff] }
 0x25f   :  { %v1702_v29 = vadd.f32 %v1701_v0, %v4185_v63  ;;  %v1790_v33 = vpop.f32.mrf.mxu1  ;;  %v4805_v0 = vld [vmem:[#allocation8_spill] sm:$0xff] }
 0x260   :  { %1654 = vmatmul.bf16.gmra.mxu3 %v4068_v3  ;;  %v4242_v34 = vpack.c.bf16 %v2046_v27, %v2044_v61  ;;  %v1526_v9 = vpop.f32.mrf.mxu2 }
 0x261   :  { %v4244_v21 = vadd.f32 %v1790_v33, %v1702_v29  ;;  %v1527_v41 = vadd.f32 %v1526_v9, %v4802_v14  ;;  %v4806_v29 = vld [vmem:[#allocation9_spill] sm:$0xff] }
 0x263   :  { %v1615_v57 = vpop.f32.mrf.mxu3 }
 0x264   :  { %v1616_v30 = vadd.f32 %v1615_v57, %v1527_v41  ;;  %v3072_v57 = vld [vmem:[%s4727_s3 + $0x104] sm:$0xf] }
 0x266   :  { %v1704_v52 = vpop.f32.mrf.mxu0  ;;  %v2048_v9 = vmax.f32 %v1616_v30, 0.0 }
 0x267   :  { %v1705_v55 = vadd.f32 %v1704_v52, %v4185_v63  ;;  %v1793_v13 = vpop.f32.mrf.mxu1 }
 0x268   :  { %v1528_v38 = vpop.f32.mrf.mxu2 }
 0x269   :  { %v4254_v45 = vadd.f32 %v1793_v13, %v1705_v55  ;;  %v1529_v61 = vadd.f32 %v1528_v38, %v4804_v6  ;;  %1743 = vmatmul.bf16.gmra.mxu0 %v4805_v0  ;;  %v2807_v55 = vor.u32 %v3072_v57, %v2804_v4  ;;  %v4808_v6 = vld [vmem:[#allocation28_spill] sm:$0xff] }
 0x26a   :  { %1832 = vmatmul.bf16.gmra.mxu1 %v4806_v29  ;;  %v3088_v0 = vld [vmem:[%s4727_s3 + $0x184] sm:$0xf]  ;;  %v2868_v29 = vld [vmem:[%s4727_s3 + $0x188] sm:$0xf0] }
 0x26b   :  { %4803 = vst [vmem:[#allocation24_spill] sm:$0xff] %v4254_v45  ;;  %v1617_v27 = vpop.f32.mrf.mxu3  ;;  %1865 = vmatpush.bf16.msrb.mxu2 %v2807_v55 }
 0x26c   :  { %v1618_v33 = vadd.f32 %v1617_v27, %v1529_v61 }
 0x26d   :  { %1570 = vmatmul.bf16.gmra.mxu2 %v4089_v39 }
 0x26e   :  { %v2050_v14 = vmax.f32 %v1618_v33, 0.0  ;;  %v1706_v41 = vpop.f32.mrf.mxu0  ;;  %v2871_v33 = vor.u32 %v3088_v0, %v2868_v29 }
 0x26f   :  { %v1707_v5 = vadd.f32 %v1706_v41, %v4185_v63  ;;  %v1795_v52 = vpop.f32.mrf.mxu1 }
 0x270   :  { %1659 = vmatmul.bf16.gmra.mxu3 %v4092_v31  ;;  %v4268_v13 = vpack.c.bf16 %v2050_v14, %v2048_v9  ;;  %v1531_v30 = vpop.f32.mrf.mxu2  ;;  %v4811_v31 = vld [vmem:[#allocation11_spill] sm:$0xff] }
 0x271   :  { %v4270_v38 = vadd.f32 %v1795_v52, %v1707_v5  ;;  %v1532_v61 = vadd.f32 %v1531_v30, %v4808_v6  ;;  %1954 = vmatpush.bf16.msrb.mxu3 %v2871_v33  ;;  %v4809_v52 = vld [vmem:[#allocation31_spill] sm:$0xff]  ;;  %v4810_v6 = vld [vmem:[#allocation10_spill] sm:$0xff] }
 0x273   :  { %4807 = vst [vmem:[#allocation27_spill] sm:$0xff] %v4270_v38  ;;  %v1620_v27 = vpop.f32.mrf.mxu3 }
 0x274   :  { %v1621_v41 = vadd.f32 %v1620_v27, %v1532_v61 }
 0x276   :  { %v1709_v9 = vpop.f32.mrf.mxu0  ;;  %v2052_v38 = vmax.f32 %v1621_v41, 0.0 }
 0x277   :  { %v1710_v14 = vadd.f32 %v1709_v9, %v4185_v63  ;;  %v1798_v57 = vpop.f32.mrf.mxu1 }
 0x278   :  { %v1533_v4 = vpop.f32.mrf.mxu2 }
 0x279   :  { %v4280_v5 = vadd.f32 %v1798_v57, %v1710_v14  ;;  %v1534_v55 = vadd.f32 %v1533_v4, %v4809_v52  ;;  %1748 = vmatmul.bf16.gmra.mxu0 %v4810_v6  ;;  %v3107_v6 = vld [vmem:[%s4729_s5 + $0x18] sm:$0xff] }
 0x27a   :  { %1837 = vmatmul.bf16.gmra.mxu1 %v4811_v31  ;;  %v3108_v31 = vld [vmem:[%s4729_s5 + $0x20] sm:$0xff] }
 0x27b   :  { %v1622_v30 = vpop.f32.mrf.mxu3  ;;  %2267 = vmatpush.bf16.msrb.mxu0 %v3108_v31 }
 0x27c   :  { %v1623_v39 = vadd.f32 %v1622_v30, %v1534_v55  ;;  %v4813_v30 = vld [vmem:[#allocation12_spill] sm:$0xff] }
 0x27d   :  { %1575 = vmatmul.bf16.gmra.mxu2 %v4107_v19 }
 0x27e   :  { %v2054_v45 = vmax.f32 %v1623_v39, 0.0  ;;  %v4287_v61 = vpop.f32.mrf.mxu0  ;;  %v3116_v39 = vld [vmem:[%s4729_s5 + $0x60] sm:$0xff] }
 0x27f   :  { %v4289_v27 = vpop.f32.mrf.mxu1  ;;  %2356 = vmatpush.bf16.msrb.mxu1 %v3116_v39  ;;  %2268 = vmatpush.bf16.msrb.mxu0 %v3107_v6  ;;  %v3106_v39 = vld [vmem:[%s4729_s5 + $0x10] sm:$0xff] }
 0x280   :  { %1664 = vmatmul.bf16.gmra.mxu3 %v4116_v36  ;;  %v4291_v0 = vpack.c.bf16 %v2054_v45, %v2052_v38  ;;  %v1536_v29 = vpop.f32.mrf.mxu2 }
 0x281   :  { %v1537_v33 = vadd.f32 %v1536_v29, %v3867_v7  ;;  %v4812_v7 = vld [vmem:[#allocation34_spill] sm:$0xff]  ;;  %v4814_v29 = vld [vmem:[#allocation13_spill] sm:$0xff] }
 0x283   :  { %v1625_v9 = vpop.f32.mrf.mxu3  ;;  %2269 = vmatpush.bf16.msrb.mxu0 %v3106_v39 }
 0x284   :  { %v1626_v41 = vadd.f32 %v1625_v9, %v1537_v33 }
 0x286   :  { %v1714_v14 = vpop.f32.mrf.mxu0  ;;  %v2056_v9 = vmax.f32 %v1626_v41, 0.0 }
 0x287   :  { %v1715_v57 = vadd.f32 %v1714_v14, %v4185_v63  ;;  %v1803_v4 = vpop.f32.mrf.mxu1 }
 0x288   :  { %v1538_v45 = vpop.f32.mrf.mxu2 }
 0x289   :  { %v4301_v38 = vadd.f32 %v1803_v4, %v1715_v57  ;;  %v1539_v52 = vadd.f32 %v1538_v45, %v4812_v7  ;;  %1753 = vmatmul.bf16.gmra.mxu0 %v4813_v30  ;;  %v3104_v30 = vld [vmem:[%s4729_s5] sm:$0xff] }
 0x28a   :  { %1842 = vmatmul.bf16.gmra.mxu1 %v4814_v29 }
 0x28b   :  { %v1627_v55 = vpop.f32.mrf.mxu3 }
 0x28c   :  { %v1628_v33 = vadd.f32 %v1627_v55, %v1539_v52  ;;  %v3105_v52 = vld [vmem:[%s4729_s5 + $0x8] sm:$0xff] }
 0x28d   :  { %1580 = vmatmul.bf16.gmra.mxu2 %v4137_v2  ;;  %2270 = vmatpush.bf16.msrb.mxu0 %v3105_v52  ;;  %v4818_v2 = vld [vmem:[#allocation15_spill] sm:$0xff] }
 0x28e   :  { %v2058_v31 = vmax.f32 %v1628_v33, 0.0  ;;  %v4314_v14 = vpop.f32.mrf.mxu0 }
 0x28f   :  { %v4316_v57 = vpop.f32.mrf.mxu1 }
 0x290   :  { %1669 = vmatmul.bf16.gmra.mxu3 %v4140_v58  ;;  %v4318_v4 = vpack.c.bf16 %v2058_v31, %v2056_v9  ;;  %v1541_v45 = vpop.f32.mrf.mxu2  ;;  %v4817_v58 = vld [vmem:[#allocation14_spill] sm:$0xff] }
 0x291   :  { %v1542_v7 = vadd.f32 %v1541_v45, %v3937_v60  ;;  %2271 = vmatpush.bf16.msrb.mxu0 %v3104_v30  ;;  %v4816_v60 = vld [vmem:[#allocation37_spill] sm:$0xff] }
 0x293   :  { %v1630_v41 = vpop.f32.mrf.mxu3 }
 0x294   :  { %v1631_v55 = vadd.f32 %v1630_v41, %v1542_v7 }
 0x296   :  { %v1719_v6 = vpop.f32.mrf.mxu0  ;;  %v2060_v41 = vmax.f32 %v1631_v55, 0.0 }
 0x297   :  { %v1720_v29 = vadd.f32 %v1719_v6, %v4185_v63  ;;  %v1808_v33 = vpop.f32.mrf.mxu1 }
 0x298   :  { %v1543_v9 = vpop.f32.mrf.mxu2 }
 0x299   :  { %v4328_v31 = vadd.f32 %v1808_v33, %v1720_v29  ;;  %v1544_v39 = vadd.f32 %v1543_v9, %v4816_v60  ;;  %1758 = vmatmul.bf16.gmra.mxu0 %v4817_v58 }
 0x29a   :  { %1847 = vmatmul.bf16.gmra.mxu1 %v4818_v2  ;;  %v3115_v2 = vld [vmem:[%s4729_s5 + $0x58] sm:$0xff] }
 0x29b   :  { %4815 = vst [vmem:[#allocation8_spill] sm:$0xff] %v4328_v31  ;;  %v1632_v45 = vpop.f32.mrf.mxu3  ;;  %2357 = vmatpush.bf16.msrb.mxu1 %v3115_v2  ;;  %v4824_v31 = vld [vmem:[#allocation19_spill] sm:$0xff] }
 0x29c   :  { %v1633_v7 = vadd.f32 %v1632_v45, %v1544_v39 }
 0x29d   :  { %1585 = vmatmul.bf16.gmra.mxu2 %v4161_v43  ;;  %v4821_v43 = vld [vmem:[#allocation16_spill] sm:$0xff] }
 0x29e   :  { %v2062_v52 = vmax.f32 %v1633_v7, 0.0  ;;  %v4335_v6 = vpop.f32.mrf.mxu0 }
 0x29f   :  { %v4337_v30 = vpop.f32.mrf.mxu1 }
 0x2a0   :  { %1674 = vmatmul.bf16.gmra.mxu3 %v4170_v37  ;;  %4819 = vst [vmem:[#allocation9_spill] sm:$0xff] %v4337_v30  ;;  %v4339_v29 = vpack.c.bf16 %v2062_v52, %v2060_v41  ;;  %v1546_v33 = vpop.f32.mrf.mxu2  ;;  %v4823_v30 = vld [vmem:[#allocation18_spill] sm:$0xff] }
 0x2a1   :  { %v1547_v9 = vadd.f32 %v1546_v33, %v3956_v24  ;;  %v4822_v24 = vld [vmem:[#allocation17_spill] sm:$0xff] }
 0x2a3   :  { %v1635_v60 = vpop.f32.mrf.mxu3 }
 0x2a4   :  { %v1636_v58 = vadd.f32 %v1635_v60, %v1547_v9 }
 0x2a6   :  { %v1724_v55 = vpop.f32.mrf.mxu0  ;;  %v2064_v9 = vmax.f32 %v1636_v58, 0.0 }
 0x2a7   :  { %v1725_v39 = vadd.f32 %v1724_v55, %v4185_v63  ;;  %v1813_v45 = vpop.f32.mrf.mxu1 }
 0x2a8   :  { %v1548_v7 = vpop.f32.mrf.mxu2 }
 0x2a9   :  { %v4346_v37 = vadd.f32 %v1813_v45, %v1725_v39  ;;  %v1549_v41 = vadd.f32 %v1548_v7, %v3975_v42  ;;  %1763 = vmatmul.bf16.gmra.mxu0 %v4821_v43 }
 0x2aa   :  { %1852 = vmatmul.bf16.gmra.mxu1 %v4822_v24 }
 0x2ab   :  { %4820 = vst [vmem:[#allocation28_spill] sm:$0xff] %v4346_v37  ;;  %v1637_v52 = vpop.f32.mrf.mxu3 }
 0x2ac   :  { %v1638_v33 = vadd.f32 %v1637_v52, %v1549_v41 }
 0x2ad   :  { %1866 = vmatmul.bf16.vlgmr.msrb.gmra.mxu2 %v4823_v30 }
 0x2ae   :  { %v2066_v60 = vmax.f32 %v1638_v33, 0.0  ;;  %v4353_v55 = vpop.f32.mrf.mxu0 }
 0x2af   :  { %v4355_v2 = vpop.f32.mrf.mxu1 }
 0x2b0   :  { %1955 = vmatmul.bf16.vlgmr.msrb.gmra.mxu3 %v4824_v31  ;;  %4825 = vst [vmem:[#allocation31_spill] sm:$0xff] %v4355_v2  ;;  %v4357_v39 = vpack.c.bf16 %v2066_v60, %v2064_v9  ;;  %v1551_v45 = vpop.f32.mrf.mxu2  ;;  %v4826_v2 = vld [vmem:[#allocation20_spill] sm:$0xff] }
 0x2b1   :  { %v1552_v42 = vadd.f32 %v1551_v45, %v3986_v12  ;;  %v4827_v12 = vld [vmem:[#allocation21_spill] sm:$0xff] }
 0x2b3   :  { %v1640_v7 = vpop.f32.mrf.mxu3 }
 0x2b4   :  { %v1641_v43 = vadd.f32 %v1640_v7, %v1552_v42 }
 0x2b6   :  { %v1729_v37 = vpop.f32.mrf.mxu0  ;;  %v2068_v9 = vmax.f32 %v1641_v43, 0.0 }
 0x2b7   :  { %v1730_v41 = vadd.f32 %v1729_v37, %v4185_v63  ;;  %v1818_v58 = vpop.f32.mrf.mxu1 }
 0x2b8   :  { %v1553_v52 = vpop.f32.mrf.mxu2 }
 0x2b9   :  { %v4361_v24 = vadd.f32 %v1818_v58, %v1730_v41  ;;  %v1554_v31 = vadd.f32 %v1553_v52, %v3999_v62  ;;  %2272 = vmatmul.bf16.vlgmr.msrb.gmra.mxu0 %v4195_v47  ;;  %v3114_v47 = vld [vmem:[%s4729_s5 + $0x50] sm:$0xff] }
 0x2ba   :  { %2358 = vmatpush.bf16.msrb.mxu1 %v3114_v47 }
 0x2bb   :  { %v1642_v30 = vpop.f32.mrf.mxu3 }
 0x2bc   :  { %v1643_v33 = vadd.f32 %v1642_v30, %v1554_v31 }
 0x2bd   :  { %1871 = vmatmul.bf16.gmra.mxu2 %v4826_v2 }
 0x2be   :  { %v2070_v60 = vmax.f32 %v1643_v33, 0.0  ;;  %v4367_v45 = vpop.f32.mrf.mxu0 }
 0x2bf   :  { %v4369_v42 = vpop.f32.mrf.mxu1 }
 0x2c0   :  { %1960 = vmatmul.bf16.gmra.mxu3 %v4827_v12  ;;  %v4371_v37 = vpack.c.bf16 %v2070_v60, %v2068_v9  ;;  %v1556_v7 = vpop.f32.mrf.mxu2 }
 0x2c1   :  { %v1557_v41 = vadd.f32 %v1556_v7, %v4004_v11  ;;  %v4829_v7 = vld [vmem:[#allocation22_spill] sm:$0xff] }
 0x2c3   :  { %v1645_v62 = vpop.f32.mrf.mxu3 }
 0x2c4   :  { %v1646_v58 = vadd.f32 %v1645_v62, %v1557_v41  ;;  %v4830_v41 = vld [vmem:[#allocation23_spill] sm:$0xff] }
 0x2c6   :  { %v1734_v43 = vpop.f32.mrf.mxu0  ;;  %v2072_v60 = vmax.f32 %v1646_v58, 0.0 }
 0x2c7   :  { %v1735_v2 = vadd.f32 %v1734_v43, %v4185_v63  ;;  %v1823_v52 = vpop.f32.mrf.mxu1 }
 0x2c8   :  { %v1558_v31 = vpop.f32.mrf.mxu2 }
 0x2c9   :  { %v4378_v30 = vadd.f32 %v1823_v52, %v1735_v2  ;;  %v1559_v33 = vadd.f32 %v1558_v31, %v4023_v40  ;;  %2277 = vmatmul.bf16.gmra.mxu0 %v4222_v26 }
 0x2cb   :  { %4828 = vst [vmem:[#allocation10_spill] sm:$0xff] %v4378_v30  ;;  %v1647_v9 = vpop.f32.mrf.mxu3 }
 0x2cc   :  { %v1648_v11 = vadd.f32 %v1647_v9, %v1559_v33 }
 0x2cd   :  { %1876 = vmatmul.bf16.gmra.mxu2 %v4829_v7 }
 0x2ce   :  { %v2074_v12 = vmax.f32 %v1648_v11, 0.0  ;;  %v4384_v62 = vpop.f32.mrf.mxu0 }
 0x2cf   :  { %v4386_v43 = vpop.f32.mrf.mxu1 }
 0x2d0   :  { %1965 = vmatmul.bf16.gmra.mxu3 %v4830_v41  ;;  %4831 = vst [vmem:[#allocation11_spill] sm:$0xff] %v4386_v43  ;;  %v4388_v47 = vpack.c.bf16 %v2074_v12, %v2072_v60  ;;  %v1561_v2 = vpop.f32.mrf.mxu2  ;;  %v4832_v43 = vld [vmem:[#allocation25_spill] sm:$0xff] }
 0x2d1   :  { %v1562_v52 = vadd.f32 %v1561_v2, %v4034_v53  ;;  %v4833_v53 = vld [vmem:[#allocation26_spill] sm:$0xff] }
 0x2d3   :  { %v1650_v40 = vpop.f32.mrf.mxu3 }
 0x2d4   :  { %v1651_v31 = vadd.f32 %v1650_v40, %v1562_v52 }
 0x2d6   :  { %v1739_v30 = vpop.f32.mrf.mxu0  ;;  %v2076_v60 = vmax.f32 %v1651_v31, 0.0 }
 0x2d7   :  { %v1740_v26 = vadd.f32 %v1739_v30, %v4185_v63  ;;  %v1828_v58 = vpop.f32.mrf.mxu1 }
 0x2d8   :  { %v1563_v33 = vpop.f32.mrf.mxu2 }
 0x2d9   :  { %v4392_v9 = vadd.f32 %v1828_v58, %v1740_v26  ;;  %v1564_v11 = vadd.f32 %v1563_v33, %v4047_v15  ;;  %2282 = vmatmul.bf16.gmra.mxu0 %v4242_v34  ;;  %v3113_v34 = vld [vmem:[%s4729_s5 + $0x48] sm:$0xff] }
 0x2da   :  { %2359 = vmatpush.bf16.msrb.mxu1 %v3113_v34 }
 0x2db   :  { %v1652_v7 = vpop.f32.mrf.mxu3 }
 0x2dc   :  { %v1653_v41 = vadd.f32 %v1652_v7, %v1564_v11 }
 0x2dd   :  { %1881 = vmatmul.bf16.gmra.mxu2 %v4832_v43 }
 0x2de   :  { %v2078_v12 = vmax.f32 %v1653_v41, 0.0  ;;  %v4398_v2 = vpop.f32.mrf.mxu0 }
 0x2df   :  { %v4400_v52 = vpop.f32.mrf.mxu1 }
 0x2e0   :  { %1970 = vmatmul.bf16.gmra.mxu3 %v4833_v53  ;;  %v4402_v30 = vpack.c.bf16 %v2078_v12, %v2076_v60  ;;  %v1566_v40 = vpop.f32.mrf.mxu2 }
 0x2e1   :  { %v1567_v26 = vadd.f32 %v1566_v40, %v4052_v50  ;;  %v4835_v40 = vld [vmem:[#allocation29_spill] sm:$0xff] }
 0x2e3   :  { %v1655_v15 = vpop.f32.mrf.mxu3 }
 0x2e4   :  { %v1656_v58 = vadd.f32 %v1655_v15, %v1567_v26  ;;  %v4836_v26 = vld [vmem:[#allocation30_spill] sm:$0xff] }
 0x2e6   :  { %v1744_v31 = vpop.f32.mrf.mxu0  ;;  %v2080_v12 = vmax.f32 %v1656_v58, 0.0 }
 0x2e7   :  { %v1745_v43 = vadd.f32 %v1744_v31, %v4185_v63  ;;  %v1833_v33 = vpop.f32.mrf.mxu1 }
 0x2e8   :  { %v1568_v11 = vpop.f32.mrf.mxu2 }
 0x2e9   :  { %v4409_v7 = vadd.f32 %v1833_v33, %v1745_v43  ;;  %v1569_v41 = vadd.f32 %v1568_v11, %v4071_v46  ;;  %2287 = vmatmul.bf16.gmra.mxu0 %v4268_v13 }
 0x2eb   :  { %4834 = vst [vmem:[#allocation34_spill] sm:$0xff] %v4409_v7  ;;  %v1657_v60 = vpop.f32.mrf.mxu3 }
 0x2ec   :  { %v1658_v50 = vadd.f32 %v1657_v60, %v1569_v41 }
 0x2ed   :  { %1886 = vmatmul.bf16.gmra.mxu2 %v4835_v40 }
 0x2ee   :  { %v2082_v53 = vmax.f32 %v1658_v50, 0.0  ;;  %v4415_v15 = vpop.f32.mrf.mxu0 }
 0x2ef   :  { %v4417_v31 = vpop.f32.mrf.mxu1 }
 0x2f0   :  { %1975 = vmatmul.bf16.gmra.mxu3 %v4836_v26  ;;  %4837 = vst [vmem:[#allocation12_spill] sm:$0xff] %v4417_v31  ;;  %v4419_v34 = vpack.c.bf16 %v2082_v53, %v2080_v12  ;;  %v1571_v43 = vpop.f32.mrf.mxu2  ;;  %v4838_v31 = vld [vmem:[#allocation32_spill] sm:$0xff] }
 0x2f1   :  { %v1572_v33 = vadd.f32 %v1571_v43, %v4082_v44  ;;  %v4839_v44 = vld [vmem:[#allocation33_spill] sm:$0xff] }
 0x2f3   :  { %v1660_v46 = vpop.f32.mrf.mxu3 }
 0x2f4   :  { %v1661_v11 = vadd.f32 %v1660_v46, %v1572_v33 }
 0x2f6   :  { %v1749_v7 = vpop.f32.mrf.mxu0  ;;  %v2084_v12 = vmax.f32 %v1661_v11, 0.0 }
 0x2f7   :  { %v1750_v13 = vadd.f32 %v1749_v7, %v4185_v63  ;;  %v1838_v58 = vpop.f32.mrf.mxu1 }
 0x2f8   :  { %v1573_v41 = vpop.f32.mrf.mxu2 }
 0x2f9   :  { %v4423_v60 = vadd.f32 %v1838_v58, %v1750_v13  ;;  %v1574_v50 = vadd.f32 %v1573_v41, %v4095_v49  ;;  %2292 = vmatmul.bf16.gmra.mxu0 %v4291_v0  ;;  %v3112_v0 = vld [vmem:[%s4729_s5 + $0x40] sm:$0xff] }
 0x2fa   :  { %2360 = vmatpush.bf16.msrb.mxu1 %v3112_v0 }
 0x2fb   :  { %v1662_v40 = vpop.f32.mrf.mxu3 }
 0x2fc   :  { %v1663_v26 = vadd.f32 %v1662_v40, %v1574_v50 }
 0x2fd   :  { %1891 = vmatmul.bf16.gmra.mxu2 %v4838_v31 }
 0x2fe   :  { %v2086_v53 = vmax.f32 %v1663_v26, 0.0  ;;  %v4429_v43 = vpop.f32.mrf.mxu0 }
 0x2ff   :  { %v4431_v33 = vpop.f32.mrf.mxu1 }
 0x300   :  { %1980 = vmatmul.bf16.gmra.mxu3 %v4839_v44  ;;  %v4433_v7 = vpack.c.bf16 %v2086_v53, %v2084_v12  ;;  %v1576_v46 = vpop.f32.mrf.mxu2 }
 0x301   :  { %v1577_v13 = vadd.f32 %v1576_v46, %v4100_v22  ;;  %v4841_v46 = vld [vmem:[#allocation35_spill] sm:$0xff] }
 0x303   :  { %v1665_v49 = vpop.f32.mrf.mxu3 }
 0x304   :  { %v1666_v58 = vadd.f32 %v1665_v49, %v1577_v13  ;;  %v4842_v13 = vld [vmem:[#allocation36_spill] sm:$0xff] }
 0x306   :  { %v1754_v11 = vpop.f32.mrf.mxu0  ;;  %v2088_v53 = vmax.f32 %v1666_v58, 0.0 }
 0x307   :  { %v1755_v31 = vadd.f32 %v1754_v11, %v4185_v63  ;;  %v1843_v41 = vpop.f32.mrf.mxu1 }
 0x308   :  { %v1578_v50 = vpop.f32.mrf.mxu2 }
 0x309   :  { %v4440_v40 = vadd.f32 %v1843_v41, %v1755_v31  ;;  %v1579_v26 = vadd.f32 %v1578_v50, %v4119_v8  ;;  %2297 = vmatmul.bf16.gmra.mxu0 %v4318_v4 }
 0x30b   :  { %4840 = vst [vmem:[#allocation13_spill] sm:$0xff] %v4440_v40  ;;  %v1667_v12 = vpop.f32.mrf.mxu3 }
 0x30c   :  { %v1668_v22 = vadd.f32 %v1667_v12, %v1579_v26 }
 0x30d   :  { %1896 = vmatmul.bf16.gmra.mxu2 %v4841_v46 }
 0x30e   :  { %v2090_v44 = vmax.f32 %v1668_v22, 0.0  ;;  %v4446_v49 = vpop.f32.mrf.mxu0 }
 0x30f   :  { %v4448_v11 = vpop.f32.mrf.mxu1 }
 0x310   :  { %1985 = vmatmul.bf16.gmra.mxu3 %v4842_v13  ;;  %4843 = vst [vmem:[#allocation37_spill] sm:$0xff] %v4448_v11  ;;  %v4450_v0 = vpack.c.bf16 %v2090_v44, %v2088_v53  ;;  %v1581_v31 = vpop.f32.mrf.mxu2  ;;  %v4844_v11 = vld [vmem:[#allocation38_spill] sm:$0xff] }
 0x311   :  { %v1582_v41 = vadd.f32 %v1581_v31, %v4130_v18  ;;  %v4845_v18 = vld [vmem:[#allocation39_spill] sm:$0xff] }
 0x313   :  { %v1670_v8 = vpop.f32.mrf.mxu3 }
 0x314   :  { %v1671_v50 = vadd.f32 %v1670_v8, %v1582_v41 }
 0x316   :  { %v1759_v40 = vpop.f32.mrf.mxu0  ;;  %v2092_v53 = vmax.f32 %v1671_v50, 0.0 }
 0x317   :  { %v1760_v4 = vadd.f32 %v1759_v40, %v4185_v63  ;;  %v1848_v58 = vpop.f32.mrf.mxu1 }
 0x318   :  { %v1583_v26 = vpop.f32.mrf.mxu2 }
 0x319   :  { %v4454_v12 = vadd.f32 %v1848_v58, %v1760_v4  ;;  %v1584_v22 = vadd.f32 %v1583_v26, %v4143_v23  ;;  %2302 = vmatmul.bf16.gmra.mxu0 %v4339_v29 }
 0x31b   :  { %v1672_v46 = vpop.f32.mrf.mxu3 }
 0x31c   :  { %v1673_v13 = vadd.f32 %v1672_v46, %v1584_v22 }
 0x31d   :  { %1901 = vmatmul.bf16.gmra.mxu2 %v4844_v11 }
 0x31e   :  { %v2094_v44 = vmax.f32 %v1673_v13, 0.0  ;;  %v4460_v31 = vpop.f32.mrf.mxu0 }
 0x31f   :  { %v4462_v41 = vpop.f32.mrf.mxu1 }
 0x320   :  { %1990 = vmatmul.bf16.gmra.mxu3 %v4845_v18  ;;  %v4464_v40 = vpack.c.bf16 %v2094_v44, %v2092_v53  ;;  %v1586_v8 = vpop.f32.mrf.mxu2 }
 0x321   :  { %v1587_v4 = vadd.f32 %v1586_v8, %v4154_v25 }
 0x323   :  { %v1675_v23 = vpop.f32.mrf.mxu3 }
 0x324   :  { %v1676_v58 = vadd.f32 %v1675_v23, %v1587_v4 }
 0x326   :  { %v1764_v26 = vpop.f32.mrf.mxu0  ;;  %v2096_v53 = vmax.f32 %v1676_v58, 0.0 }
 0x327   :  { %v1765_v29 = vadd.f32 %v1764_v26, %v4185_v63  ;;  %v1853_v50 = vpop.f32.mrf.mxu1 }
 0x328   :  { %v1588_v22 = vpop.f32.mrf.mxu2 }
 0x329   :  { %v4468_v46 = vadd.f32 %v1853_v50, %v1765_v29  ;;  %v1589_v11 = vadd.f32 %v1588_v22, %v4173_v17  ;;  %2307 = vmatmul.bf16.gmra.mxu0 %v4357_v39 }
 0x32b   :  { %v1677_v13 = vpop.f32.mrf.mxu3 }
 0x32c   :  { %v1678_v18 = vadd.f32 %v1677_v13, %v1589_v11 }
 0x32d   :  { %1906 = vmatmul.bf16.gmra.mxu2 %v3993_v59 }
 0x32e   :  { %v2098_v44 = vmax.f32 %v1678_v18, 0.0 }
 0x330   :  { %1995 = vmatmul.bf16.gmra.mxu3 %v3996_v56  ;;  %v4474_v25 = vpack.c.bf16 %v2098_v44, %v2096_v53  ;;  %v1867_v8 = vpop.f32.mrf.mxu2 }
 0x331   :  { %v1868_v23 = vadd.f32 %v1867_v8, %v4188_v32 }
 0x333   :  { %v1956_v4 = vpop.f32.mrf.mxu3 }
 0x334   :  { %v1957_v29 = vadd.f32 %v1956_v4, %v1868_v23 }
 0x336   :  { %v2037_v58 = vmax.f32 %v1957_v29, 0.0 }
 0x338   :  { %v1869_v26 = vpop.f32.mrf.mxu2 }
 0x339   :  { %v1870_v17 = vadd.f32 %v1869_v26, %v4198_v20  ;;  %2312 = vmatmul.bf16.gmra.mxu0 %v4371_v37  ;;  %v4487_v26 = vpop.f32.mrf.mxu0 }
 0x33b   :  { %v1958_v50 = vpop.f32.mrf.mxu3 }
 0x33c   :  { %v1959_v39 = vadd.f32 %v1958_v50, %v1870_v17 }
 0x33d   :  { %1911 = vmatmul.bf16.gmra.mxu2 %v4011_v35 }
 0x33e   :  { %v2039_v22 = vmax.f32 %v1959_v39, 0.0 }
 0x340   :  { %2000 = vmatmul.bf16.gmra.mxu3 %v4020_v48  ;;  %v2101_v59 = vpack.c.bf16 %v2039_v22, %v2037_v58  ;;  %v1872_v56 = vpop.f32.mrf.mxu2  ;;  %v4846_v22 = vld [vmem:[#allocation24_spill] sm:$0xff] }
 0x341   :  { %v1873_v32 = vadd.f32 %v1872_v56, %v4208_v10 }
 0x342   :  { %2361 = vmatmul.bf16.vlgmr.msrb.gmra.mxu1 %v2101_v59 }
 0x343   :  { %v1961_v11 = vpop.f32.mrf.mxu3 }
 0x344   :  { %v1962_v18 = vadd.f32 %v1961_v11, %v1873_v32  ;;  %v4847_v11 = vld [vmem:[#allocation27_spill] sm:$0xff] }
 0x346   :  { %v2041_v44 = vmax.f32 %v1962_v18, 0.0 }
 0x348   :  { %v1874_v13 = vpop.f32.mrf.mxu2 }
 0x349   :  { %v1875_v20 = vadd.f32 %v1874_v13, %v4224_v51  ;;  %2317 = vmatmul.bf16.gmra.mxu0 %v4388_v47 }
 0x34b   :  { %v1963_v53 = vpop.f32.mrf.mxu3 }
 0x34c   :  { %v1964_v37 = vadd.f32 %v1963_v53, %v1875_v20  ;;  %v4848_v20 = vld [vmem:[#allocation40_spill] sm:$0xff]  ;;  %v4849_v53 = vld [vmem:[#allocation41_spill] sm:$0xff] }
 0x34d   :  { %1916 = vmatmul.bf16.gmra.mxu2 %v4041_v54 }
 0x34e   :  { %v2043_v8 = vmax.f32 %v1964_v37, 0.0 }
 0x350   :  { %2005 = vmatmul.bf16.gmra.mxu3 %v4044_v16  ;;  %v2103_v35 = vpack.c.bf16 %v2043_v8, %v2041_v44  ;;  %v1877_v48 = vpop.f32.mrf.mxu2 }
 0x351   :  { %v1878_v10 = vadd.f32 %v1877_v48, %v4234_v28  ;;  %v4493_v28 = vpop.f32.mrf.mxu0 }
 0x352   :  { %2366 = vmatmul.bf16.gmra.mxu1 %v2103_v35  ;;  %v1712_v35 = vadd.f32 %v4287_v61, %v4185_v63 }
 0x353   :  { %v1966_v4 = vpop.f32.mrf.mxu3 }
 0x354   :  { %v1967_v51 = vadd.f32 %v1966_v4, %v1878_v10 }
 0x356   :  { %v2045_v50 = vmax.f32 %v1967_v51, 0.0 }
 0x358   :  { %v1879_v23 = vpop.f32.mrf.mxu2 }
 0x359   :  { %v1880_v29 = vadd.f32 %v1879_v23, %v4244_v21  ;;  %2322 = vmatmul.bf16.gmra.mxu0 %v4402_v30  ;;  %v4498_v18 = vpop.f32.mrf.mxu0 }
 0x35b   :  { %v1968_v47 = vpop.f32.mrf.mxu3 }
 0x35c   :  { %v1969_v17 = vadd.f32 %v1968_v47, %v1880_v29 }
 0x35d   :  { %1921 = vmatmul.bf16.gmra.mxu2 %v4059_v1 }
 0x35e   :  { %v2047_v54 = vmax.f32 %v1969_v17, 0.0 }
 0x360   :  { %2010 = vmatmul.bf16.gmra.mxu3 %v4068_v3  ;;  %v2105_v16 = vpack.c.bf16 %v2047_v54, %v2045_v50  ;;  %v1882_v39 = vpop.f32.mrf.mxu2 }
 0x361   :  { %v1883_v59 = vadd.f32 %v1882_v39, %v4846_v22  ;;  %v4506_v4 = vpop.f32.mrf.mxu0 }
 0x362   :  { %2371 = vmatmul.bf16.gmra.mxu1 %v2105_v16  ;;  %v1717_v16 = vadd.f32 %v4314_v14, %v4185_v63 }
 0x363   :  { %v1971_v58 = vpop.f32.mrf.mxu3 }
 0x364   :  { %v1972_v21 = vadd.f32 %v1971_v58, %v1883_v59 }
 0x366   :  { %v2049_v1 = vmax.f32 %v1972_v21, 0.0 }
 0x368   :  { %v1884_v56 = vpop.f32.mrf.mxu2 }
 0x369   :  { %v1885_v32 = vadd.f32 %v1884_v56, %v4847_v11  ;;  %2327 = vmatmul.bf16.gmra.mxu0 %v4419_v34  ;;  %v1801_v34 = vadd.f32 %v4289_v27, %v1712_v35 }
 0x36b   :  { %v1973_v30 = vpop.f32.mrf.mxu3 }
 0x36c   :  { %v1974_v13 = vadd.f32 %v1973_v30, %v1885_v32  ;;  %v4850_v32 = vld [vmem:[#allocation42_spill] sm:$0xff]  ;;  %v4851_v30 = vld [vmem:[#allocation43_spill] sm:$0xff] }
 0x36d   :  { %1926 = vmatmul.bf16.gmra.mxu2 %v4848_v20  ;;  %v4853_v20 = vld [vmem:[#allocation9_spill] sm:$0xff] }
 0x36e   :  { %v2051_v3 = vmax.f32 %v1974_v13, 0.0 }
 0x370   :  { %2015 = vmatmul.bf16.gmra.mxu3 %v4849_v53  ;;  %v2107_v37 = vpack.c.bf16 %v2051_v3, %v2049_v1  ;;  %v1887_v44 = vpop.f32.mrf.mxu2  ;;  %v4852_v3 = vld [vmem:[#allocation8_spill] sm:$0xff] }
 0x371   :  { %v1888_v48 = vadd.f32 %v1887_v44, %v4280_v5  ;;  %v4511_v5 = vpop.f32.mrf.mxu0 }
 0x372   :  { %2376 = vmatmul.bf16.gmra.mxu1 %v2107_v37 }
 0x373   :  { %v1976_v8 = vpop.f32.mrf.mxu3 }
 0x374   :  { %v1977_v23 = vadd.f32 %v1976_v8, %v1888_v48 }
 0x376   :  { %v2053_v17 = vmax.f32 %v1977_v23, 0.0  ;;  %v4854_v23 = vld [vmem:[#allocation44_spill] sm:$0xff] }
 0x378   :  { %v1889_v10 = vpop.f32.mrf.mxu2 }
 0x379   :  { %v1890_v51 = vadd.f32 %v1889_v10, %v1801_v34  ;;  %2332 = vmatmul.bf16.gmra.mxu0 %v4433_v7  ;;  %v1806_v7 = vadd.f32 %v4316_v57, %v1717_v16  ;;  %v1722_v57 = vadd.f32 %v4335_v6, %v4185_v63 }
 0x37b   :  { %v1978_v29 = vpop.f32.mrf.mxu3  ;;  %v1811_v53 = vadd.f32 %v4853_v20, %v1722_v57 }
 0x37c   :  { %v1979_v47 = vadd.f32 %v1978_v29, %v1890_v51  ;;  %v4855_v51 = vld [vmem:[#allocation45_spill] sm:$0xff] }
 0x37d   :  { %1931 = vmatmul.bf16.gmra.mxu2 %v4107_v19  ;;  %v4518_v19 = vpop.f32.mrf.mxu0 }
 0x37e   :  { %v2055_v50 = vmax.f32 %v1979_v47, 0.0 }
 0x380   :  { %2020 = vmatmul.bf16.gmra.mxu3 %v4116_v36  ;;  %v2109_v61 = vpack.c.bf16 %v2055_v50, %v2053_v17  ;;  %v1892_v54 = vpop.f32.mrf.mxu2  ;;  %v1727_v50 = vadd.f32 %v4353_v55, %v4185_v63  ;;  %v1732_v55 = vadd.f32 %v4367_v45, %v4185_v63 }
 0x381   :  { %v1893_v39 = vadd.f32 %v1892_v54, %v4301_v38 }
 0x382   :  { %2381 = vmatmul.bf16.gmra.mxu1 %v2109_v61  ;;  %v4856_v61 = vld [vmem:[#allocation28_spill] sm:$0xff] }
 0x383   :  { %v1981_v27 = vpop.f32.mrf.mxu3 }
 0x384   :  { %v1982_v22 = vadd.f32 %v1981_v27, %v1893_v39  ;;  %v4857_v27 = vld [vmem:[#allocation31_spill] sm:$0xff] }
 0x385   :  { %v4524_v1 = vpop.f32.mrf.mxu0 }
 0x386   :  { %v2057_v21 = vmax.f32 %v1982_v22, 0.0 }
 0x388   :  { %v1894_v58 = vpop.f32.mrf.mxu2 }
 0x389   :  { %v1895_v59 = vadd.f32 %v1894_v58, %v1806_v7  ;;  %2337 = vmatmul.bf16.gmra.mxu0 %v4450_v0 }
 0x38b   :  { %v1983_v56 = vpop.f32.mrf.mxu3 }
 0x38c   :  { %v1984_v36 = vadd.f32 %v1983_v56, %v1895_v59 }
 0x38d   :  { %1936 = vmatmul.bf16.gmra.mxu2 %v4850_v32  ;;  %v4531_v6 = vpop.f32.mrf.mxu0 }
 0x38e   :  { %v2059_v11 = vmax.f32 %v1984_v36, 0.0 }
 0x390   :  { %2025 = vmatmul.bf16.gmra.mxu3 %v4851_v30  ;;  %v2111_v14 = vpack.c.bf16 %v2059_v11, %v2057_v21  ;;  %v1897_v13 = vpop.f32.mrf.mxu2 }
 0x391   :  { %v1898_v0 = vadd.f32 %v1897_v13, %v4852_v3  ;;  %v1821_v13 = vadd.f32 %v4369_v42, %v1732_v55 }
 0x392   :  { %2386 = vmatmul.bf16.gmra.mxu1 %v2111_v14  ;;  %v4543_v14 = vpop.f32.mrf.mxu1 }
 0x393   :  { %v1986_v38 = vpop.f32.mrf.mxu3 }
 0x394   :  { %v1987_v44 = vadd.f32 %v1986_v38, %v1898_v0 }
 0x395   :  { %v4537_v39 = vpop.f32.mrf.mxu0 }
 0x396   :  { %v2061_v34 = vmax.f32 %v1987_v44, 0.0 }
 0x398   :  { %v1899_v37 = vpop.f32.mrf.mxu2 }
 0x399   :  { %v1900_v8 = vadd.f32 %v1899_v37, %v1811_v53  ;;  %2342 = vmatmul.bf16.gmra.mxu0 %v4464_v40  ;;  %v1816_v40 = vadd.f32 %v4857_v27, %v1727_v50 }
 0x39b   :  { %v1988_v35 = vpop.f32.mrf.mxu3 }
 0x39c   :  { %v1989_v48 = vadd.f32 %v1988_v35, %v1900_v8 }
 0x39d   :  { %1941 = vmatmul.bf16.gmra.mxu2 %v4854_v23 }
 0x39e   :  { %v2063_v10 = vmax.f32 %v1989_v48, 0.0  ;;  %v1737_v48 = vadd.f32 %v4384_v62, %v4185_v63 }
 0x3a0   :  { %2030 = vmatmul.bf16.gmra.mxu3 %v4855_v51  ;;  %v2113_v29 = vpack.c.bf16 %v2063_v10, %v2061_v34  ;;  %v1902_v47 = vpop.f32.mrf.mxu2  ;;  %v4858_v10 = vld [vmem:[#allocation10_spill] sm:$0xff]  ;;  %v4859_v51 = vld [vmem:[#allocation11_spill] sm:$0xff] }
 0x3a1   :  { %v1903_v54 = vadd.f32 %v1902_v47, %v4856_v61 }
 0x3a2   :  { %2391 = vmatmul.bf16.gmra.mxu1 %v2113_v29  ;;  %v1826_v29 = vadd.f32 %v4859_v51, %v1737_v48  ;;  %v4861_v48 = vld [vmem:[#allocation12_spill] sm:$0xff] }
 0x3a3   :  { %v1991_v17 = vpop.f32.mrf.mxu3 }
 0x3a4   :  { %v1992_v7 = vadd.f32 %v1991_v17, %v1903_v54 }
 0x3a6   :  { %v2065_v56 = vmax.f32 %v1992_v7, 0.0 }
 0x3a8   :  { %v1904_v16 = vpop.f32.mrf.mxu2 }
 0x3a9   :  { %v1905_v58 = vadd.f32 %v1904_v16, %v1816_v40  ;;  %2347 = vmatmul.bf16.gmra.mxu0 %v4474_v25  ;;  %v4549_v25 = vld [vmem:[%s4730_s6] ss:$0 sm:$0xff]  ;;  %v4565_v40 = vpop.f32.mrf.mxu0 }
 0x3aa   :  { %v2274_v53 = vadd.f32 %v4549_v25, %v4493_v28  ;;  %v2276_v34 = vadd.f32 %v4549_v25, %v4498_v18  ;;  %v2279_v62 = vadd.f32 %v4549_v25, %v4506_v4 }
 0x3ab   :  { %v1993_v22 = vpop.f32.mrf.mxu3 }
 0x3ac   :  { %v1994_v59 = vadd.f32 %v1993_v22, %v1905_v58 }
 0x3ae   :  { %v2067_v36 = vmax.f32 %v1994_v59, 0.0 }
 0x3b0   :  { %v2115_v21 = vpack.c.bf16 %v2067_v36, %v2065_v56  ;;  %v1907_v11 = vpop.f32.mrf.mxu2  ;;  %v1742_v36 = vadd.f32 %v4398_v2, %v4185_v63 }
 0x3b1   :  { %v1908_v30 = vadd.f32 %v1907_v11, %v4361_v24  ;;  %v4577_v11 = vpop.f32.mrf.mxu0 }
 0x3b2   :  { %2396 = vmatmul.bf16.gmra.mxu1 %v2115_v21  ;;  %v2281_v21 = vadd.f32 %v4549_v25, %v4511_v5  ;;  %v1831_v55 = vadd.f32 %v4400_v52, %v1742_v36  ;;  %v2284_v5 = vadd.f32 %v4549_v25, %v4518_v19  ;;  %v2286_v19 = vadd.f32 %v4549_v25, %v4524_v1 }
 0x3b3   :  { %v1996_v32 = vpop.f32.mrf.mxu3 }
 0x3b4   :  { %v1997_v57 = vadd.f32 %v1996_v32, %v1908_v30 }
 0x3b6   :  { %v2069_v45 = vmax.f32 %v1997_v57, 0.0 }
 0x3b8   :  { %v1909_v38 = vpop.f32.mrf.mxu2 }
 0x3b9   :  { %v1910_v3 = vadd.f32 %v1909_v38, %v1821_v13 }
 0x3bb   :  { %v1998_v0 = vpop.f32.mrf.mxu3 }
 0x3bc   :  { %v1999_v20 = vadd.f32 %v1998_v0, %v1910_v3 }
 0x3be   :  { %v2071_v37 = vmax.f32 %v1999_v20, 0.0 }
 0x3bf   :  { %v2362_v24 = vpop.f32.mrf.mxu1 }
 0x3c0   :  { %v2117_v44 = vpack.c.bf16 %v2071_v37, %v2069_v45  ;;  %v2363_v8 = vadd.f32 %v2362_v24, %v2274_v53  ;;  %v1912_v35 = vpop.f32.mrf.mxu2  ;;  %v4585_v37 = vpop.f32.mrf.mxu0 }
 0x3c1   :  { %v1913_v28 = vadd.f32 %v1912_v35, %v4858_v10 }
 0x3c2   :  { %2442 = vst [vmem:[%s4731_s7] sm:$0xff] %v2363_v8  ;;  %2401 = vmatmul.bf16.gmra.mxu1 %v2117_v44  ;;  %v1747_v44 = vadd.f32 %v4415_v15, %v4185_v63  ;;  %v4860_v8 = vld [vmem:[#allocation34_spill] sm:$0xff]  ;;  %v2289_v15 = vadd.f32 %v4549_v25, %v4531_v6 }
 0x3c3   :  { %v2001_v42 = vpop.f32.mrf.mxu3 }
 0x3c4   :  { %v2002_v50 = vadd.f32 %v2001_v42, %v1913_v28 }
 0x3c6   :  { %v2073_v18 = vmax.f32 %v2002_v50, 0.0 }
 0x3c7   :  { %v2364_v23 = vpop.f32.mrf.mxu1 }
 0x3c8   :  { %v2365_v47 = vadd.f32 %v2364_v23, %v2276_v34  ;;  %v1914_v17 = vpop.f32.mrf.mxu2  ;;  %v1836_v34 = vadd.f32 %v4861_v48, %v1747_v44 }
 0x3c9   :  { %v1915_v61 = vadd.f32 %v1914_v17, %v1826_v29 }
 0x3ca   :  { %2443 = vst [vmem:[%s4731_s7 + $0x8] sm:$0xff] %v2365_v47  ;;  %v2300_v47 = vpop.f32.mrf.mxu0 }
 0x3cb   :  { %v2003_v54 = vpop.f32.mrf.mxu3 }
 0x3cc   :  { %v2004_v27 = vadd.f32 %v2003_v54, %v1915_v61 }
 0x3ce   :  { %v2075_v16 = vmax.f32 %v2004_v27, 0.0 }
 0x3cf   :  { %v2367_v7 = vpop.f32.mrf.mxu1 }
 0x3d0   :  { %v2119_v58 = vpack.c.bf16 %v2075_v16, %v2073_v18  ;;  %v2368_v22 = vadd.f32 %v2367_v7, %v2279_v62  ;;  %v1917_v59 = vpop.f32.mrf.mxu2  ;;  %v1752_v16 = vadd.f32 %v4429_v43, %v4185_v63  ;;  %v2294_v43 = vadd.f32 %v4549_v25, %v4565_v40  ;;  %v4862_v40 = vld [vmem:[#allocation13_spill] sm:$0xff] }
 0x3d1   :  { %v1918_v4 = vadd.f32 %v1917_v59, %v4392_v9 }
 0x3d2   :  { %2444 = vst [vmem:[%s4731_s7 + $0x10] sm:$0xff] %v2368_v22  ;;  %2406 = vmatmul.bf16.gmra.mxu1 %v2119_v58  ;;  %v2303_v7 = vpop.f32.mrf.mxu0  ;;  %v2291_v58 = vadd.f32 %v4549_v25, %v4537_v39  ;;  %v1841_v59 = vadd.f32 %v4431_v33, %v1752_v16 }
 0x3d3   :  { %v2006_v56 = vpop.f32.mrf.mxu3 }
 0x3d4   :  { %v2007_v38 = vadd.f32 %v2006_v56, %v1918_v4 }
 0x3d6   :  { %v2077_v0 = vmax.f32 %v2007_v38, 0.0 }
 0x3d7   :  { %v2369_v32 = vpop.f32.mrf.mxu1 }
 0x3d8   :  { %v2370_v30 = vadd.f32 %v2369_v32, %v2281_v21  ;;  %v1919_v13 = vpop.f32.mrf.mxu2 }
 0x3d9   :  { %v1920_v57 = vadd.f32 %v1919_v13, %v1831_v55 }
 0x3da   :  { %2445 = vst [vmem:[%s4731_s7 + $0x18] sm:$0xff] %v2370_v30  ;;  %v2305_v13 = vpop.f32.mrf.mxu0 }
 0x3db   :  { %v2008_v3 = vpop.f32.mrf.mxu3 }
 0x3dc   :  { %v2009_v2 = vadd.f32 %v2008_v3, %v1920_v57 }
 0x3de   :  { %v2079_v9 = vmax.f32 %v2009_v2, 0.0  ;;  %v1757_v2 = vadd.f32 %v4446_v49, %v4185_v63  ;;  %v2299_v49 = vadd.f32 %v4549_v25, %v4585_v37 }
 0x3df   :  { %v2372_v20 = vpop.f32.mrf.mxu1 }
 0x3e0   :  { %v2121_v53 = vpack.c.bf16 %v2079_v9, %v2077_v0  ;;  %v2373_v45 = vadd.f32 %v2372_v20, %v2284_v5  ;;  %v1922_v52 = vpop.f32.mrf.mxu2  ;;  %v2296_v5 = vadd.f32 %v4549_v25, %v4577_v11  ;;  %v4863_v20 = vld [vmem:[#allocation37_spill] sm:$0xff] }
 0x3e1   :  { %v1923_v35 = vadd.f32 %v1922_v52, %v4860_v8 }
 0x3e2   :  { %2446 = vst [vmem:[%s4731_s7 + $0x20] sm:$0xff] %v2373_v45  ;;  %2411 = vmatmul.bf16.gmra.mxu1 %v2121_v53  ;;  %v1846_v53 = vadd.f32 %v4863_v20, %v1757_v2  ;;  %v2308_v52 = vpop.f32.mrf.mxu0 }
 0x3e3   :  { %v2011_v24 = vpop.f32.mrf.mxu3 }
 0x3e4   :  { %v2012_v23 = vadd.f32 %v2011_v24, %v1923_v35 }
 0x3e6   :  { %v2081_v1 = vmax.f32 %v2012_v23, 0.0 }
 0x3e7   :  { %v2374_v42 = vpop.f32.mrf.mxu1 }
 0x3e8   :  { %v2375_v10 = vadd.f32 %v2374_v42, %v2286_v19  ;;  %v1924_v28 = vpop.f32.mrf.mxu2 }
 0x3e9   :  { %v1925_v51 = vadd.f32 %v1924_v28, %v1836_v34 }
 0x3ea   :  { %2447 = vst [vmem:[%s4731_s7 + $0x28] sm:$0xff] %v2375_v10 }
 0x3eb   :  { %v2013_v29 = vpop.f32.mrf.mxu3 }
 0x3ec   :  { %v2014_v17 = vadd.f32 %v2013_v29, %v1925_v51  ;;  %v2310_v51 = vpop.f32.mrf.mxu0  ;;  %v1762_v29 = vadd.f32 %v4460_v31, %v4185_v63  ;;  %v2304_v31 = vadd.f32 %v4549_v25, %v2303_v7 }
 0x3ee   :  { %v2083_v50 = vmax.f32 %v2014_v17, 0.0  ;;  %v2301_v17 = vadd.f32 %v4549_v25, %v2300_v47 }
 0x3ef   :  { %v2377_v61 = vpop.f32.mrf.mxu1 }
 0x3f0   :  { %v2123_v54 = vpack.c.bf16 %v2083_v50, %v2081_v1  ;;  %v2378_v27 = vadd.f32 %v2377_v61, %v2289_v15  ;;  %v1927_v62 = vpop.f32.mrf.mxu2  ;;  %v1851_v1 = vadd.f32 %v4462_v41, %v1762_v29 }
 0x3f1   :  { %v1928_v6 = vadd.f32 %v1927_v62, %v4423_v60 }
 0x3f2   :  { %2448 = vst [vmem:[%s4731_s7 + $0x30] sm:$0xff] %v2378_v27  ;;  %2416 = vmatmul.bf16.gmra.mxu1 %v2123_v54 }
 0x3f3   :  { %v2016_v18 = vpop.f32.mrf.mxu3 }
 0x3f4   :  { %v2017_v21 = vadd.f32 %v2016_v18, %v1928_v6  ;;  %v2313_v16 = vpop.f32.mrf.mxu0 }
 0x3f6   :  { %v2085_v30 = vmax.f32 %v2017_v21, 0.0 }
 0x3f7   :  { %v2379_v22 = vpop.f32.mrf.mxu1 }
 0x3f8   :  { %v2380_v56 = vadd.f32 %v2379_v22, %v2291_v58  ;;  %v1929_v36 = vpop.f32.mrf.mxu2 }
 0x3f9   :  { %v1930_v4 = vadd.f32 %v1929_v36, %v1841_v59  ;;  %v2306_v36 = vadd.f32 %v4549_v25, %v2305_v13 }
 0x3fa   :  { %2449 = vst [vmem:[%s4731_s7 + $0x38] sm:$0xff] %v2380_v56  ;;  %v1767_v56 = vadd.f32 %v4487_v26, %v4185_v63  ;;  %v2309_v63 = vadd.f32 %v4549_v25, %v2308_v52 }
 0x3fb   :  { %v2018_v32 = vpop.f32.mrf.mxu3 }
 0x3fc   :  { %v2019_v55 = vadd.f32 %v2018_v32, %v1930_v4  ;;  %v2315_v7 = vpop.f32.mrf.mxu0  ;;  %v1856_v32 = vadd.f32 %v4543_v14, %v1767_v56  ;;  %v2311_v14 = vadd.f32 %v4549_v25, %v2310_v51 }
 0x3fe   :  { %v2087_v39 = vmax.f32 %v2019_v55, 0.0 }
 0x3ff   :  { %v2382_v60 = vpop.f32.mrf.mxu1 }
 0x400   :  { %v2125_v38 = vpack.c.bf16 %v2087_v39, %v2085_v30  ;;  %v2383_v57 = vadd.f32 %v2382_v60, %v2294_v43  ;;  %v1932_v33 = vpop.f32.mrf.mxu2 }
 0x401   :  { %v1933_v0 = vadd.f32 %v1932_v33, %v4862_v40 }
 0x402   :  { %2450 = vst [vmem:[%s4731_s7 + $0x40] sm:$0xff] %v2383_v57  ;;  %2421 = vmatmul.bf16.gmra.mxu1 %v2125_v38 }
 0x403   :  { %v2021_v3 = vpop.f32.mrf.mxu3 }
 0x404   :  { %v2022_v44 = vadd.f32 %v2021_v3, %v1933_v0  ;;  %v2318_v3 = vpop.f32.mrf.mxu0  ;;  %v2314_v0 = vadd.f32 %v4549_v25, %v2313_v16 }
 0x406   :  { %v2089_v11 = vmax.f32 %v2022_v44, 0.0  ;;  %v2319_v44 = vadd.f32 %v4549_v25, %v2318_v3 }
 0x407   :  { %v2384_v9 = vpop.f32.mrf.mxu1 }
 0x408   :  { %v2385_v45 = vadd.f32 %v2384_v9, %v2296_v5  ;;  %v1934_v24 = vpop.f32.mrf.mxu2 }
 0x409   :  { %v1935_v19 = vadd.f32 %v1934_v24, %v1846_v53 }
 0x40a   :  { %2451 = vst [vmem:[%s4731_s7 + $0x48] sm:$0xff] %v2385_v45  ;;  %v2316_v45 = vadd.f32 %v4549_v25, %v2315_v7 }
 0x40b   :  { %v2023_v8 = vpop.f32.mrf.mxu3 }
 0x40c   :  { %v2024_v35 = vadd.f32 %v2023_v8, %v1935_v19  ;;  %v2320_v40 = vpop.f32.mrf.mxu0 }
 0x40e   :  { %v2091_v42 = vmax.f32 %v2024_v35, 0.0 }
 0x40f   :  { %v2387_v48 = vpop.f32.mrf.mxu1 }
 0x410   :  { %v2127_v34 = vpack.c.bf16 %v2091_v42, %v2089_v11  ;;  %v2388_v10 = vadd.f32 %v2387_v48, %v2299_v49  ;;  %v1937_v28 = vpop.f32.mrf.mxu2  ;;  %v2321_v49 = vadd.f32 %v4549_v25, %v2320_v40 }
 0x411   :  { %v1938_v37 = vadd.f32 %v1937_v28, %v4454_v12 }
 0x412   :  { %2452 = vst [vmem:[%s4731_s7 + $0x50] sm:$0xff] %v2388_v10  ;;  %2426 = vmatmul.bf16.gmra.mxu1 %v2127_v34 }
 0x413   :  { %v2026_v23 = vpop.f32.mrf.mxu3 }
 0x414   :  { %v2027_v54 = vadd.f32 %v2026_v23, %v1938_v37  ;;  %v2323_v53 = vpop.f32.mrf.mxu0 }
 0x415   :  { %v2324_v34 = vadd.f32 %v4549_v25, %v2323_v53 }
 0x416   :  { %v2093_v58 = vmax.f32 %v2027_v54, 0.0 }
 0x417   :  { %v2389_v15 = vpop.f32.mrf.mxu1 }
 0x418   :  { %v2390_v50 = vadd.f32 %v2389_v15, %v2301_v17  ;;  %v1939_v61 = vpop.f32.mrf.mxu2 }
 0x419   :  { %v1940_v27 = vadd.f32 %v1939_v61, %v1851_v1 }
 0x41a   :  { %2453 = vst [vmem:[%s4731_s7 + $0x58] sm:$0xff] %v2390_v50 }
 0x41b   :  { %v2028_v62 = vpop.f32.mrf.mxu3 }
 0x41c   :  { %v2029_v18 = vadd.f32 %v2028_v62, %v1940_v27  ;;  %v2325_v19 = vpop.f32.mrf.mxu0 }
 0x41d   :  { %v2326_v51 = vadd.f32 %v4549_v25, %v2325_v19 }
 0x41e   :  { %v2095_v47 = vmax.f32 %v2029_v18, 0.0 }
 0x41f   :  { %v2392_v6 = vpop.f32.mrf.mxu1 }
 0x420   :  { %v2129_v12 = vpack.c.bf16 %v2095_v47, %v2093_v58  ;;  %v2393_v22 = vadd.f32 %v2392_v6, %v2304_v31  ;;  %v1942_v59 = vpop.f32.mrf.mxu2 }
 0x421   :  { %v1943_v21 = vadd.f32 %v1942_v59, %v4468_v46 }
 0x422   :  { %2454 = vst [vmem:[%s4731_s7 + $0x60] sm:$0xff] %v2393_v22  ;;  %2431 = vmatmul.bf16.gmra.mxu1 %v2129_v12 }
 0x423   :  { %v2031_v41 = vpop.f32.mrf.mxu3 }
 0x424   :  { %v2032_v30 = vadd.f32 %v2031_v41, %v1943_v21  ;;  %v2328_v48 = vpop.f32.mrf.mxu0 }
 0x425   :  { %v2329_v15 = vadd.f32 %v4549_v25, %v2328_v48 }
 0x426   :  { %v2097_v26 = vmax.f32 %v2032_v30, 0.0 }
 0x427   :  { %v2394_v4 = vpop.f32.mrf.mxu1 }
 0x428   :  { %v2395_v55 = vadd.f32 %v2394_v4, %v2306_v36  ;;  %v1944_v43 = vpop.f32.mrf.mxu2 }
 0x429   :  { %v1945_v39 = vadd.f32 %v1944_v43, %v1856_v32 }
 0x42a   :  { %2455 = vst [vmem:[%s4731_s7 + $0x68] sm:$0xff] %v2395_v55 }
 0x42b   :  { %v2033_v60 = vpop.f32.mrf.mxu3 }
 0x42c   :  { %v2034_v38 = vadd.f32 %v2033_v60, %v1945_v39  ;;  %v2330_v23 = vpop.f32.mrf.mxu0 }
 0x42d   :  { %v2331_v61 = vadd.f32 %v4549_v25, %v2330_v23 }
 0x42e   :  { %v2099_v13 = vmax.f32 %v2034_v38, 0.0 }
 0x42f   :  { %v2397_v57 = vpop.f32.mrf.mxu1 }
 0x430   :  { %v2131_v46 = vpack.c.bf16 %v2099_v13, %v2097_v26  ;;  %v2398_v33 = vadd.f32 %v2397_v57, %v2309_v63 }
 0x432   :  { %2456 = vst [vmem:[%s4731_s7 + $0x70] sm:$0xff] %v2398_v33  ;;  %2436 = vmatmul.bf16.gmra.mxu1 %v2131_v46 }
 0x434   :  { %v2333_v37 = vpop.f32.mrf.mxu0 }
 0x435   :  { %v2334_v18 = vadd.f32 %v4549_v25, %v2333_v37 }
 0x437   :  { %v2399_v2 = vpop.f32.mrf.mxu1 }
 0x438   :  { %v2400_v5 = vadd.f32 %v2399_v2, %v2311_v14 }
 0x43a   :  { %2457 = vst [vmem:[%s4731_s7 + $0x78] sm:$0xff] %v2400_v5 }
 0x43c   :  { %v2335_v54 = vpop.f32.mrf.mxu0 }
 0x43d   :  { %v2336_v47 = vadd.f32 %v4549_v25, %v2335_v54 }
 0x43f   :  { %v2402_v9 = vpop.f32.mrf.mxu1 }
 0x440   :  { %v2403_v20 = vadd.f32 %v2402_v9, %v2314_v0 }
 0x442   :  { %2458 = vst [vmem:[%s4731_s7 + $0x80] sm:$0xff] %v2403_v20 }
 0x444   :  { %v2338_v58 = vpop.f32.mrf.mxu0 }
 0x445   :  { %v2339_v59 = vadd.f32 %v4549_v25, %v2338_v58 }
 0x447   :  { %v2404_v52 = vpop.f32.mrf.mxu1 }
 0x448   :  { %v2405_v24 = vadd.f32 %v2404_v52, %v2316_v45 }
 0x44a   :  { %2459 = vst [vmem:[%s4731_s7 + $0x88] sm:$0xff] %v2405_v24 }
 0x44c   :  { %v2340_v22 = vpop.f32.mrf.mxu0 }
 0x44d   :  { %v2341_v21 = vadd.f32 %v4549_v25, %v2340_v22 }
 0x44f   :  { %v2407_v8 = vpop.f32.mrf.mxu1 }
 0x450   :  { %v2408_v35 = vadd.f32 %v2407_v8, %v2319_v44 }
 0x452   :  { %2460 = vst [vmem:[%s4731_s7 + $0x90] sm:$0xff] %v2408_v35 }
 0x454   :  { %v2343_v36 = vpop.f32.mrf.mxu0 }
 0x455   :  { %v2344_v32 = vadd.f32 %v4549_v25, %v2343_v36 }
 0x457   :  { %v2409_v11 = vpop.f32.mrf.mxu1 }
 0x458   :  { %v2410_v42 = vadd.f32 %v2409_v11, %v2321_v49 }
 0x45a   :  { %2461 = vst [vmem:[%s4731_s7 + $0x98] sm:$0xff] %v2410_v42 }
 0x45c   :  { %v2345_v55 = vpop.f32.mrf.mxu0 }
 0x45d   :  { %v2346_v39 = vadd.f32 %v4549_v25, %v2345_v55 }
 0x45f   :  { %v2412_v10 = vpop.f32.mrf.mxu1 }
 0x460   :  { %v2413_v28 = vadd.f32 %v2412_v10, %v2324_v34 }
 0x462   :  { %2462 = vst [vmem:[%s4731_s7 + $0xa0] sm:$0xff] %v2413_v28 }
 0x464   :  { %v2348_v63 = vpop.f32.mrf.mxu0 }
 0x465   :  { %v2349_v26 = vadd.f32 %v4549_v25, %v2348_v63 }
 0x467   :  { %v2414_v29 = vpop.f32.mrf.mxu1 }
 0x468   :  { %v2415_v17 = vadd.f32 %v2414_v29, %v2326_v51 }
 0x46a   :  { %2463 = vst [vmem:[%s4731_s7 + $0xa8] sm:$0xff] %v2415_v17 }
 0x46c   :  { %v2350_v46 = vpop.f32.mrf.mxu0 }
 0x46d   :  { %v2351_v33 = vadd.f32 %v4549_v25, %v2350_v46 }
 0x46f   :  { %v2417_v1 = vpop.f32.mrf.mxu1 }
 0x470   :  { %v2418_v50 = vadd.f32 %v2417_v1, %v2329_v15 }
 0x472   :  { %2464 = vst [vmem:[%s4731_s7 + $0xb0] sm:$0xff] %v2418_v50 }
 0x477   :  { %v2419_v27 = vpop.f32.mrf.mxu1 }
 0x478   :  { %v2420_v62 = vadd.f32 %v2419_v27, %v2331_v61 }
 0x47a   :  { %2465 = vst [vmem:[%s4731_s7 + $0xb8] sm:$0xff] %v2420_v62 }
 0x47f   :  { %v2422_v16 = vpop.f32.mrf.mxu1 }
 0x480   :  { %v2423_v31 = vadd.f32 %v2422_v16, %v2334_v18 }
 0x482   :  { %2466 = vst [vmem:[%s4731_s7 + $0xc0] sm:$0xff] %v2423_v31 }
 0x487   :  { %v2424_v6 = vpop.f32.mrf.mxu1 }
 0x488   :  { %v2425_v12 = vadd.f32 %v2424_v6, %v2336_v47 }
 0x48a   :  { %2467 = vst [vmem:[%s4731_s7 + $0xc8] sm:$0xff] %v2425_v12 }
 0x48f   :  { %v2427_v41 = vpop.f32.mrf.mxu1 }
 0x490   :  { %v2428_v56 = vadd.f32 %v2427_v41, %v2339_v59 }
 0x492   :  { %2468 = vst [vmem:[%s4731_s7 + $0xd0] sm:$0xff] %v2428_v56 }
 0x497   :  { %v2429_v7 = vpop.f32.mrf.mxu1 }
 0x498   :  { %v2430_v4 = vadd.f32 %v2429_v7, %v2341_v21 }
 0x49a   :  { %2469 = vst [vmem:[%s4731_s7 + $0xd8] sm:$0xff] %v2430_v4 }
 0x49f   :  { %v2432_v43 = vpop.f32.mrf.mxu1 }
 0x4a0   :  { %v2433_v30 = vadd.f32 %v2432_v43, %v2344_v32 }
 0x4a2   :  { %2470 = vst [vmem:[%s4731_s7 + $0xe0] sm:$0xff] %v2433_v30 }
 0x4a7   :  { %v2434_v60 = vpop.f32.mrf.mxu1 }
 0x4a8   :  { %v2435_v38 = vadd.f32 %v2434_v60, %v2346_v39 }
 0x4aa   :  { %2471 = vst [vmem:[%s4731_s7 + $0xe8] sm:$0xff] %v2435_v38 }
 0x4af   :  { %v2437_v13 = vpop.f32.mrf.mxu1 }
 0x4b0   :  { %v2438_v57 = vadd.f32 %v2437_v13, %v2349_v26 }
 0x4b2   :  { %2472 = vst [vmem:[%s4731_s7 + $0xf0] sm:$0xff] %v2438_v57 }
 0x4b7   :  { %v2439_v3 = vpop.f32.mrf.mxu1 }
 0x4b8   :  { %v2440_v14 = vadd.f32 %v2439_v3, %v2351_v33 }
 0x4ba   :  { %2473 = vst [vmem:[%s4731_s7 + $0xf8] sm:$0xff] %v2440_v14 }
 0x4bb   :  { %2478 = vsyncpa [#allocation3], 1 }
 0x4bc   :  { %2479 = vsyncpa [#allocation5], 1 }

</bundles_post_ra>
